<compile_context>
chip_gen: v7x
topology: tpu7x:2x2x1
jax: 0.10.0
libtpu: 0.0.40
codegen_flags: <defaults>
</compile_context>

<pallas_src>
import jax
import jax.numpy as jnp
from jax.experimental import pallas as pl
from jax.experimental.pallas import tpu as pltpu


def _net_kernel(params_ref, x_ref, o_ref):
    # params_ref (SMEM, float32[7]), pre-scaled by 2.45 = 4.9 * 0.5:
    #   [hg1, hg2, hb1, og3, og4, og5, ob2]
    hg1 = params_ref[0]
    hg2 = params_ref[1]
    hb1 = params_ref[2]
    og3 = params_ref[3]
    og4 = params_ref[4]
    og5 = params_ref[5]
    ob2 = params_ref[6]

    x1 = x_ref[0]          # (tm, W)
    x2 = x_ref[1]          # (tm, W)

    # sigmoid(4.9*z) == 0.5 + 0.5*tanh(2.45*z); 2.45 already folded into params.
    h1 = 0.5 + 0.5 * jnp.tanh(x1 * hg1 + x2 * hg2 + hb1)
    o_ref[...] = 0.5 + 0.5 * jnp.tanh(x1 * og3 + h1 * og4 + x2 * og5 + ob2)


def _pick_tile_rows(H, W, *, dtype_bytes=4, target_bytes=2 << 20, row_cap=512):
    """Largest row tile with output tile <= ~2 MiB, a multiple of 8 that
    divides H, and <= row_cap (so H=1024 still yields >=2 grid steps for
    megacore sharding).  Falls back to full H (full-extent block always
    satisfies the (8,128) rule)."""
    max_rows = max(8, min(row_cap, target_bytes // max(1, W * dtype_bytes)))
    if H <= max_rows:
        return H
    tm = (max_rows // 8) * 8
    while tm >= 8 and H % tm != 0:
        tm -= 8
    return H if tm < 8 else tm


def net_forward(x, params):
    """x: (2, H, W) float32; params: (7,) float32 = [g1, g2, g3, g4, g5, b1, b2]."""
    assert x.shape[0] == 2, "forward indexes x[0] and x[1]"
    _, H, W = x.shape

    g1, g2, g3, g4, g5, b1, b2 = (params[i] for i in range(7))
    s = jnp.float32(4.9 * 0.5)  # fold gain + tanh half-angle (scalar-only work)
    fused_params = jnp.stack(
        [s * g1, s * g2, s * b1, s * g3, s * g4, s * g5, s * b2]
    ).astype(jnp.float32)

    tm = _pick_tile_rows(H, W)
    grid = (H // tm,)

    return pl.pallas_call(
        _net_kernel,
        out_shape=jax.ShapeDtypeStruct((H, W), x.dtype),
        grid=grid,
        in_specs=[
            pl.BlockSpec(memory_space=pltpu.SMEM),            # 7 scalar params
            pl.BlockSpec((2, tm, W), lambda i: (0, i, 0)),    # both inputs, one DMA
        ],
        out_specs=pl.BlockSpec((tm, W), lambda i: (i, 0)),
        compiler_params=pltpu.CompilerParams(
            dimension_semantics=("parallel",),
        ),
    )(fused_params, x)


def _reference_forward(x, params):
    # Exp-based sigmoid, matching torch.sigmoid's formulation.
    g1, g2, g3, g4, g5, b1, b2 = (params[i] for i in range(7))
    x1, x2 = x[0], x[1]
    h1 = jax.nn.sigmoid(4.9 * (x1 * g1 + x2 * g2 + b1))
    return jax.nn.sigmoid(4.9 * (x1 * g3 + h1 * g4 + x2 * g5 + b2))


if __name__ == "__main__":
    key = jax.random.PRNGKey(0)
    k_params, k_x1, k_x2 = jax.random.split(key, 3)

    # Deterministic stand-in for the torch.randn(1) parameter init:
    # params = [g1, g2, g3, g4, g5, b1, b2]
    params = jax.random.normal(k_params, (7,), dtype=jnp.float32)

    # Tiled path: (2, 1024, 256) -> grid of 2 row-tiles of 512 rows each.
    x = jax.random.normal(k_x1, (2, 1024, 256), dtype=jnp.float32)
    out = jax.block_until_ready(net_forward(x, params))
    ref = _reference_forward(x, params)
    assert out.shape == ref.shape == (1024, 256)
    assert out.dtype == jnp.float32
    assert jnp.allclose(out, ref, atol=1e-5, rtol=1e-5)

    # Tiny full-block fallback path (toy 8x128 payload, single grid step).
    x_small = jax.random.normal(k_x2, (2, 8, 128), dtype=jnp.float32)
    out_small = jax.block_until_ready(net_forward(x_small, params))
    ref_small = _reference_forward(x_small, params)
    assert out_small.shape == (8, 128)
    assert jnp.allclose(out_small, ref_small, atol=1e-5, rtol=1e-5)

    print("KERNEL_OK")
</pallas_src>

<mosaic_0001>
module attributes {stable_mosaic.version = 11 : i64} {
  func.func @_net_kernel(%arg0: i32, %arg1: memref<7xf32, #tpu.memory_space<smem>>, %arg2: memref<2x512x256xf32, #tpu.memory_space<vmem>>, %arg3: memref<512x256xf32, #tpu.memory_space<vmem>>) attributes {dimension_semantics = [#tpu.dimension_semantics<parallel>], iteration_bounds = array<i64: 2>, scalar_prefetch = 0 : i64, scratch_operands = 0 : i64, tpu.core_type = #tpu.core_type<tc>, window_params = [{transform_indices = @transform_0, window_bounds = array<i64: 7>}, {transform_indices = @transform_1, window_bounds = array<i64: 2, 512, 256>}, {transform_indices = @transform_2, window_bounds = array<i64: 512, 256>}]} {
    %c0 = arith.constant 0 : index
    %0 = memref.load %arg1[%c0] : memref<7xf32, #tpu.memory_space<smem>>
    %c1 = arith.constant 1 : index
    %1 = memref.load %arg1[%c1] : memref<7xf32, #tpu.memory_space<smem>>
    %c2 = arith.constant 2 : index
    %2 = memref.load %arg1[%c2] : memref<7xf32, #tpu.memory_space<smem>>
    %c3 = arith.constant 3 : index
    %3 = memref.load %arg1[%c3] : memref<7xf32, #tpu.memory_space<smem>>
    %c4 = arith.constant 4 : index
    %4 = memref.load %arg1[%c4] : memref<7xf32, #tpu.memory_space<smem>>
    %c5 = arith.constant 5 : index
    %5 = memref.load %arg1[%c5] : memref<7xf32, #tpu.memory_space<smem>>
    %c6 = arith.constant 6 : index
    %6 = memref.load %arg1[%c6] : memref<7xf32, #tpu.memory_space<smem>>
    %c0_0 = arith.constant 0 : index
    %c0_1 = arith.constant 0 : index
    %c0_2 = arith.constant 0 : index
    %7 = vector.load %arg2[%c0_0, %c0_1, %c0_2] : memref<2x512x256xf32, #tpu.memory_space<vmem>>, vector<1x512x256xf32>
    %8 = vector.shape_cast %7 : vector<1x512x256xf32> to vector<512x256xf32>
    %c1_3 = arith.constant 1 : index
    %c0_4 = arith.constant 0 : index
    %c0_5 = arith.constant 0 : index
    %9 = vector.load %arg2[%c1_3, %c0_4, %c0_5] : memref<2x512x256xf32, #tpu.memory_space<vmem>>, vector<1x512x256xf32>
    %10 = vector.shape_cast %9 : vector<1x512x256xf32> to vector<512x256xf32>
    %11 = vector.broadcast %0 : f32 to vector<512x256xf32>
    %12 = arith.mulf %8, %11 : vector<512x256xf32>
    %13 = vector.broadcast %1 : f32 to vector<512x256xf32>
    %14 = arith.mulf %10, %13 : vector<512x256xf32>
    %15 = arith.addf %12, %14 : vector<512x256xf32>
    %16 = vector.broadcast %2 : f32 to vector<512x256xf32>
    %17 = arith.addf %15, %16 : vector<512x256xf32>
    %18 = math.tanh %17 : vector<512x256xf32>
    %cst = arith.constant 5.000000e-01 : f32
    %19 = vector.broadcast %cst : f32 to vector<512x256xf32>
    %20 = arith.mulf %19, %18 : vector<512x256xf32>
    %cst_6 = arith.constant 5.000000e-01 : f32
    %21 = vector.broadcast %cst_6 : f32 to vector<512x256xf32>
    %22 = arith.addf %21, %20 : vector<512x256xf32>
    %23 = vector.broadcast %3 : f32 to vector<512x256xf32>
    %24 = arith.mulf %8, %23 : vector<512x256xf32>
    %25 = vector.broadcast %4 : f32 to vector<512x256xf32>
    %26 = arith.mulf %22, %25 : vector<512x256xf32>
    %27 = arith.addf %24, %26 : vector<512x256xf32>
    %28 = vector.broadcast %5 : f32 to vector<512x256xf32>
    %29 = arith.mulf %10, %28 : vector<512x256xf32>
    %30 = arith.addf %27, %29 : vector<512x256xf32>
    %31 = vector.broadcast %6 : f32 to vector<512x256xf32>
    %32 = arith.addf %30, %31 : vector<512x256xf32>
    %33 = math.tanh %32 : vector<512x256xf32>
    %cst_7 = arith.constant 5.000000e-01 : f32
    %34 = vector.broadcast %cst_7 : f32 to vector<512x256xf32>
    %35 = arith.mulf %34, %33 : vector<512x256xf32>
    %cst_8 = arith.constant 5.000000e-01 : f32
    %36 = vector.broadcast %cst_8 : f32 to vector<512x256xf32>
    %37 = arith.addf %36, %35 : vector<512x256xf32>
    %c0_9 = arith.constant 0 : index
    %c0_10 = arith.constant 0 : index
    %38 = vector.load %arg3[%c0_9, %c0_10] : memref<512x256xf32, #tpu.memory_space<vmem>>, vector<512x256xf32>
    tpu.vector_store %arg3[%c0_9, %c0_10], %37 {strides = array<i32>} : memref<512x256xf32, #tpu.memory_space<vmem>>, vector<512x256xf32>,
    return
  }
  func.func @transform_0(%arg0: i32) -> i32 {
    %c0_i32 = arith.constant 0 : i32
    %c0_i32_0 = arith.constant 0 : i32
    return %c0_i32 : i32
  }
  func.func @transform_1(%arg0: i32) -> (i32, i32, i32) {
    %c0_i32 = arith.constant 0 : i32
    %c0_i32_0 = arith.constant 0 : i32
    %c0_i32_1 = arith.constant 0 : i32
    return %c0_i32, %arg0, %c0_i32_0 : i32, i32, i32
  }
  func.func @transform_2(%arg0: i32) -> (i32, i32) {
    %c0_i32 = arith.constant 0 : i32
    %c0_i32_0 = arith.constant 0 : i32
    return %arg0, %c0_i32 : i32, i32
  }
}

</mosaic_0001>

<bundles_post_ra>
// kernel: tpu_custom_call.1
= control target key start
LH: loop header
LB: loop body
LE: loop exit
PB: predicated region body
PF: predicated region fallthrough
CT: control target
= control target key end

     0   :  { %7 = vsyncpa [#allocation5], 0  ;;  %s6071_s0 = inlined_call_operand.hbm [shape: f32[7], index: 0, kind: input, shape index: {}]   ;;  %s6072_s1 = inlined_call_operand.hbm [shape: f32[2,1024,256], index: 1, kind: input, shape index: {}]   ;;  %s6073_s2 = inlined_call_operand.hbm [shape: f32[1024,256], index: 2, kind: output, shape index: {}]  }
   0x1   :  { %8 = vsyncpa [#allocation3], 0 }
   0x2   :  { %10 = vsyncpa [#allocation3 + $0x1], 0 }
   0x3   :  { %11 = vsyncpa [#allocation4], 0 }
   0x4   :  { %13 = vsyncpa [#allocation4 + $0x1], 0  ;;  %s3596_s9 = smov 0   ;;  %s3598_s10 = smov 0  }
   0x5   :  { %s3600_s11 = smov 0   ;;  %s3602_s12 = smov 0  }
   0x6 LB: > { %s3617_s13 = sadd.s32 4294967295, %s3569_s12   ;;  %s2749_s14 = sadd.s32 4294967294, %s3569_s12   ;;  %s3569_s12 = sphi %s3602_s12, %s6082_s12   ;;  %s3565_s11 = sphi %s3600_s11, %s6081_s11   ;;  %s3561_s10 = sphi %s3598_s10, %s6080_s10   ;;  %s3557_s9 = sphi %s3596_s9, %s6079_s9  }
   0x7   : > { %s3621_s15 = sadd.s32 1, %s3569_s12   ;;  %s47_s16 = sadd.s32 1, %s3565_s11 }
   0x8   : > { %s44_s17 = ssub.s32 %s3569_s12, %s3621_s15  ;;  %p54_p0 = scmp.ne.s32.totalorder %s3565_s11, %s3561_s10 }
   0x9   : > { %p45_p1 = scmp.eq.s32.totalorder %s44_s17, 0  ;;  %p55_p2 = scmp.eq.s32.totalorder %s3569_s12, 0 }
   0xa   : > { %p60_p3 = scmp.ne.s32.totalorder %s3561_s10, %s3557_s9  ;;  %p61_p4 = scmp.eq.s32.totalorder %s3617_s13, 0 }
   0xb   : > { %s3633_s18 = scalar_select %p45_p1, %s3565_s11, %s47_s16  }
   0xc   : > { %p3635_p5 = por %p55_p2, %p54_p0  ;;  %p3641_p6 = por %p61_p4, %p60_p3 }
   0xd   : > { %p84_p7 = scmp.eq.s32.totalorder %s3617_s13, 1  ;;  %p90_p8 = scmp.eq.s32.totalorder %s2749_s14, 1 }
   0xe   : > { %p2750_p9 = scmp.ge.s32.totalorder %s3569_s12, 1  ;;  %p97_p10 = scmp.lt.s32.totalorder %s3569_s12, 3 }
   0xf   : > { %p3648_p11 = por %p84_p7, %p54_p0  ;;  %p3652_p12 = por %p90_p8, %p60_p3 }
  0x10   : > { %p3656_p13 = pnand %p2750_p9, %p97_p10  ;;  %s3486_s26 = scalar_lea.hbm %s6071_s0, 16 }
  0x11   : > { %p3487_p0 = scmp.ne.s32.totalorder %s6071_s0, %s3486_s26  ;;  %p3493_p9 = scmp.lt.u32.totalorder %s3486_s26, %s6071_s0 }
  0x12   : > { %p2922_p1 = pneg %p3656_p13 }
  0x14   : > { %p2923_p2 = pnand %p2922_p1, %p61_p4 }
  0x16   : > { %p3488_p3 = pneg %p2923_p2 }
  0x18   : > { %p3489_p7 = pnand %p3488_p3, %p3487_p0 }
  0x1a   : > { %p3490_p8 = pneg %p3489_p7 }
  0x1c   : > { %p3495_p10 = pnand %p3493_p9, %p3490_p8 }
  0x1e   : > { %3498 = shalt.err (!%p3495_p10)
}
  0x1f   : > { %s3571_s3 = smov [#allocation2]   ;;  %p2752_p1 = scmp.ge.s32.totalorder %s3569_s12, 2 }
  0x20   : > { %2925 = dma.hbm_to_smem (!%p2923_p2), %s6071_s0, 16, %s3571_s3, [#allocation5]  }
  0x21   : > { %115 = sbr.rel (%p2752_p1) target bundleno = 53 (0x35), region = 20 }
  0x28   : > { %s119_s6 = sand.u32 1, %s3565_s11   ;;  %s2904_s7 = sshll.u32 %s3569_s12, 14 }
  0x29   : > { %s2753_s8 = sshll.u32 %s119_s6, 11  ;;  %s130_s17 = scalar_lea.hbm %s6072_s1, %s2904_s7 }
  0x2a   : > { %s2909_s24 = scalar_select %p3635_p5, [#allocation0], [#allocation10] }
  0x2b   : > { %s123_s25 = scalar_lea.vmem [#allocation6], %s2753_s8  ;;  %s3572_s28 = smov 32768  }
  0x2c   : > { %s143_s26 = sshll.u32 %s123_s25, 4  ;;  %s135_s27 = sld [smem:[%s2909_s24]]   ;;  %s144_s26 = int_to_ptr.vmem [resolvable:$true] %s143_s26 }
  0x2d   : > { %2910 = sst [smem:[#allocation9]] (%p3635_p5), %s3572_s28  ;;  %s3573_s29 = smov 16384  }
  0x2e   : > { %2911 = sst [smem:[#allocation9 + $0x1]] (%p3635_p5), %s3573_s29  ;;  %s3574_s30 = smov 64  }
  0x2f   : > { %2912 = sst [smem:[#allocation9 + $0x2]] (%p3635_p5), %s3574_s30  ;;  %s3575_s3 = smov 256  }
  0x30   : > { %2913 = sst [smem:[#allocation9 + $0x3]] (%p3635_p5), %s3575_s3  ;;  %s3576_s5 = smov 16  }
  0x31   : > { %2914 = sst [smem:[#allocation9 + $0x4]] (%p3635_p5), %s3575_s3  ;;  %s120_s8 = scalar_lea.sflag [#allocation3], %s119_s6 }
  0x32   : > { %s2757_s4 = sshll.u32 %s135_s27, 26  ;;  %2915 = sst [smem:[#allocation9 + $0x5]] (%p3635_p5), %s3576_s5 }
  0x33   : > { %s2758_s7 = sadd.s32 134217728, %s2757_s4  ;;  %s3577_s14 = smov [#allocation8]  }
  0x34   : > { %2916 = dma.general (%p3635_p5), %s130_s17, 32768, %s144_s26, %s120_s8, %s3577_s14, [#allocation9], %s2758_s7, 0  }
  0x35 PF: > { %168 = sbr.rel (%p3656_p13) target bundleno = 626 (0x272), region = 28 }
  0x3c   : > { %3544 = dma.done.wait (%p61_p4), [#allocation5], 16  }
  0x3d   : > { %3546 = vsyncadd (%p61_p4), [#allocation5], 4294967280  ;;  %s3707_s16 = sand.u32 1, %s3561_s10  }
  0x3e   : > { %s2761_s6 = sshll.u32 %s3707_s16, 11  ;;  %s175_s24 = scalar_lea.sflag [#allocation3], %s3707_s16 }
  0x3f   : > { %s3711_s19 = scalar_lea.vmem [#allocation6], %s2761_s6 }
  0x40   : > { %3548 = dma.done.wait (%p3641_p6), %s175_s24, 32768  }
  0x41   : > { %3550 = vsyncadd (%p3641_p6), %s175_s24, 4294934528 }
  0x42   : > { %183 = sfence }
  0x43   : > { %s202_s23 = sld [smem:[#allocation2]]  ;;  %s2763_s17 = sld [smem:[#allocation2 + $0x1]]  ;;  %v209_v0 = vld [vmem:[%s3711_s19] sm:$0xff]  ;;  %v210_v1 = vld [vmem:[%s3711_s19 + $0x8] sm:$0xff]  ;;  %v211_v4 = vld [vmem:[%s3711_s19 + $0x10] sm:$0xff] }
  0x44   : > { %s2764_s25 = sld [smem:[#allocation2 + $0x2]]  ;;  %s2765_s26 = sld [smem:[#allocation2 + $0x3]]  ;;  %v2769_v2 = vld [vmem:[%s3711_s19 + $0x400] sm:$0xff]  ;;  %v2770_v3 = vld [vmem:[%s3711_s19 + $0x408] sm:$0xff]  ;;  %v2771_v12 = vld [vmem:[%s3711_s19 + $0x410] sm:$0xff] }
  0x45   : > { %s2766_s27 = sld [smem:[#allocation2 + $0x4]]  ;;  %s2767_s28 = sld [smem:[#allocation2 + $0x5]]  ;;  %v212_v14 = vld [vmem:[%s3711_s19 + $0x18] sm:$0xff]  ;;  %v213_v24 = vld [vmem:[%s3711_s19 + $0x20] sm:$0xff]  ;;  %v214_v34 = vld [vmem:[%s3711_s19 + $0x28] sm:$0xff] }
  0x46   : > { %s2768_s29 = sld [smem:[#allocation2 + $0x6]]  ;;  %v2772_v19 = vld [vmem:[%s3711_s19 + $0x418] sm:$0xff]  ;;  %v2773_v29 = vld [vmem:[%s3711_s19 + $0x420] sm:$0xff]  ;;  %v2774_v39 = vld [vmem:[%s3711_s19 + $0x428] sm:$0xff]  ;;  %s2762_s20 = sshll.u32 %s3707_s16, 10 }
  0x47   : > { %v215_v43 = vld [vmem:[%s3711_s19 + $0x30] sm:$0xff]  ;;  %v216_v52 = vld [vmem:[%s3711_s19 + $0x38] sm:$0xff]  ;;  %v217_v60 = vld [vmem:[%s3711_s19 + $0x40] sm:$0xff]  ;;  %s3924_s30 = scalar_lea.vmem [#allocation7], %s2762_s20  ;;  %s2906_s3 = sshll.u32 %s3617_s13, 14 }
  0x48   : > { %v2775_v44 = vld [vmem:[%s3711_s19 + $0x430] sm:$0xff]  ;;  %v2776_v53 = vld [vmem:[%s3711_s19 + $0x438] sm:$0xff]  ;;  %v2777_v61 = vld [vmem:[%s3711_s19 + $0x440] sm:$0xff]  ;;  %s2664_s4 = sshll.u32 %s3924_s30, 4  ;;  %s6024_s8 = scalar_lea.hbm %s6073_s2, %s2906_s3  ;;  %s6026_s4 = int_to_ptr.vmem [resolvable:$true] %s2664_s4 }
  0x49   : > { %v3722_v5 = vstv %s202_s23  ;;  %v3725_v7 = vstv %s2763_s17  ;;  %s2650_s14 = scalar_lea.sflag [#allocation4], %s3707_s16  ;;  %s3499_s6 = scalar_lea.vmem %s6026_s4, 16384 }
  0x4a   : > { %v467_v6 = vmul.f32 %v3722_v5, %v209_v0  ;;  %v468_v8 = vmul.f32 %v3722_v5, %v210_v1  ;;  %v596_v9 = vmul.f32 %v2769_v2, %v3725_v7  ;;  %v3729_v10 = vstv %s2765_s26  ;;  %p3500_p4 = scmp.ne.s32.totalorder %s6026_s4, %s3499_s6  ;;  %s3578_s13 = smov [#allocation7]  }
  0x4b   : > { %v597_v11 = vmul.f32 %v2770_v3, %v3725_v7  ;;  %v469_v13 = vmul.f32 %v3722_v5, %v211_v4  ;;  %v3735_v15 = vstv %s2764_s25  ;;  %v3738_v16 = vmul.f32 %v3729_v10, %v209_v0  ;;  %s3503_s24 = sshll.u32 %s3578_s13, 4  ;;  %s3504_s24 = int_to_ptr.vmem [resolvable:$false] %s3503_s24 }
  0x4c   : > { %v3740_v17 = vstv %s2766_s27  ;;  %v3742_v18 = vstv %s2767_s28  ;;  %v724_v20 = vadd.f32 %v596_v9, %v467_v6  ;;  %v3749_v23 = vmul.f32 %v3729_v10, %v210_v1  ;;  %p3501_p5 = pnand %p3500_p4, %p3648_p11  ;;  %p3506_p13 = scmp.lt.s32.totalorder %s6026_s4, %s3504_s24 }
  0x4d   : > { %v3746_v21 = vmul.f32 %v2769_v2, %v3742_v18  ;;  %v725_v22 = vadd.f32 %v597_v11, %v468_v8  ;;  %v3752_v25 = vstv %s2768_s29  ;;  %v3755_v26 = vmul.f32 %v2770_v3, %v3742_v18  ;;  %v218_v2 = vld [vmem:[%s3711_s19 + $0x48] sm:$0xff] }
  0x4e   : > { %v598_v27 = vmul.f32 %v2771_v12, %v3725_v7  ;;  %v3759_v28 = vmul.f32 %v3729_v10, %v211_v4  ;;  %v853_v30 = vadd.f32 %v3735_v15, %v724_v20  ;;  %v470_v32 = vmul.f32 %v3722_v5, %v212_v14  ;;  %v2778_v8 = vld [vmem:[%s3711_s19 + $0x448] sm:$0xff]  ;;  %p3502_p6 = pneg %p3501_p5 }
  0x4f   : > { %v854_v31 = vadd.f32 %v3735_v15, %v725_v22  ;;  %v599_v33 = vmul.f32 %v2772_v19, %v3725_v7  ;;  %v3768_v36 = vmul.f32 %v2771_v12, %v3742_v18  ;;  %v3771_v37 = vmul.f32 %v3729_v10, %v212_v14  ;;  %v219_v14 = vld [vmem:[%s3711_s19 + $0x50] sm:$0xff] }
  0x50   : > { %v726_v35 = vadd.f32 %v598_v27, %v469_v13  ;;  %v471_v38 = vmul.f32 %v3722_v5, %v213_v24  ;;  %2974 = vtanh.f32 %v853_v30  ;;  %v3776_v41 = vmul.f32 %v2772_v19, %v3742_v18  ;;  %v2779_v19 = vld [vmem:[%s3711_s19 + $0x450] sm:$0xff] }
  0x51   : > { %v727_v40 = vadd.f32 %v599_v33, %v470_v32  ;;  %v600_v42 = vmul.f32 %v2773_v29, %v3725_v7  ;;  %2976 = vtanh.f32 %v854_v31  ;;  %v3783_v46 = vmul.f32 %v3729_v10, %v213_v24 }
  0x52   : > { %v855_v45 = vadd.f32 %v3735_v15, %v726_v35  ;;  %v472_v47 = vmul.f32 %v3722_v5, %v214_v34  ;;  %v3788_v50 = vmul.f32 %v2773_v29, %v3742_v18  ;;  %v601_v51 = vmul.f32 %v2774_v39, %v3725_v7 }
  0x53   : > { %v856_v48 = vadd.f32 %v3735_v15, %v727_v40  ;;  %v728_v49 = vadd.f32 %v600_v42, %v471_v38  ;;  %v3794_v54 = vmul.f32 %v3729_v10, %v214_v34  ;;  %v473_v55 = vmul.f32 %v3722_v5, %v215_v43  ;;  %v220_v38 = vld [vmem:[%s3711_s19 + $0x58] sm:$0xff] }
  0x54   : > { %2978 = vtanh.f32 %v855_v45  ;;  %v602_v56 = vmul.f32 %v2775_v44, %v3725_v7  ;;  %v729_v58 = vadd.f32 %v601_v51, %v472_v47  ;;  %v3800_v59 = vmul.f32 %v2774_v39, %v3742_v18 }
  0x55   : > { %2980 = vtanh.f32 %v856_v48  ;;  %v857_v57 = vadd.f32 %v3735_v15, %v728_v49  ;;  %v3805_v63 = vmul.f32 %v3729_v10, %v215_v43  ;;  %v474_v0 = vmul.f32 %v3722_v5, %v216_v52 }
  0x56   : > { %v730_v62 = vadd.f32 %v602_v56, %v473_v55  ;;  %v603_v1 = vmul.f32 %v2776_v53, %v3725_v7  ;;  %v858_v3 = vadd.f32 %v3735_v15, %v729_v58  ;;  %v3812_v4 = vmul.f32 %v2775_v44, %v3742_v18  ;;  %v3843_v44 = vld [vmem:[%s3711_s19 + $0x458] sm:$0xff] }
  0x57   : > { %2982 = vtanh.f32 %v857_v57  ;;  %v3815_v6 = vmul.f32 %v3729_v10, %v216_v52  ;;  %v475_v12 = vmul.f32 %v3722_v5, %v217_v60  ;;  %v604_v13 = vmul.f32 %v2777_v61, %v3725_v7 }
  0x58   : > { %v859_v9 = vadd.f32 %v3735_v15, %v730_v62  ;;  %v731_v11 = vadd.f32 %v603_v1, %v474_v0  ;;  %2984 = vtanh.f32 %v858_v3  ;;  %v3824_v20 = vmul.f32 %v2776_v53, %v3742_v18 }
  0x59   : > { %v3827_v22 = vmul.f32 %v3729_v10, %v217_v60  ;;  %v476_v24 = vmul.f32 %v3722_v5, %v218_v2  ;;  %v732_v29 = vadd.f32 %v604_v13, %v475_v12  ;;  %v605_v30 = vmul.f32 %v2778_v8, %v3725_v7 }
  0x5a   : > { %2986 = vtanh.f32 %v859_v9  ;;  %v860_v27 = vadd.f32 %v3735_v15, %v731_v11  ;;  %v2975_v31 = vpop.eup %2974  ;;  %v3833_v32 = vmul.f32 %v2777_v61, %v3742_v18  ;;  %v3836_v33 = vmul.f32 %v3729_v10, %v218_v2  ;;  %v3861_v2 = vld [vmem:[%s3711_s19 + $0x60] sm:$0xff] }
  0x5b   : > { %v477_v34 = vmul.f32 %v3722_v5, %v219_v14  ;;  %v606_v35 = vmul.f32 %v2779_v19, %v3725_v7  ;;  %v2977_v39 = vpop.eup %2976  ;;  %v1109_v40 = vmul.f32 0.5, %v2975_v31  ;;  %v861_v42 = vadd.f32 %v3735_v15, %v732_v29 }
  0x5c   : > { %2988 = vtanh.f32 %v860_v27  ;;  %v733_v43 = vadd.f32 %v605_v30, %v476_v24  ;;  %v1110_v45 = vmul.f32 0.5, %v2977_v39  ;;  %v3846_v47 = vmul.f32 %v2778_v8, %v3742_v18 }
  0x5d   : > { %v734_v48 = vadd.f32 %v606_v35, %v477_v34  ;;  %v3849_v49 = vmul.f32 %v3729_v10, %v219_v14  ;;  %v1237_v52 = vadd.f32 0.5, %v1109_v40  ;;  %2990 = vtanh.f32 %v861_v42 }
  0x5e   : > { %v2979_v51 = vpop.eup %2978  ;;  %v862_v53 = vadd.f32 %v3735_v15, %v733_v43  ;;  %v478_v55 = vmul.f32 %v3722_v5, %v220_v38  ;;  %v1238_v57 = vadd.f32 0.5, %v1110_v45  ;;  %v607_v61 = vmul.f32 %v3843_v44, %v3725_v7 }
  0x5f   : > { %v2981_v56 = vpop.eup %2980  ;;  %v1111_v58 = vmul.f32 0.5, %v2979_v51  ;;  %v863_v60 = vadd.f32 %v3735_v15, %v734_v48  ;;  %v1495_v62 = vmul.f32 %v3740_v17, %v1237_v52  ;;  %v3858_v1 = vmul.f32 %v2779_v19, %v3742_v18 }
  0x60   : > { %v1112_v0 = vmul.f32 0.5, %v2981_v56  ;;  %2992 = vtanh.f32 %v862_v53  ;;  %v1496_v8 = vmul.f32 %v3740_v17, %v1238_v57  ;;  %v735_v11 = vadd.f32 %v607_v61, %v478_v55 }
  0x61   : > { %v2983_v3 = vpop.eup %2982  ;;  %v1239_v9 = vadd.f32 0.5, %v1111_v58  ;;  %2994 = vtanh.f32 %v863_v60  ;;  %v1623_v12 = vadd.f32 %v1495_v62, %v3738_v16  ;;  %v3866_v24 = vmul.f32 %v3729_v10, %v220_v38 }
  0x62   : > { %v1240_v13 = vadd.f32 0.5, %v1112_v0  ;;  %v1113_v14 = vmul.f32 0.5, %v2983_v3  ;;  %v2985_v27 = vpop.eup %2984  ;;  %v1624_v29 = vadd.f32 %v1496_v8, %v3749_v23  ;;  %v864_v30 = vadd.f32 %v3735_v15, %v735_v11 }
  0x63   : > { %v1497_v19 = vmul.f32 %v3740_v17, %v1239_v9  ;;  %v479_v31 = vmul.f32 %v3722_v5, %v3861_v2  ;;  %v1880_v35 = vadd.f32 %v3746_v21, %v1623_v12  ;;  %v1114_v40 = vmul.f32 0.5, %v2985_v27  ;;  %v3893_v12 = vld [vmem:[%s3711_s19 + $0x460] sm:$0xff] }
  0x64   : > { %v2987_v34 = vpop.eup %2986  ;;  %v1498_v16 = vmul.f32 %v3740_v17, %v1240_v13  ;;  %v1241_v39 = vadd.f32 0.5, %v1113_v14  ;;  %v1881_v38 = vadd.f32 %v3755_v26, %v1624_v29  ;;  %2996 = vtanh.f32 %v864_v30 }
  0x65   : > { %v1625_v42 = vadd.f32 %v1497_v19, %v3759_v28  ;;  %v1115_v43 = vmul.f32 0.5, %v2987_v34  ;;  %v2009_v45 = vadd.f32 %v3752_v25, %v1880_v35  ;;  %v1242_v52 = vadd.f32 0.5, %v1114_v40 }
  0x66   : > { %v2989_v23 = vpop.eup %2988  ;;  %v1626_v48 = vadd.f32 %v1498_v16, %v3771_v37  ;;  %v1499_v51 = vmul.f32 %v3740_v17, %v1241_v39  ;;  %v2010_v21 = vadd.f32 %v3752_v25, %v1881_v38  ;;  %v608_v34 = vmul.f32 %v3893_v12, %v3725_v7 }
  0x67   : > { %v1882_v53 = vadd.f32 %v3768_v36, %v1625_v42  ;;  %v1243_v55 = vadd.f32 0.5, %v1115_v43  ;;  %v1116_v56 = vmul.f32 0.5, %v2989_v23  ;;  %v2991_v57 = vpop.eup %2990  ;;  %2998 = vtanh.f32 %v2009_v45 }
  0x68   : > { %v1883_v26 = vadd.f32 %v3776_v41, %v1626_v48  ;;  %v1627_v28 = vadd.f32 %v1499_v51, %v3783_v46  ;;  %v1500_v58 = vmul.f32 %v3740_v17, %v1242_v52  ;;  %3000 = vtanh.f32 %v2010_v21 }
  0x69   : > { %v2011_v37 = vadd.f32 %v3752_v25, %v1882_v53  ;;  %v1501_v60 = vmul.f32 %v3740_v17, %v1243_v55  ;;  %v1244_v61 = vadd.f32 0.5, %v1116_v56  ;;  %v1117_v8 = vmul.f32 0.5, %v2991_v57 }
  0x6a   : > { %v2993_v62 = vpop.eup %2992  ;;  %v2012_v36 = vadd.f32 %v3752_v25, %v1883_v26  ;;  %v1884_v0 = vadd.f32 %v3788_v50, %v1627_v28  ;;  %v1628_v3 = vadd.f32 %v1500_v58, %v3794_v54  ;;  %v736_v38 = vadd.f32 %v608_v34, %v479_v31  ;;  %v2782_v58 = vld [vmem:[%s3711_s19 + $0x468] sm:$0xff] }
  0x6b   : > { %v2995_v41 = vpop.eup %2994  ;;  %3002 = vtanh.f32 %v2011_v37  ;;  %v1629_v46 = vadd.f32 %v1501_v60, %v3805_v63  ;;  %v1502_v9 = vmul.f32 %v3740_v17, %v1244_v61  ;;  %v1118_v11 = vmul.f32 0.5, %v2993_v62 }
  0x6c   : > { %3004 = vtanh.f32 %v2012_v36  ;;  %v2013_v13 = vadd.f32 %v3752_v25, %v1884_v0  ;;  %v1885_v14 = vadd.f32 %v3800_v59, %v1628_v3  ;;  %v1245_v27 = vadd.f32 0.5, %v1117_v8  ;;  %v3931_v0 = vld [vmem:[%s3711_s19 + $0x470] sm:$0xff] }
  0x6d   : > { %v1886_v50 = vadd.f32 %v3812_v4, %v1629_v46  ;;  %v1630_v54 = vadd.f32 %v1502_v9, %v3815_v6  ;;  %v1246_v29 = vadd.f32 0.5, %v1118_v11  ;;  %v1119_v19 = vmul.f32 0.5, %v2995_v41 }
  0x6e   : > { %3006 = vtanh.f32 %v2013_v13  ;;  %v2014_v63 = vadd.f32 %v3752_v25, %v1885_v14  ;;  %v1503_v30 = vmul.f32 %v3740_v17, %v1245_v27  ;;  %v2997_v35 = vpop.eup %2996  ;;  %v1763_v51 = vmul.f32 %v3843_v44, %v3742_v18 }
  0x6f   : > { %v2015_v16 = vadd.f32 %v3752_v25, %v1886_v50  ;;  %v1887_v59 = vadd.f32 %v3824_v20, %v1630_v54  ;;  %v1504_v4 = vmul.f32 %v3740_v17, %v1246_v29  ;;  %v1247_v39 = vadd.f32 0.5, %v1119_v19  ;;  %v224_v54 = vld [vmem:[%s3711_s19 + $0x78] sm:$0xff] }
  0x70   : > { %3008 = vtanh.f32 %v2014_v63  ;;  %v1631_v6 = vadd.f32 %v1503_v30, %v3827_v22  ;;  %v1120_v40 = vmul.f32 0.5, %v2997_v35  ;;  %v865_v22 = vadd.f32 %v3735_v15, %v736_v38  ;;  %v3942_v29 = vld [vmem:[%s3711_s19 + $0x478] sm:$0xff] }
  0x71   : > { %3010 = vtanh.f32 %v2015_v16  ;;  %v2016_v42 = vadd.f32 %v3752_v25, %v1887_v59  ;;  %v1632_v43 = vadd.f32 %v1504_v4, %v3836_v33  ;;  %v1505_v23 = vmul.f32 %v3740_v17, %v1247_v39  ;;  %v2999_v45 = vpop.eup %2998  ;;  %v225_v4 = vld [vmem:[%s3711_s19 + $0x80] sm:$0xff] }
  0x72   : > { %v1888_v20 = vadd.f32 %v3833_v32, %v1631_v6  ;;  %v1248_v48 = vadd.f32 0.5, %v1120_v40  ;;  %v3001_v31 = vpop.eup %3000  ;;  %v2265_v52 = vmul.f32 0.5, %v2999_v45  ;;  %v222_v32 = vld [vmem:[%s3711_s19 + $0x68] sm:$0xff]  ;;  %v609_v41 = vmul.f32 %v2782_v58, %v3725_v7 }
  0x73   : > { %3012 = vtanh.f32 %v2016_v42  ;;  %v1889_v21 = vadd.f32 %v3846_v47, %v1632_v43  ;;  %v1633_v33 = vadd.f32 %v1505_v23, %v3849_v49  ;;  %v2266_v53 = vmul.f32 0.5, %v3001_v31  ;;  %v2785_v42 = vld [vmem:[%s3711_s19 + $0x480] sm:$0xff]  ;;  %v226_v31 = vld [vmem:[%s3711_s19 + $0x88] sm:$0xff] }
  0x74   : > { %v2017_v55 = vadd.f32 %v3752_v25, %v1888_v20  ;;  %v1506_v56 = vmul.f32 %v3740_v17, %v1248_v48  ;;  %3014 = vtanh.f32 %v865_v22  ;;  %v2393_v44 = vadd.f32 0.5, %v2265_v52  ;;  %v3964_v52 = vld [vmem:[%s3711_s19 + $0x488] sm:$0xff] }
  0x75   : > { %v3003_v57 = vpop.eup %3002  ;;  %v2018_v26 = vadd.f32 %v3752_v25, %v1889_v21  ;;  %v1890_v28 = vadd.f32 %v3858_v1, %v1633_v33  ;;  %v2394_v47 = vadd.f32 0.5, %v2266_v53  ;;  %v480_v36 = vmul.f32 %v3722_v5, %v222_v32  ;;  %v223_v1 = vld [vmem:[%s3711_s19 + $0x70] sm:$0xff] }
  0x76   : > { %v3005_v37 = vpop.eup %3004  ;;  %v2267_v60 = vmul.f32 0.5, %v3003_v57  ;;  %3016 = vtanh.f32 %v2017_v55  ;;  %v1634_v49 = vadd.f32 %v1506_v56, %v3866_v24  ;;  %2521 = vst [vmem:[%s3924_s30] sm:$0xff] %v2393_v44  ;;  %v481_v27 = vmul.f32 %v3722_v5, %v223_v1 }
  0x77   : > { %v2268_v61 = vmul.f32 0.5, %v3005_v37  ;;  %3018 = vtanh.f32 %v2018_v26  ;;  %v2019_v62 = vadd.f32 %v3752_v25, %v1890_v28  ;;  %2522 = vst [vmem:[%s3924_s30 + $0x8] sm:$0xff] %v2394_v47  ;;  %v737_v14 = vadd.f32 %v609_v41, %v480_v36 }
  0x78   : > { %v3007_v3 = vpop.eup %3006  ;;  %v2395_v24 = vadd.f32 0.5, %v2267_v60  ;;  %v1891_v8 = vadd.f32 %v1763_v51, %v1634_v49  ;;  %v610_v50 = vmul.f32 %v3931_v0, %v3725_v7  ;;  %v1378_v34 = vmul.f32 %v3729_v10, %v3861_v2  ;;  %v227_v60 = vld [vmem:[%s3711_s19 + $0x90] sm:$0xff] }
  0x79   : > { %v2396_v46 = vadd.f32 0.5, %v2268_v61  ;;  %v2269_v9 = vmul.f32 0.5, %v3007_v3  ;;  %3020 = vtanh.f32 %v2019_v62  ;;  %v866_v16 = vadd.f32 %v3735_v15, %v737_v14  ;;  %v3981_v49 = vld [vmem:[%s3711_s19 + $0x490] sm:$0xff]  ;;  %v3998_v14 = vld [vmem:[%s3711_s19 + $0x498] sm:$0xff] }
  0x7a   : > { %v3009_v11 = vpop.eup %3008  ;;  %2523 = vst [vmem:[%s3924_s30 + $0x10] sm:$0xff] %v2395_v24  ;;  %v2020_v13 = vadd.f32 %v3752_v25, %v1891_v8  ;;  %v738_v59 = vadd.f32 %v610_v50, %v481_v27  ;;  %v1764_v40 = vmul.f32 %v3893_v12, %v3742_v18  ;;  %v482_v38 = vmul.f32 %v3722_v5, %v224_v54 }
  0x7b   : > { %v3011_v19 = vpop.eup %3010  ;;  %2524 = vst [vmem:[%s3924_s30 + $0x18] sm:$0xff] %v2396_v46  ;;  %v2397_v63 = vadd.f32 0.5, %v2269_v9  ;;  %v2270_v30 = vmul.f32 0.5, %v3009_v11  ;;  %v611_v2 = vmul.f32 %v3942_v29, %v3725_v7  ;;  %v3959_v51 = vmul.f32 %v3729_v10, %v222_v32 }
  0x7c   : > { %v2271_v35 = vmul.f32 0.5, %v3011_v19  ;;  %3022 = vtanh.f32 %v2020_v13  ;;  %v867_v20 = vadd.f32 %v3735_v15, %v738_v59  ;;  %v483_v22 = vmul.f32 %v3722_v5, %v225_v4  ;;  %v4011_v59 = vld [vmem:[%s3711_s19 + $0x4a0] sm:$0xff] }
  0x7d   : > { %v3013_v39 = vpop.eup %3012  ;;  %2525 = vst [vmem:[%s3924_s30 + $0x20] sm:$0xff] %v2397_v63  ;;  %v2398_v6 = vadd.f32 0.5, %v2270_v30  ;;  %3024 = vtanh.f32 %v866_v16  ;;  %v739_v12 = vadd.f32 %v611_v2, %v482_v38  ;;  %v3968_v53 = vmul.f32 %v2782_v58, %v3742_v18  ;;  %v229_v16 = vld [vmem:[%s3711_s19 + $0xa0] sm:$0xff] }
  0x7e   : > { %v3015_v43 = vpop.eup %3014  ;;  %v2399_v23 = vadd.f32 0.5, %v2271_v35  ;;  %v2272_v45 = vmul.f32 0.5, %v3013_v39  ;;  %3026 = vtanh.f32 %v867_v20  ;;  %v612_v55 = vmul.f32 %v2785_v42, %v3725_v7 }
  0x7f   : > { %2526 = vst [vmem:[%s3924_s30 + $0x28] sm:$0xff] %v2398_v6  ;;  %v1121_v48 = vmul.f32 0.5, %v3015_v43  ;;  %v3972_v44 = vmul.f32 %v3729_v10, %v223_v1  ;;  %v868_v26 = vadd.f32 %v3735_v15, %v739_v12  ;;  %v484_v47 = vmul.f32 %v3722_v5, %v226_v31  ;;  %v4029_v12 = vld [vmem:[%s3711_s19 + $0xa8] sm:$0xff] }
  0x80   : > { %v3017_v21 = vpop.eup %3016  ;;  %2527 = vst [vmem:[%s3924_s30 + $0x30] sm:$0xff] %v2399_v23  ;;  %v2400_v33 = vadd.f32 0.5, %v2272_v45  ;;  %v740_v37 = vadd.f32 %v612_v55, %v483_v22  ;;  %v613_v58 = vmul.f32 %v3964_v52, %v3725_v7  ;;  %v3986_v1 = vmul.f32 %v3931_v0, %v3742_v18  ;;  %v228_v0 = vld [vmem:[%s3711_s19 + $0x98] sm:$0xff]  ;;  %v4032_v22 = vld [vmem:[%s3711_s19 + $0x4a8] sm:$0xff] }
  0x81   : > { %v3019_v56 = vpop.eup %3018  ;;  %v2273_v32 = vmul.f32 0.5, %v3017_v21  ;;  %v1249_v57 = vadd.f32 0.5, %v1121_v48  ;;  %3028 = vtanh.f32 %v868_v26  ;;  %v3991_v9 = vmul.f32 %v3729_v10, %v224_v54 }
  0x82   : > { %2528 = vst [vmem:[%s3924_s30 + $0x38] sm:$0xff] %v2400_v33  ;;  %v2274_v28 = vmul.f32 0.5, %v3019_v56  ;;  %v869_v8 = vadd.f32 %v3735_v15, %v740_v37  ;;  %v741_v41 = vadd.f32 %v613_v58, %v484_v47  ;;  %v485_v11 = vmul.f32 %v3722_v5, %v227_v60  ;;  %v4049_v58 = vld [vmem:[%s3711_s19 + $0xb0] sm:$0xff] }
  0x83   : > { %v3021_v61 = vpop.eup %3020  ;;  %v2401_v62 = vadd.f32 0.5, %v2273_v32  ;;  %v1507_v36 = vmul.f32 %v3740_v17, %v1249_v57  ;;  %v614_v13 = vmul.f32 %v3981_v49, %v3725_v7  ;;  %v4003_v19 = vmul.f32 %v3942_v29, %v3742_v18 }
  0x84   : > { %v2402_v3 = vadd.f32 0.5, %v2274_v28  ;;  %v2275_v24 = vmul.f32 0.5, %v3021_v61  ;;  %3030 = vtanh.f32 %v869_v8  ;;  %v870_v54 = vadd.f32 %v3735_v15, %v741_v41 }
  0x85   : > { %2529 = vst [vmem:[%s3924_s30 + $0x40] sm:$0xff] %v2401_v62  ;;  %v1635_v46 = vadd.f32 %v1507_v36, %v1378_v34  ;;  %v4007_v34 = vmul.f32 %v3729_v10, %v225_v4  ;;  %v742_v35 = vadd.f32 %v614_v13, %v485_v11  ;;  %v4015_v29 = vmul.f32 %v2785_v42, %v3742_v18 }
  0x86   : > { %v3023_v27 = vpop.eup %3022  ;;  %2530 = vst [vmem:[%s3924_s30 + $0x48] sm:$0xff] %v2402_v3  ;;  %v2403_v50 = vadd.f32 0.5, %v2275_v24  ;;  %3032 = vtanh.f32 %v870_v54  ;;  %v486_v6 = vmul.f32 %v3722_v5, %v228_v0  ;;  %v4023_v45 = vmul.f32 %v3729_v10, %v226_v31 }
  0x87   : > { %v2276_v63 = vmul.f32 0.5, %v3023_v27  ;;  %v1892_v30 = vadd.f32 %v1764_v40, %v1635_v46  ;;  %v3025_v39 = vpop.eup %3024  ;;  %v615_v40 = vmul.f32 %v3998_v14, %v3725_v7  ;;  %v871_v43 = vadd.f32 %v3735_v15, %v742_v35 }
  0x88   : > { %2531 = vst [vmem:[%s3924_s30 + $0x50] sm:$0xff] %v2403_v50  ;;  %v1122_v2 = vmul.f32 0.5, %v3025_v39  ;;  %v3027_v23 = vpop.eup %3026  ;;  %v487_v42 = vmul.f32 %v3722_v5, %v229_v16  ;;  %v616_v48 = vmul.f32 %v4011_v59, %v3725_v7  ;;  %v4037_v31 = vmul.f32 %v3964_v52, %v3742_v18  ;;  %v4052_v52 = vld [vmem:[%s3711_s19 + $0x4b0] sm:$0xff] }
  0x89   : > { %v2404_v4 = vadd.f32 0.5, %v2276_v63  ;;  %v2021_v38 = vadd.f32 %v3752_v25, %v1892_v30  ;;  %v743_v20 = vadd.f32 %v615_v40, %v486_v6  ;;  %v1123_v33 = vmul.f32 0.5, %v3027_v23 }
  0x8a   : > { %v1250_v21 = vadd.f32 0.5, %v1122_v2  ;;  %v4040_v55 = vmul.f32 %v3729_v10, %v227_v60  ;;  %v744_v32 = vadd.f32 %v616_v48, %v487_v42  ;;  %v488_v37 = vmul.f32 %v3722_v5, %v4029_v12 }
  0x8b   : > { %2532 = vst [vmem:[%s3924_s30 + $0x58] sm:$0xff] %v2404_v4  ;;  %3034 = vtanh.f32 %v2021_v38  ;;  %v872_v56 = vadd.f32 %v3735_v15, %v743_v20  ;;  %v3029_v57 = vpop.eup %3028  ;;  %v1251_v28 = vadd.f32 0.5, %v1123_v33  ;;  %v617_v47 = vmul.f32 %v4032_v22, %v3725_v7  ;;  %v4085_v4 = vld [vmem:[%s3711_s19 + $0x4b8] sm:$0xff] }
  0x8c   : > { %3036 = vtanh.f32 %v871_v43  ;;  %v1508_v26 = vmul.f32 %v3740_v17, %v1250_v21  ;;  %v1124_v61 = vmul.f32 0.5, %v3029_v57  ;;  %v4056_v60 = vmul.f32 %v3981_v49, %v3742_v18 }
  0x8d   : > { %3038 = vtanh.f32 %v872_v56  ;;  %v873_v62 = vadd.f32 %v3735_v15, %v744_v32  ;;  %v1509_v3 = vmul.f32 %v3740_v17, %v1251_v28  ;;  %v4062_v24 = vmul.f32 %v3729_v10, %v228_v0  ;;  %v4072_v0 = vld [vmem:[%s3711_s19 + $0xb8] sm:$0xff]  ;;  %v4099_v32 = vld [vmem:[%s3711_s19 + $0xc0] sm:$0xff] }
  0x8e   : > { %v1636_v36 = vadd.f32 %v1508_v26, %v3959_v51  ;;  %v745_v8 = vadd.f32 %v617_v47, %v488_v37  ;;  %v3031_v41 = vpop.eup %3030  ;;  %v1252_v46 = vadd.f32 0.5, %v1124_v61  ;;  %v489_v11 = vmul.f32 %v3722_v5, %v4049_v58 }
  0x8f   : > { %3040 = vtanh.f32 %v873_v62  ;;  %v618_v49 = vmul.f32 %v4052_v52, %v3725_v7  ;;  %v1637_v51 = vadd.f32 %v1509_v3, %v3972_v44  ;;  %v1125_v27 = vmul.f32 0.5, %v3031_v41 }
  0x90   : > { %v1893_v13 = vadd.f32 %v3968_v53, %v1636_v36  ;;  %v874_v50 = vadd.f32 %v3735_v15, %v745_v8  ;;  %v3033_v54 = vpop.eup %3032  ;;  %v1510_v63 = vmul.f32 %v3740_v17, %v1252_v46  ;;  %v4077_v30 = vmul.f32 %v3998_v14, %v3742_v18  ;;  %v4107_v36 = vld [vmem:[%s3711_s19 + $0x4c0] sm:$0xff] }
  0x91   : > { %v4080_v35 = vmul.f32 %v3729_v10, %v229_v16  ;;  %v746_v39 = vadd.f32 %v618_v49, %v489_v11  ;;  %v1894_v44 = vadd.f32 %v3986_v1, %v1637_v51  ;;  %v1253_v6 = vadd.f32 0.5, %v1125_v27  ;;  %v4119_v49 = vld [vmem:[%s3711_s19 + $0xc8] sm:$0xff] }
  0x92   : > { %v2022_v53 = vadd.f32 %v3752_v25, %v1893_v13  ;;  %v1126_v40 = vmul.f32 0.5, %v3033_v54  ;;  %v1638_v38 = vadd.f32 %v1510_v63, %v3991_v9  ;;  %3042 = vtanh.f32 %v874_v50  ;;  %v4129_v54 = vld [vmem:[%s3711_s19 + $0x4c8] sm:$0xff] }
  0x93   : > { %v875_v2 = vadd.f32 %v3735_v15, %v746_v39  ;;  %v490_v14 = vmul.f32 %v3722_v5, %v4072_v0  ;;  %v2023_v43 = vadd.f32 %v3752_v25, %v1894_v44  ;;  %v1511_v23 = vmul.f32 %v3740_v17, %v1253_v6 }
  0x94   : > { %3044 = vtanh.f32 %v2022_v53  ;;  %v1254_v1 = vadd.f32 0.5, %v1126_v40  ;;  %v1895_v48 = vadd.f32 %v4003_v19, %v1638_v38  ;;  %v619_v9 = vmul.f32 %v4085_v4, %v3725_v7 }
  0x95   : > { %v3035_v16 = vpop.eup %3034  ;;  %3046 = vtanh.f32 %v875_v2  ;;  %v1639_v21 = vadd.f32 %v1511_v23, %v4007_v34  ;;  %v1772_v19 = vmul.f32 %v4011_v59, %v3742_v18  ;;  %v1387_v8 = vmul.f32 %v3729_v10, %v4029_v12 }
  0x96   : > { %v3037_v20 = vpop.eup %3036  ;;  %v2277_v42 = vmul.f32 0.5, %v3035_v16  ;;  %3048 = vtanh.f32 %v2023_v43  ;;  %v1512_v33 = vmul.f32 %v3740_v17, %v1254_v1  ;;  %v2024_v28 = vadd.f32 %v3752_v25, %v1895_v48 }
  0x97   : > { %v1127_v56 = vmul.f32 0.5, %v3037_v20  ;;  %v3039_v57 = vpop.eup %3038  ;;  %v747_v37 = vadd.f32 %v619_v9, %v490_v14  ;;  %v1896_v47 = vadd.f32 %v4015_v29, %v1639_v21  ;;  %v491_v59 = vmul.f32 %v3722_v5, %v4099_v32 }
  0x98   : > { %v2405_v26 = vadd.f32 0.5, %v2277_v42  ;;  %v1640_v61 = vadd.f32 %v1512_v33, %v4023_v45  ;;  %v1128_v34 = vmul.f32 0.5, %v3039_v57  ;;  %3050 = vtanh.f32 %v2024_v28  ;;  %v4147_v57 = vld [vmem:[%s3711_s19 + $0xd0] sm:$0xff] }
  0x99   : > { %v1255_v62 = vadd.f32 0.5, %v1127_v56  ;;  %v3041_v3 = vpop.eup %3040  ;;  %v876_v41 = vadd.f32 %v3735_v15, %v747_v37  ;;  %v2025_v29 = vadd.f32 %v3752_v25, %v1896_v47  ;;  %v1773_v51 = vmul.f32 %v4032_v22, %v3742_v18 }
  0x9a   : > { %2533 = vst [vmem:[%s3924_s30 + $0x60] sm:$0xff] %v2405_v26  ;;  %v1897_v45 = vadd.f32 %v4037_v31, %v1640_v61  ;;  %v1256_v11 = vadd.f32 0.5, %v1128_v34  ;;  %v1129_v13 = vmul.f32 0.5, %v3041_v3  ;;  %v620_v12 = vmul.f32 %v4107_v36, %v3725_v7  ;;  %v4154_v34 = vld [vmem:[%s3711_s19 + $0x4d0] sm:$0xff] }
  0x9b   : > { %v1513_v46 = vmul.f32 %v3740_v17, %v1255_v62  ;;  %3052 = vtanh.f32 %v876_v41  ;;  %v1388_v53 = vmul.f32 %v3729_v10, %v4049_v58  ;;  %v492_v22 = vmul.f32 %v3722_v5, %v4119_v49 }
  0x9c   : > { %3054 = vtanh.f32 %v2025_v29  ;;  %v2026_v27 = vadd.f32 %v3752_v25, %v1897_v45  ;;  %v1514_v31 = vmul.f32 %v3740_v17, %v1256_v11  ;;  %v3043_v63 = vpop.eup %3042  ;;  %v1257_v39 = vadd.f32 0.5, %v1129_v13 }
  0x9d   : > { %v1641_v50 = vadd.f32 %v1513_v46, %v4040_v55  ;;  %v748_v44 = vadd.f32 %v620_v12, %v491_v59  ;;  %v1130_v55 = vmul.f32 0.5, %v3043_v63  ;;  %v621_v58 = vmul.f32 %v4129_v54, %v3725_v7 }
  0x9e   : > { %v3045_v6 = vpop.eup %3044  ;;  %3056 = vtanh.f32 %v2026_v27  ;;  %v1642_v38 = vadd.f32 %v1514_v31, %v4062_v24  ;;  %v1515_v16 = vmul.f32 %v3740_v17, %v1257_v39  ;;  %v1774_v37 = vmul.f32 %v4052_v52, %v3742_v18  ;;  %v4166_v27 = vld [vmem:[%s3711_s19 + $0xd8] sm:$0xff] }
  0x9f   : > { %v1898_v40 = vadd.f32 %v4056_v60, %v1641_v50  ;;  %v3047_v2 = vpop.eup %3046  ;;  %v2278_v14 = vmul.f32 0.5, %v3045_v6  ;;  %v877_v43 = vadd.f32 %v3735_v15, %v748_v44  ;;  %v1258_v60 = vadd.f32 0.5, %v1130_v55  ;;  %v4171_v39 = vld [vmem:[%s3711_s19 + $0x4d8] sm:$0xff]  ;;  %v4180_v55 = vld [vmem:[%s3711_s19 + $0xe0] sm:$0xff] }
  0xa0   : > { %v3049_v23 = vpop.eup %3048  ;;  %v1899_v20 = vadd.f32 %v4077_v30, %v1642_v38  ;;  %v1131_v42 = vmul.f32 0.5, %v3047_v2  ;;  %v1643_v9 = vadd.f32 %v1515_v16, %v4080_v35  ;;  %v749_v47 = vadd.f32 %v621_v58, %v492_v22 }
  0xa1   : > { %v2027_v1 = vadd.f32 %v3752_v25, %v1898_v40  ;;  %v2406_v24 = vadd.f32 0.5, %v2278_v14  ;;  %v2279_v48 = vmul.f32 0.5, %v3049_v23  ;;  %3058 = vtanh.f32 %v877_v43  ;;  %v4187_v43 = vld [vmem:[%s3711_s19 + $0x4e0] sm:$0xff] }
  0xa2   : > { %v2028_v21 = vadd.f32 %v3752_v25, %v1899_v20  ;;  %v1516_v33 = vmul.f32 %v3740_v17, %v1258_v60  ;;  %v1259_v56 = vadd.f32 0.5, %v1131_v42  ;;  %v3051_v26 = vpop.eup %3050  ;;  %v1900_v28 = vadd.f32 %v1772_v19, %v1643_v9 }
  0xa3   : > { %3060 = vtanh.f32 %v2027_v1  ;;  %2534 = vst [vmem:[%s3924_s30 + $0x68] sm:$0xff] %v2406_v24  ;;  %v2407_v30 = vadd.f32 0.5, %v2279_v48  ;;  %v2280_v35 = vmul.f32 0.5, %v3051_v26  ;;  %v878_v59 = vadd.f32 %v3735_v15, %v749_v47  ;;  %v4193_v24 = vld [vmem:[%s3711_s19 + $0xe8] sm:$0xff] }
  0xa4   : > { %3062 = vtanh.f32 %v2028_v21  ;;  %v1644_v61 = vadd.f32 %v1516_v33, %v1387_v8  ;;  %v1517_v62 = vmul.f32 %v3740_v17, %v1259_v56  ;;  %v2029_v41 = vadd.f32 %v3752_v25, %v1900_v28  ;;  %v4200_v26 = vld [vmem:[%s3711_s19 + $0x4e8] sm:$0xff] }
  0xa5   : > { %v3053_v3 = vpop.eup %3052  ;;  %2535 = vst [vmem:[%s3924_s30 + $0x70] sm:$0xff] %v2407_v30  ;;  %v493_v19 = vmul.f32 %v3722_v5, %v4147_v57  ;;  %v2408_v29 = vadd.f32 0.5, %v2280_v35  ;;  %v1389_v13 = vmul.f32 %v3729_v10, %v4072_v0  ;;  %v622_v12 = vmul.f32 %v4154_v34, %v3725_v7 }
  0xa6   : > { %v3055_v52 = vpop.eup %3054  ;;  %v1901_v45 = vadd.f32 %v1773_v51, %v1644_v61  ;;  %v1645_v8 = vadd.f32 %v1517_v62, %v1388_v53  ;;  %v1132_v46 = vmul.f32 0.5, %v3053_v3  ;;  %3064 = vtanh.f32 %v2029_v41  ;;  %v4210_v3 = vld [vmem:[%s3711_s19 + $0xf0] sm:$0xff] }
  0xa7   : > { %v2281_v11 = vmul.f32 0.5, %v3055_v52  ;;  %2536 = vst [vmem:[%s3924_s30 + $0x78] sm:$0xff] %v2408_v29  ;;  %3066 = vtanh.f32 %v878_v59  ;;  %v1775_v0 = vmul.f32 %v4085_v4, %v3742_v18  ;;  %v750_v22 = vadd.f32 %v622_v12, %v493_v19  ;;  %v4218_v52 = vld [vmem:[%s3711_s19 + $0x4f0] sm:$0xff] }
  0xa8   : > { %v3057_v50 = vpop.eup %3056  ;;  %v2030_v31 = vadd.f32 %v3752_v25, %v1901_v45  ;;  %v1902_v63 = vadd.f32 %v1774_v37, %v1645_v8  ;;  %v1260_v51 = vadd.f32 0.5, %v1132_v46  ;;  %v494_v38 = vmul.f32 %v3722_v5, %v4166_v27 }
  0xa9   : > { %v2409_v53 = vadd.f32 0.5, %v2281_v11  ;;  %v2282_v44 = vmul.f32 0.5, %v3057_v50  ;;  %v879_v16 = vadd.f32 %v3735_v15, %v750_v22  ;;  %v623_v4 = vmul.f32 %v4171_v39, %v3725_v7  ;;  %v4227_v50 = vld [vmem:[%s3711_s19 + $0xf8] sm:$0xff] }
  0xaa   : > { %3068 = vtanh.f32 %v2030_v31  ;;  %v2031_v6 = vadd.f32 %v3752_v25, %v1902_v63  ;;  %v1518_v40 = vmul.f32 %v3740_v17, %v1260_v51  ;;  %v495_v42 = vmul.f32 %v3722_v5, %v4180_v55 }
  0xab   : > { %v3059_v2 = vpop.eup %3058  ;;  %2537 = vst [vmem:[%s3924_s30 + $0x80] sm:$0xff] %v2409_v53  ;;  %v2410_v14 = vadd.f32 0.5, %v2282_v44  ;;  %v751_v60 = vadd.f32 %v623_v4, %v494_v38  ;;  %v1390_v33 = vmul.f32 %v3729_v10, %v4099_v32  ;;  %v624_v56 = vmul.f32 %v4187_v43, %v3725_v7 }
  0xac   : > { %3070 = vtanh.f32 %v2031_v6  ;;  %v1646_v23 = vadd.f32 %v1518_v40, %v1389_v13  ;;  %v1133_v1 = vmul.f32 0.5, %v3059_v2  ;;  %v1776_v37 = vmul.f32 %v4107_v36, %v3742_v18  ;;  %v4235_v6 = vld [vmem:[%s3711_s19 + $0x4f8] sm:$0xff] }
  0xad   : > { %v3061_v58 = vpop.eup %3060  ;;  %2538 = vst [vmem:[%s3924_s30 + $0x88] sm:$0xff] %v2410_v14  ;;  %3072 = vtanh.f32 %v879_v16  ;;  %v880_v47 = vadd.f32 %v3735_v15, %v751_v60  ;;  %v752_v62 = vadd.f32 %v624_v56, %v495_v42  ;;  %v496_v32 = vmul.f32 %v3722_v5, %v4193_v24  ;;  %v4251_v42 = vld [vmem:[%s3711_s19 + $0x500] sm:$0xff]  ;;  %v4259_v56 = vld [vmem:[%s3711_s19 + $0x108] sm:$0xff] }
  0xae   : > { %v2283_v20 = vmul.f32 0.5, %v3061_v58  ;;  %v3063_v48 = vpop.eup %3062  ;;  %v1903_v9 = vadd.f32 %v1775_v0, %v1646_v23  ;;  %v1261_v21 = vadd.f32 0.5, %v1133_v1  ;;  %v1391_v36 = vmul.f32 %v3729_v10, %v4119_v49  ;;  %v4245_v1 = vld [vmem:[%s3711_s19 + $0x100] sm:$0xff] }
  0xaf   : > { %v2284_v28 = vmul.f32 0.5, %v3063_v48  ;;  %3074 = vtanh.f32 %v880_v47  ;;  %v625_v19 = vmul.f32 %v4200_v26, %v3725_v7  ;;  %v881_v46 = vadd.f32 %v3735_v15, %v752_v62  ;;  %v4264_v47 = vld [vmem:[%s3711_s19 + $0x508] sm:$0xff] }
  0xb0   : > { %v2411_v30 = vadd.f32 0.5, %v2283_v20  ;;  %v2032_v35 = vadd.f32 %v3752_v25, %v1903_v9  ;;  %v1519_v61 = vmul.f32 %v3740_v17, %v1261_v21  ;;  %v3065_v41 = vpop.eup %3064  ;;  %v1777_v13 = vmul.f32 %v4129_v54, %v3742_v18 }
  0xb1   : > { %v2412_v59 = vadd.f32 0.5, %v2284_v28  ;;  %v3067_v29 = vpop.eup %3066  ;;  %v2285_v45 = vmul.f32 0.5, %v3065_v41  ;;  %v753_v49 = vadd.f32 %v625_v19, %v496_v32  ;;  %v497_v12 = vmul.f32 %v3722_v5, %v4210_v3 }
  0xb2   : > { %2539 = vst [vmem:[%s3924_s30 + $0x90] sm:$0xff] %v2411_v30  ;;  %3076 = vtanh.f32 %v2032_v35  ;;  %v1647_v8 = vadd.f32 %v1519_v61, %v1390_v33  ;;  %v1134_v11 = vmul.f32 0.5, %v3067_v29  ;;  %v626_v53 = vmul.f32 %v4218_v52, %v3725_v7 }
  0xb3   : > { %2540 = vst [vmem:[%s3924_s30 + $0x98] sm:$0xff] %v2412_v59  ;;  %v2413_v63 = vadd.f32 0.5, %v2285_v45  ;;  %3078 = vtanh.f32 %v881_v46  ;;  %v1392_v22 = vmul.f32 %v3729_v10, %v4147_v57  ;;  %v882_v54 = vadd.f32 %v3735_v15, %v753_v49  ;;  %v4283_v49 = vld [vmem:[%s3711_s19 + $0x110] sm:$0xff] }
  0xb4   : > { %v3069_v31 = vpop.eup %3068  ;;  %v1904_v51 = vadd.f32 %v1776_v37, %v1647_v8  ;;  %v1262_v0 = vadd.f32 0.5, %v1134_v11  ;;  %v1778_v2 = vmul.f32 %v4154_v34, %v3742_v18  ;;  %v754_v14 = vadd.f32 %v626_v53, %v497_v12  ;;  %v4286_v12 = vld [vmem:[%s3711_s19 + $0x510] sm:$0xff] }
  0xb5   : > { %v2286_v44 = vmul.f32 0.5, %v3069_v31  ;;  %2541 = vst [vmem:[%s3924_s30 + $0xa0] sm:$0xff] %v2413_v63  ;;  %v498_v16 = vmul.f32 %v3722_v5, %v4227_v50  ;;  %3080 = vtanh.f32 %v882_v54  ;;  %v627_v34 = vmul.f32 %v4235_v6, %v3725_v7 }
  0xb6   : > { %v3071_v40 = vpop.eup %3070  ;;  %v2033_v38 = vadd.f32 %v3752_v25, %v1904_v51  ;;  %v1520_v23 = vmul.f32 %v3740_v17, %v1262_v0  ;;  %v883_v60 = vadd.f32 %v3735_v15, %v754_v14  ;;  %v1393_v21 = vmul.f32 %v3729_v10, %v4166_v27 }
  0xb7   : > { %v3073_v4 = vpop.eup %3072  ;;  %v2414_v57 = vadd.f32 0.5, %v2286_v44  ;;  %v2287_v58 = vmul.f32 0.5, %v3071_v40  ;;  %v1779_v33 = vmul.f32 %v4171_v39, %v3742_v18  ;;  %v755_v28 = vadd.f32 %v627_v34, %v498_v16 }
  0xb8   : > { %3082 = vtanh.f32 %v2033_v38  ;;  %v1135_v20 = vmul.f32 0.5, %v3073_v4  ;;  %v1648_v9 = vadd.f32 %v1520_v23, %v1391_v36  ;;  %v499_v37 = vmul.f32 %v3722_v5, %v4245_v1 }
  0xb9   : > { %2542 = vst [vmem:[%s3924_s30 + $0xa8] sm:$0xff] %v2414_v57  ;;  %v2415_v48 = vadd.f32 0.5, %v2287_v58  ;;  %3084 = vtanh.f32 %v883_v60  ;;  %v3075_v35 = vpop.eup %3074  ;;  %v1394_v62 = vmul.f32 %v3729_v10, %v4180_v55  ;;  %v1780_v27 = vmul.f32 %v4187_v43, %v3742_v18  ;;  %v4303_v60 = vld [vmem:[%s3711_s19 + $0x118] sm:$0xff] }
  0xba   : > { %v1263_v30 = vadd.f32 0.5, %v1135_v20  ;;  %v1905_v61 = vadd.f32 %v1777_v13, %v1648_v9  ;;  %v628_v39 = vmul.f32 %v4251_v42, %v3725_v7  ;;  %v1136_v59 = vmul.f32 0.5, %v3075_v35 }
  0xbb   : > { %2543 = vst [vmem:[%s3924_s30 + $0xb0] sm:$0xff] %v2415_v48  ;;  %v884_v36 = vadd.f32 %v3735_v15, %v755_v28  ;;  %v500_v19 = vmul.f32 %v3722_v5, %v4259_v56  ;;  %v629_v43 = vmul.f32 %v4264_v47, %v3725_v7  ;;  %v1395_v13 = vmul.f32 %v3729_v10, %v4193_v24 }
  0xbc   : > { %v3077_v32 = vpop.eup %3076  ;;  %v1521_v41 = vmul.f32 %v3740_v17, %v1263_v30  ;;  %v2034_v55 = vadd.f32 %v3752_v25, %v1905_v61  ;;  %v756_v45 = vadd.f32 %v628_v39, %v499_v37  ;;  %v1264_v11 = vadd.f32 0.5, %v1136_v59  ;;  %v4308_v30 = vld [vmem:[%s3711_s19 + $0x518] sm:$0xff]  ;;  %v4311_v61 = vld [vmem:[%s3711_s19 + $0x120] sm:$0xff] }
  0xbd   : > { %v2288_v29 = vmul.f32 0.5, %v3077_v32  ;;  %v3079_v8 = vpop.eup %3078  ;;  %3086 = vtanh.f32 %v884_v36  ;;  %v1781_v0 = vmul.f32 %v4200_v26, %v3742_v18  ;;  %v501_v40 = vmul.f32 %v3722_v5, %v4283_v49  ;;  %v4324_v36 = vld [vmem:[%s3711_s19 + $0x520] sm:$0xff] }
  0xbe   : > { %v1649_v46 = vadd.f32 %v1521_v41, %v1392_v22  ;;  %3088 = vtanh.f32 %v2034_v55  ;;  %v1137_v63 = vmul.f32 0.5, %v3079_v8  ;;  %v885_v51 = vadd.f32 %v3735_v15, %v756_v45 }
  0xbf   : > { %v2416_v31 = vadd.f32 0.5, %v2288_v29  ;;  %v1522_v44 = vmul.f32 %v3740_v17, %v1264_v11  ;;  %v757_v22 = vadd.f32 %v629_v43, %v500_v19  ;;  %v3081_v54 = vpop.eup %3080  ;;  %v630_v38 = vmul.f32 %v4286_v12, %v3725_v7 }
  0xc0   : > { %v1906_v53 = vadd.f32 %v1778_v2, %v1649_v46  ;;  %v1265_v24 = vadd.f32 0.5, %v1137_v63  ;;  %3090 = vtanh.f32 %v885_v51  ;;  %v1138_v4 = vmul.f32 0.5, %v3081_v54 }
  0xc1   : > { %2544 = vst [vmem:[%s3924_s30 + $0xb8] sm:$0xff] %v2416_v31  ;;  %v1650_v16 = vadd.f32 %v1522_v44, %v1393_v21  ;;  %v886_v26 = vadd.f32 %v3735_v15, %v757_v22  ;;  %v1396_v23 = vmul.f32 %v3729_v10, %v4210_v3  ;;  %v758_v20 = vadd.f32 %v630_v38, %v501_v40  ;;  %v4337_v44 = vld [vmem:[%s3711_s19 + $0x128] sm:$0xff] }
  0xc2   : > { %v3083_v14 = vpop.eup %3082  ;;  %v2035_v2 = vadd.f32 %v3752_v25, %v1906_v53  ;;  %v1523_v58 = vmul.f32 %v3740_v17, %v1265_v24  ;;  %v1266_v9 = vadd.f32 0.5, %v1138_v4  ;;  %v1782_v21 = vmul.f32 %v4218_v52, %v3742_v18  ;;  %v4340_v22 = vld [vmem:[%s3711_s19 + $0x528] sm:$0xff] }
  0xc3   : > { %v2289_v57 = vmul.f32 0.5, %v3083_v14  ;;  %v3085_v34 = vpop.eup %3084  ;;  %v1907_v48 = vadd.f32 %v1779_v33, %v1650_v16  ;;  %v887_v32 = vadd.f32 %v3735_v15, %v758_v20  ;;  %v502_v33 = vmul.f32 %v3722_v5, %v4303_v60 }
  0xc4   : > { %3092 = vtanh.f32 %v2035_v2  ;;  %v1651_v37 = vadd.f32 %v1523_v58, %v1394_v62  ;;  %v1139_v35 = vmul.f32 0.5, %v3085_v34  ;;  %v1524_v39 = vmul.f32 %v3740_v17, %v1266_v9 }
  0xc5   : > { %v2417_v28 = vadd.f32 0.5, %v2289_v57  ;;  %3094 = vtanh.f32 %v886_v26  ;;  %v2036_v3 = vadd.f32 %v3752_v25, %v1907_v48  ;;  %v1397_v59 = vmul.f32 %v3729_v10, %v4227_v50 }
  0xc6   : > { %v1908_v52 = vadd.f32 %v1780_v27, %v1651_v37  ;;  %v1267_v41 = vadd.f32 0.5, %v1139_v35  ;;  %v631_v62 = vmul.f32 %v4308_v30, %v3725_v7  ;;  %v1652_v29 = vadd.f32 %v1524_v39, %v1395_v13 }
  0xc7   : > { %2545 = vst [vmem:[%s3924_s30 + $0xc0] sm:$0xff] %v2417_v28  ;;  %v3087_v19 = vpop.eup %3086  ;;  %3096 = vtanh.f32 %v2036_v3  ;;  %v1783_v55 = vmul.f32 %v4235_v6, %v3742_v18  ;;  %v503_v45 = vmul.f32 %v3722_v5, %v4311_v61  ;;  %v632_v13 = vmul.f32 %v4324_v36, %v3725_v7  ;;  %v4356_v28 = vld [vmem:[%s3711_s19 + $0x130] sm:$0xff] }
  0xc8   : > { %v3089_v27 = vpop.eup %3088  ;;  %v2037_v43 = vadd.f32 %v3752_v25, %v1908_v52  ;;  %v1525_v50 = vmul.f32 %v3740_v17, %v1267_v41  ;;  %v1140_v8 = vmul.f32 0.5, %v3087_v19  ;;  %3098 = vtanh.f32 %v887_v32  ;;  %v4362_v41 = vld [vmem:[%s3711_s19 + $0x530] sm:$0xff] }
  0xc9   : > { %v2290_v46 = vmul.f32 0.5, %v3089_v27  ;;  %v1909_v11 = vadd.f32 %v1781_v0, %v1652_v29  ;;  %v759_v31 = vadd.f32 %v631_v62, %v502_v33  ;;  %v1398_v53 = vmul.f32 %v3729_v10, %v4245_v1 }
  0xca   : > { %v3091_v63 = vpop.eup %3090  ;;  %3100 = vtanh.f32 %v2037_v43  ;;  %v1653_v6 = vadd.f32 %v1525_v50, %v1396_v23  ;;  %v1268_v51 = vadd.f32 0.5, %v1140_v8  ;;  %v1784_v2 = vmul.f32 %v4251_v42, %v3742_v18  ;;  %v4372_v43 = vld [vmem:[%s3711_s19 + $0x138] sm:$0xff] }
  0xcb   : > { %v2418_v54 = vadd.f32 0.5, %v2290_v46  ;;  %v2038_v24 = vadd.f32 %v3752_v25, %v1909_v11  ;;  %v1141_v0 = vmul.f32 0.5, %v3091_v63  ;;  %v888_v40 = vadd.f32 %v3735_v15, %v759_v31  ;;  %v4375_v50 = vld [vmem:[%s3711_s19 + $0x538] sm:$0xff] }
  0xcc   : > { %v1910_v38 = vadd.f32 %v1782_v21, %v1653_v6  ;;  %v1526_v14 = vmul.f32 %v3740_v17, %v1268_v51  ;;  %v760_v16 = vadd.f32 %v632_v13, %v503_v45  ;;  %v504_v26 = vmul.f32 %v3722_v5, %v4337_v44 }
  0xcd   : > { %2546 = vst [vmem:[%s3924_s30 + $0xc8] sm:$0xff] %v2418_v54  ;;  %3102 = vtanh.f32 %v2038_v24  ;;  %v1269_v1 = vadd.f32 0.5, %v1141_v0  ;;  %v633_v57 = vmul.f32 %v4340_v22, %v3725_v7  ;;  %v1399_v3 = vmul.f32 %v3729_v10, %v4259_v56 }
  0xce   : > { %v3093_v4 = vpop.eup %3092  ;;  %v2039_v20 = vadd.f32 %v3752_v25, %v1910_v38  ;;  %v1654_v34 = vadd.f32 %v1526_v14, %v1397_v59  ;;  %3104 = vtanh.f32 %v888_v40  ;;  %v889_v9 = vadd.f32 %v3735_v15, %v760_v16  ;;  %v4391_v14 = vld [vmem:[%s3711_s19 + $0x140] sm:$0xff] }
  0xcf   : > { %v3095_v58 = vpop.eup %3094  ;;  %v2291_v23 = vmul.f32 0.5, %v3093_v4  ;;  %v1527_v42 = vmul.f32 %v3740_v17, %v1269_v1  ;;  %v761_v21 = vadd.f32 %v633_v57, %v504_v26  ;;  %v1785_v29 = vmul.f32 %v4264_v47, %v3742_v18 }
  0xd0   : > { %v1142_v48 = vmul.f32 0.5, %v3095_v58  ;;  %3106 = vtanh.f32 %v2039_v20  ;;  %v1911_v35 = vadd.f32 %v1783_v55, %v1654_v34  ;;  %v505_v56 = vmul.f32 %v3722_v5, %v4356_v28  ;;  %v4401_v20 = vld [vmem:[%s3711_s19 + $0x540] sm:$0xff] }
  0xd1   : > { %v2419_v37 = vadd.f32 0.5, %v2291_v23  ;;  %v3097_v39 = vpop.eup %3096  ;;  %v1655_v32 = vadd.f32 %v1527_v42, %v1398_v53  ;;  %3108 = vtanh.f32 %v889_v9  ;;  %v890_v52 = vadd.f32 %v3735_v15, %v761_v21 }
  0xd2   : > { %v1270_v33 = vadd.f32 0.5, %v1142_v48  ;;  %v3099_v59 = vpop.eup %3098  ;;  %v2292_v62 = vmul.f32 0.5, %v3097_v39  ;;  %v2040_v19 = vadd.f32 %v3752_v25, %v1911_v35  ;;  %v1400_v11 = vmul.f32 %v3729_v10, %v4283_v49 }
  0xd3   : > { %2547 = vst [vmem:[%s3924_s30 + $0xd0] sm:$0xff] %v2419_v37  ;;  %v1912_v55 = vadd.f32 %v1784_v2, %v1655_v32  ;;  %v1143_v27 = vmul.f32 0.5, %v3099_v59  ;;  %3110 = vtanh.f32 %v890_v52  ;;  %v634_v47 = vmul.f32 %v4362_v41, %v3725_v7 }
  0xd4   : > { %v1528_v45 = vmul.f32 %v3740_v17, %v1270_v33  ;;  %v3101_v8 = vpop.eup %3100  ;;  %v2420_v46 = vadd.f32 0.5, %v2292_v62  ;;  %3112 = vtanh.f32 %v2040_v19  ;;  %v1786_v51 = vmul.f32 %v4286_v12, %v3742_v18  ;;  %v4415_v33 = vld [vmem:[%s3711_s19 + $0x548] sm:$0xff] }
  0xd5   : > { %v2293_v31 = vmul.f32 0.5, %v3101_v8  ;;  %v2041_v13 = vadd.f32 %v3752_v25, %v1912_v55  ;;  %v1271_v6 = vadd.f32 0.5, %v1143_v27  ;;  %v762_v53 = vadd.f32 %v634_v47, %v505_v56 }
  0xd6   : > { %v1656_v63 = vadd.f32 %v1528_v45, %v1399_v3  ;;  %2548 = vst [vmem:[%s3924_s30 + $0xd8] sm:$0xff] %v2420_v46  ;;  %v506_v54 = vmul.f32 %v3722_v5, %v4372_v43  ;;  %v635_v49 = vmul.f32 %v4375_v50, %v3725_v7  ;;  %v1401_v12 = vmul.f32 %v3729_v10, %v4303_v60  ;;  %v4407_v3 = vld [vmem:[%s3711_s19 + $0x148] sm:$0xff] }
  0xd7   : > { %v3103_v24 = vpop.eup %3102  ;;  %v2421_v0 = vadd.f32 0.5, %v2293_v31  ;;  %3114 = vtanh.f32 %v2041_v13  ;;  %v1529_v38 = vmul.f32 %v3740_v17, %v1271_v6  ;;  %v891_v4 = vadd.f32 %v3735_v15, %v762_v53  ;;  %v4434_v6 = vld [vmem:[%s3711_s19 + $0x550] sm:$0xff] }
  0xd8   : > { %v1913_v40 = vadd.f32 %v1785_v29, %v1656_v63  ;;  %v3105_v2 = vpop.eup %3104  ;;  %v2294_v16 = vmul.f32 0.5, %v3103_v24  ;;  %v763_v1 = vadd.f32 %v635_v49, %v506_v54  ;;  %v1787_v23 = vmul.f32 %v4308_v30, %v3742_v18  ;;  %v4431_v63 = vld [vmem:[%s3711_s19 + $0x150] sm:$0xff] }
  0xd9   : > { %2549 = vst [vmem:[%s3924_s30 + $0xe0] sm:$0xff] %v2421_v0  ;;  %v1657_v57 = vadd.f32 %v1529_v38, %v1400_v11  ;;  %v1144_v58 = vmul.f32 0.5, %v3105_v2  ;;  %3116 = vtanh.f32 %v891_v4  ;;  %v507_v48 = vmul.f32 %v3722_v5, %v4391_v14 }
  0xda   : > { %v2042_v26 = vadd.f32 %v3752_v25, %v1913_v40  ;;  %v3107_v34 = vpop.eup %3106  ;;  %v2422_v42 = vadd.f32 0.5, %v2294_v16  ;;  %v892_v60 = vadd.f32 %v3735_v15, %v763_v1  ;;  %v1402_v39 = vmul.f32 %v3729_v10, %v4311_v61 }
  0xdb   : > { %v3109_v9 = vpop.eup %3108  ;;  %v2295_v21 = vmul.f32 0.5, %v3107_v34  ;;  %v1914_v37 = vadd.f32 %v1786_v51, %v1657_v57  ;;  %v1272_v35 = vadd.f32 0.5, %v1144_v58  ;;  %v636_v32 = vmul.f32 %v4401_v20, %v3725_v7  ;;  %v4449_v58 = vld [vmem:[%s3711_s19 + $0x158] sm:$0xff] }
  0xdc   : > { %3118 = vtanh.f32 %v2042_v26  ;;  %2550 = vst [vmem:[%s3924_s30 + $0xe8] sm:$0xff] %v2422_v42  ;;  %v1145_v30 = vmul.f32 0.5, %v3109_v9  ;;  %v1788_v29 = vmul.f32 %v4324_v36, %v3742_v18  ;;  %v508_v27 = vmul.f32 %v3722_v5, %v4407_v3 }
  0xdd   : > { %3120 = vtanh.f32 %v892_v60  ;;  %v3111_v52 = vpop.eup %3110  ;;  %v2423_v59 = vadd.f32 0.5, %v2295_v21  ;;  %v2043_v62 = vadd.f32 %v3752_v25, %v1914_v37  ;;  %v1530_v19 = vmul.f32 %v3740_v17, %v1272_v35 }
  0xde   : > { %v3113_v56 = vpop.eup %3112  ;;  %v1273_v55 = vadd.f32 0.5, %v1145_v30  ;;  %v1146_v61 = vmul.f32 0.5, %v3111_v52  ;;  %v764_v45 = vadd.f32 %v636_v32, %v507_v48  ;;  %v637_v11 = vmul.f32 %v4415_v33, %v3725_v7  ;;  %v4454_v48 = vld [vmem:[%s3711_s19 + $0x558] sm:$0xff] }
  0xdf   : > { %2551 = vst [vmem:[%s3924_s30 + $0xf0] sm:$0xff] %v2423_v59  ;;  %v2296_v8 = vmul.f32 0.5, %v3113_v56  ;;  %3122 = vtanh.f32 %v2043_v62  ;;  %v1658_v46 = vadd.f32 %v1530_v19, %v1401_v12  ;;  %v1403_v36 = vmul.f32 %v3729_v10, %v4337_v44  ;;  %v4465_v62 = vld [vmem:[%s3711_s19 + $0x160] sm:$0xff] }
  0xe0   : > { %v1531_v47 = vmul.f32 %v3740_v17, %v1273_v55  ;;  %v1274_v31 = vadd.f32 0.5, %v1146_v61  ;;  %v893_v13 = vadd.f32 %v3735_v15, %v764_v45  ;;  %v1789_v49 = vmul.f32 %v4340_v22, %v3742_v18  ;;  %v4468_v19 = vld [vmem:[%s3711_s19 + $0x560] sm:$0xff] }
  0xe1   : > { %v3115_v51 = vpop.eup %3114  ;;  %v2424_v53 = vadd.f32 0.5, %v2296_v8  ;;  %v1915_v54 = vadd.f32 %v1787_v23, %v1658_v46  ;;  %v765_v24 = vadd.f32 %v637_v11, %v508_v27  ;;  %v509_v16 = vmul.f32 %v3722_v5, %v4431_v63 }
  0xe2   : > { %v2297_v0 = vmul.f32 0.5, %v3115_v51  ;;  %v1659_v40 = vadd.f32 %v1531_v47, %v1402_v39  ;;  %v1532_v38 = vmul.f32 %v3740_v17, %v1274_v31  ;;  %3124 = vtanh.f32 %v893_v13 }
  0xe3   : > { %2552 = vst [vmem:[%s3924_s30 + $0xf8] sm:$0xff] %v2424_v53  ;;  %v2044_v44 = vadd.f32 %v3752_v25, %v1915_v54  ;;  %v894_v2 = vadd.f32 %v3735_v15, %v765_v24  ;;  %v638_v22 = vmul.f32 %v4434_v6, %v3725_v7  ;;  %v3117_v12 = vpop.eup %3116  ;;  %v1404_v57 = vmul.f32 %v3729_v10, %v4356_v28 }
  0xe4   : > { %v2425_v4 = vadd.f32 0.5, %v2297_v0  ;;  %v1916_v1 = vadd.f32 %v1788_v29, %v1659_v40  ;;  %v1660_v26 = vadd.f32 %v1532_v38, %v1403_v36  ;;  %v1147_v34 = vmul.f32 0.5, %v3117_v12  ;;  %v4485_v36 = vld [vmem:[%s3711_s19 + $0x568] sm:$0xff]  ;;  %v4493_v38 = vld [vmem:[%s3711_s19 + $0x170] sm:$0xff] }
  0xe5   : > { %3126 = vtanh.f32 %v2044_v44  ;;  %v1790_v42 = vmul.f32 %v4362_v41, %v3742_v18  ;;  %v766_v60 = vadd.f32 %v638_v22, %v509_v16  ;;  %v510_v41 = vmul.f32 %v3722_v5, %v4449_v58 }
  0xe6   : > { %v3119_v23 = vpop.eup %3118  ;;  %2553 = vst [vmem:[%s3924_s30 + $0x100] sm:$0xff] %v2425_v4  ;;  %v2045_v37 = vadd.f32 %v3752_v25, %v1916_v1  ;;  %v1917_v35 = vadd.f32 %v1789_v49, %v1660_v26  ;;  %3128 = vtanh.f32 %v894_v2  ;;  %v1275_v28 = vadd.f32 0.5, %v1147_v34  ;;  %v4505_v1 = vld [vmem:[%s3711_s19 + $0x570] sm:$0xff] }
  0xe7   : > { %v3121_v9 = vpop.eup %3120  ;;  %v2298_v21 = vmul.f32 0.5, %v3119_v23  ;;  %v895_v39 = vadd.f32 %v3735_v15, %v766_v60  ;;  %v639_v59 = vmul.f32 %v4454_v48, %v3725_v7  ;;  %v1405_v61 = vmul.f32 %v3729_v10, %v4372_v43  ;;  %v4482_v43 = vld [vmem:[%s3711_s19 + $0x168] sm:$0xff] }
  0xe8   : > { %v1148_v30 = vmul.f32 0.5, %v3121_v9  ;;  %3130 = vtanh.f32 %v2045_v37  ;;  %v2046_v52 = vadd.f32 %v3752_v25, %v1917_v35  ;;  %v1533_v56 = vmul.f32 %v3740_v17, %v1275_v28 }
  0xe9   : > { %v2426_v32 = vadd.f32 0.5, %v2298_v21  ;;  %v3123_v29 = vpop.eup %3122  ;;  %3132 = vtanh.f32 %v895_v39  ;;  %v1791_v27 = vmul.f32 %v4375_v50, %v3742_v18  ;;  %v767_v8 = vadd.f32 %v639_v59, %v510_v41 }
  0xea   : > { %v1276_v55 = vadd.f32 0.5, %v1148_v30  ;;  %v2299_v45 = vmul.f32 0.5, %v3123_v29  ;;  %3134 = vtanh.f32 %v2046_v52  ;;  %v1661_v46 = vadd.f32 %v1533_v56, %v1404_v57 }
  0xeb   : > { %2554 = vst [vmem:[%s3924_s30 + $0x108] sm:$0xff] %v2426_v32  ;;  %v511_v47 = vmul.f32 %v3722_v5, %v4465_v62  ;;  %v640_v31 = vmul.f32 %v4468_v19, %v3725_v7  ;;  %v1406_v50 = vmul.f32 %v3729_v10, %v4391_v14  ;;  %v1792_v53 = vmul.f32 %v4401_v20, %v3742_v18  ;;  %v4517_v32 = vld [vmem:[%s3711_s19 + $0x178] sm:$0xff] }
  0xec   : > { %v1534_v11 = vmul.f32 %v3740_v17, %v1276_v55  ;;  %v3125_v13 = vpop.eup %3124  ;;  %v2427_v51 = vadd.f32 0.5, %v2299_v45  ;;  %v896_v54 = vadd.f32 %v3735_v15, %v767_v8  ;;  %v1918_v49 = vadd.f32 %v1790_v42, %v1661_v46  ;;  %v4523_v55 = vld [vmem:[%s3711_s19 + $0x578] sm:$0xff] }
  0xed   : > { %v1149_v0 = vmul.f32 0.5, %v3125_v13  ;;  %v768_v40 = vadd.f32 %v640_v31, %v511_v47  ;;  %v1407_v44 = vmul.f32 %v3729_v10, %v4407_v3  ;;  %v512_v14 = vmul.f32 %v3722_v5, %v4482_v43 }
  0xee   : > { %v1662_v24 = vadd.f32 %v1534_v11, %v1405_v61  ;;  %2555 = vst [vmem:[%s3924_s30 + $0x110] sm:$0xff] %v2427_v51  ;;  %3136 = vtanh.f32 %v896_v54  ;;  %v641_v20 = vmul.f32 %v4485_v36, %v3725_v7  ;;  %v2047_v16 = vadd.f32 %v3752_v25, %v1918_v49  ;;  %v4539_v54 = vld [vmem:[%s3711_s19 + $0x580] sm:$0xff] }
  0xef   : > { %v3127_v2 = vpop.eup %3126  ;;  %v1277_v12 = vadd.f32 0.5, %v1149_v0  ;;  %v897_v4 = vadd.f32 %v3735_v15, %v768_v40  ;;  %v1793_v3 = vmul.f32 %v4415_v33, %v3742_v18  ;;  %v513_v34 = vmul.f32 %v3722_v5, %v4493_v38 }
  0xf0   : > { %v1919_v22 = vadd.f32 %v1791_v27, %v1662_v24  ;;  %v3129_v26 = vpop.eup %3128  ;;  %v2300_v57 = vmul.f32 0.5, %v3127_v2  ;;  %v769_v23 = vadd.f32 %v641_v20, %v512_v14  ;;  %3138 = vtanh.f32 %v2047_v16  ;;  %v4548_v20 = vld [vmem:[%s3711_s19 + $0x188] sm:$0xff] }
  0xf1   : > { %v1535_v60 = vmul.f32 %v3740_v17, %v1277_v12  ;;  %v1150_v9 = vmul.f32 0.5, %v3129_v26  ;;  %3140 = vtanh.f32 %v897_v4  ;;  %v642_v33 = vmul.f32 %v4505_v1, %v3725_v7  ;;  %v4557_v12 = vld [vmem:[%s3711_s19 + $0x588] sm:$0xff] }
  0xf2   : > { %v2048_v42 = vadd.f32 %v3752_v25, %v1919_v22  ;;  %v3131_v21 = vpop.eup %3130  ;;  %v2428_v37 = vadd.f32 0.5, %v2300_v57  ;;  %v898_v35 = vadd.f32 %v3735_v15, %v769_v23  ;;  %v1408_v29 = vmul.f32 %v3729_v10, %v4431_v63 }
  0xf3   : > { %v3133_v28 = vpop.eup %3132  ;;  %v2301_v30 = vmul.f32 0.5, %v3131_v21  ;;  %v1663_v39 = vadd.f32 %v1535_v60, %v1406_v50  ;;  %v1278_v41 = vadd.f32 0.5, %v1150_v9  ;;  %v770_v56 = vadd.f32 %v642_v33, %v513_v34 }
  0xf4   : > { %3142 = vtanh.f32 %v2048_v42  ;;  %v3135_v52 = vpop.eup %3134  ;;  %2556 = vst [vmem:[%s3924_s30 + $0x118] sm:$0xff] %v2428_v37  ;;  %v1151_v59 = vmul.f32 0.5, %v3133_v28  ;;  %v1794_v11 = vmul.f32 %v4434_v6, %v3742_v18  ;;  %v514_v63 = vmul.f32 %v3722_v5, %v4517_v32 }
  0xf5   : > { %3144 = vtanh.f32 %v898_v35  ;;  %v2429_v61 = vadd.f32 0.5, %v2301_v30  ;;  %v2302_v45 = vmul.f32 0.5, %v3135_v52  ;;  %v1920_v27 = vadd.f32 %v1792_v53, %v1663_v39  ;;  %v4536_v53 = vld [vmem:[%s3711_s19 + $0x180] sm:$0xff] }
  0xf6   : > { %v1536_v8 = vmul.f32 %v3740_v17, %v1278_v41  ;;  %v1279_v46 = vadd.f32 0.5, %v1151_v59  ;;  %v899_v47 = vadd.f32 %v3735_v15, %v770_v56  ;;  %v643_v50 = vmul.f32 %v4523_v55, %v3725_v7  ;;  %v4574_v56 = vld [vmem:[%s3711_s19 + $0x590] sm:$0xff] }
  0xf7   : > { %2557 = vst [vmem:[%s3924_s30 + $0x120] sm:$0xff] %v2429_v61  ;;  %v2430_v31 = vadd.f32 0.5, %v2302_v45  ;;  %v2049_v13 = vadd.f32 %v3752_v25, %v1920_v27  ;;  %v1409_v24 = vmul.f32 %v3729_v10, %v4449_v58  ;;  %v1795_v0 = vmul.f32 %v4454_v48, %v3742_v18 }
  0xf8   : > { %v1664_v51 = vadd.f32 %v1536_v8, %v1407_v44  ;;  %v3137_v6 = vpop.eup %3136  ;;  %v1537_v49 = vmul.f32 %v3740_v17, %v1279_v46  ;;  %3146 = vtanh.f32 %v899_v47  ;;  %v771_v14 = vadd.f32 %v643_v50, %v514_v63 }
  0xf9   : > { %2558 = vst [vmem:[%s3924_s30 + $0x128] sm:$0xff] %v2430_v31  ;;  %3148 = vtanh.f32 %v2049_v13  ;;  %v1152_v44 = vmul.f32 0.5, %v3137_v6  ;;  %v1410_v16 = vmul.f32 %v3729_v10, %v4465_v62  ;;  %v515_v22 = vmul.f32 %v3722_v5, %v4536_v53 }
  0xfa   : > { %v1921_v40 = vadd.f32 %v1793_v3, %v1664_v51  ;;  %v1665_v2 = vadd.f32 %v1537_v49, %v1408_v29  ;;  %v644_v58 = vmul.f32 %v4539_v54, %v3725_v7  ;;  %v3139_v48 = vpop.eup %3138  ;;  %v1796_v57 = vmul.f32 %v4468_v19, %v3742_v18  ;;  %v4571_v29 = vld [vmem:[%s3711_s19 + $0x190] sm:$0xff] }
  0xfb   : > { %v1280_v26 = vadd.f32 0.5, %v1152_v44  ;;  %v900_v3 = vadd.f32 %v3735_v15, %v771_v14  ;;  %v3141_v23 = vpop.eup %3140  ;;  %v2303_v34 = vmul.f32 0.5, %v3139_v48  ;;  %v516_v60 = vmul.f32 %v3722_v5, %v4548_v20  ;;  %v4596_v14 = vld [vmem:[%s3711_s19 + $0x598] sm:$0xff] }
  0xfc   : > { %v2050_v4 = vadd.f32 %v3752_v25, %v1921_v40  ;;  %v1922_v62 = vadd.f32 %v1794_v11, %v1665_v2  ;;  %v772_v42 = vadd.f32 %v644_v58, %v515_v22  ;;  %v1153_v37 = vmul.f32 0.5, %v3141_v23 }
  0xfd   : > { %v1538_v21 = vmul.f32 %v3740_v17, %v1280_v26  ;;  %v645_v19 = vmul.f32 %v4557_v12, %v3725_v7  ;;  %v2431_v33 = vadd.f32 0.5, %v2303_v34  ;;  %v1411_v45 = vmul.f32 %v3729_v10, %v4482_v43 }
  0xfe   : > { %v3143_v9 = vpop.eup %3142  ;;  %3150 = vtanh.f32 %v2050_v4  ;;  %v2051_v30 = vadd.f32 %v3752_v25, %v1922_v62  ;;  %v1281_v41 = vadd.f32 0.5, %v1153_v37  ;;  %v901_v59 = vadd.f32 %v3735_v15, %v772_v42  ;;  %v4608_v62 = vld [vmem:[%s3711_s19 + $0x1a0] sm:$0xff] }
  0xff   : > { %v3145_v35 = vpop.eup %3144  ;;  %v2304_v28 = vmul.f32 0.5, %v3143_v9  ;;  %3152 = vtanh.f32 %v900_v3  ;;  %v1666_v39 = vadd.f32 %v1538_v21, %v1409_v24  ;;  %2559 = vst [vmem:[%s3924_s30 + $0x130] sm:$0xff] %v2431_v33  ;;  %v773_v27 = vadd.f32 %v645_v19, %v516_v60  ;;  %v4611_v42 = vld [vmem:[%s3711_s19 + $0x5a0] sm:$0xff] }
 0x100   : > { %v1154_v52 = vmul.f32 0.5, %v3145_v35  ;;  %3154 = vtanh.f32 %v2051_v30  ;;  %v1539_v46 = vmul.f32 %v3740_v17, %v1281_v41  ;;  %v1797_v63 = vmul.f32 %v4485_v36, %v3742_v18 }
 0x101   : > { %v2432_v61 = vadd.f32 0.5, %v2304_v28  ;;  %v1923_v8 = vadd.f32 %v1795_v0, %v1666_v39  ;;  %3156 = vtanh.f32 %v901_v59  ;;  %v902_v31 = vadd.f32 %v3735_v15, %v773_v27  ;;  %v4591_v0 = vld [vmem:[%s3711_s19 + $0x198] sm:$0xff] }
 0x102   : > { %v1282_v11 = vadd.f32 0.5, %v1154_v52  ;;  %v3147_v47 = vpop.eup %3146  ;;  %v517_v13 = vmul.f32 %v3722_v5, %v4571_v29  ;;  %v646_v43 = vmul.f32 %v4574_v56, %v3725_v7  ;;  %v1667_v6 = vadd.f32 %v1539_v46, %v1410_v16 }
 0x103   : > { %2560 = vst [vmem:[%s3924_s30 + $0x138] sm:$0xff] %v2432_v61  ;;  %v3149_v51 = vpop.eup %3148  ;;  %v2052_v50 = vadd.f32 %v3752_v25, %v1923_v8  ;;  %v1155_v24 = vmul.f32 0.5, %v3147_v47  ;;  %v1412_v36 = vmul.f32 %v3729_v10, %v4493_v38  ;;  %3158 = vtanh.f32 %v902_v31  ;;  %v4624_v61 = vld [vmem:[%s3711_s19 + $0x1a8] sm:$0xff] }
 0x104   : > { %v1540_v49 = vmul.f32 %v3740_v17, %v1282_v11  ;;  %v2305_v40 = vmul.f32 0.5, %v3149_v51  ;;  %v774_v44 = vadd.f32 %v646_v43, %v517_v13  ;;  %v1924_v2 = vadd.f32 %v1796_v57, %v1667_v6  ;;  %v4631_v11 = vld [vmem:[%s3711_s19 + $0x5a8] sm:$0xff] }
 0x105   : > { %3160 = vtanh.f32 %v2052_v50  ;;  %v1283_v16 = vadd.f32 0.5, %v1155_v24  ;;  %v1798_v48 = vmul.f32 %v4505_v1, %v3742_v18  ;;  %v518_v38 = vmul.f32 %v3722_v5, %v4591_v0 }
 0x106   : > { %v1668_v22 = vadd.f32 %v1540_v49, %v1411_v45  ;;  %v2433_v58 = vadd.f32 0.5, %v2305_v40  ;;  %v903_v4 = vadd.f32 %v3735_v15, %v774_v44  ;;  %v2053_v3 = vadd.f32 %v3752_v25, %v1924_v2  ;;  %v4647_v44 = vld [vmem:[%s3711_s19 + $0x5b0] sm:$0xff] }
 0x107   : > { %v1541_v34 = vmul.f32 %v3740_v17, %v1283_v16  ;;  %v647_v57 = vmul.f32 %v4596_v14, %v3725_v7  ;;  %v1413_v9 = vmul.f32 %v3729_v10, %v4517_v32  ;;  %v1799_v21 = vmul.f32 %v4523_v55, %v3742_v18 }
 0x108   : > { %v3151_v26 = vpop.eup %3150  ;;  %v1925_v23 = vadd.f32 %v1797_v63, %v1668_v22  ;;  %2561 = vst [vmem:[%s3924_s30 + $0x140] sm:$0xff] %v2433_v58  ;;  %3162 = vtanh.f32 %v903_v4  ;;  %v519_v39 = vmul.f32 %v3722_v5, %v4608_v62  ;;  %v648_v32 = vmul.f32 %v4611_v42, %v3725_v7 }
 0x109   : > { %v3153_v60 = vpop.eup %3152  ;;  %v2306_v1 = vmul.f32 0.5, %v3151_v26  ;;  %3164 = vtanh.f32 %v2053_v3  ;;  %v1669_v19 = vadd.f32 %v1541_v34, %v1412_v36  ;;  %v775_v30 = vadd.f32 %v647_v57, %v518_v38  ;;  %v4644_v36 = vld [vmem:[%s3711_s19 + $0x1b0] sm:$0xff] }
 0x10a   : > { %v2054_v37 = vadd.f32 %v3752_v25, %v1925_v23  ;;  %v1156_v35 = vmul.f32 0.5, %v3153_v60  ;;  %v3155_v33 = vpop.eup %3154  ;;  %v1414_v27 = vmul.f32 %v3729_v10, %v4536_v53  ;;  %v776_v46 = vadd.f32 %v648_v32, %v519_v39  ;;  %v4670_v32 = vld [vmem:[%s3711_s19 + $0x5b8] sm:$0xff] }
 0x10b   : > { %v2434_v28 = vadd.f32 0.5, %v2306_v1  ;;  %v3157_v41 = vpop.eup %3156  ;;  %v2307_v55 = vmul.f32 0.5, %v3155_v33  ;;  %v1926_v52 = vadd.f32 %v1798_v48, %v1669_v19  ;;  %v904_v8 = vadd.f32 %v3735_v15, %v775_v30 }
 0x10c   : > { %3166 = vtanh.f32 %v2054_v37  ;;  %v1284_v59 = vadd.f32 0.5, %v1156_v35  ;;  %v1157_v45 = vmul.f32 0.5, %v3157_v41  ;;  %v1800_v13 = vmul.f32 %v4539_v54, %v3742_v18  ;;  %v4665_v35 = vld [vmem:[%s3711_s19 + $0x1b8] sm:$0xff] }
 0x10d   : > { %2562 = vst [vmem:[%s3924_s30 + $0x148] sm:$0xff] %v2434_v28  ;;  %v2435_v47 = vadd.f32 0.5, %v2307_v55  ;;  %v2055_v63 = vadd.f32 %v3752_v25, %v1926_v52  ;;  %v3159_v43 = vpop.eup %3158  ;;  %3168 = vtanh.f32 %v904_v8  ;;  %v905_v53 = vadd.f32 %v3735_v15, %v776_v46  ;;  %v4678_v8 = vld [vmem:[%s3711_s19 + $0x1c0] sm:$0xff] }
 0x10e   : > { %v1542_v31 = vmul.f32 %v3740_v17, %v1284_v59  ;;  %v1285_v51 = vadd.f32 0.5, %v1157_v45  ;;  %v520_v50 = vmul.f32 %v3722_v5, %v4624_v61  ;;  %v1158_v24 = vmul.f32 0.5, %v3159_v43 }
 0x10f   : > { %v3161_v6 = vpop.eup %3160  ;;  %2563 = vst [vmem:[%s3924_s30 + $0x150] sm:$0xff] %v2435_v47  ;;  %3170 = vtanh.f32 %v2055_v63  ;;  %v649_v40 = vmul.f32 %v4631_v11, %v3725_v7  ;;  %v1415_v22 = vmul.f32 %v3729_v10, %v4548_v20  ;;  %v1801_v48 = vmul.f32 %v4557_v12, %v3742_v18 }
 0x110   : > { %v1670_v49 = vadd.f32 %v1542_v31, %v1413_v9  ;;  %v2308_v54 = vmul.f32 0.5, %v3161_v6  ;;  %v1543_v2 = vmul.f32 %v3740_v17, %v1285_v51  ;;  %3172 = vtanh.f32 %v905_v53  ;;  %v4687_v53 = vld [vmem:[%s3711_s19 + $0x5c0] sm:$0xff] }
 0x111   : > { %v1286_v58 = vadd.f32 0.5, %v1158_v24  ;;  %v777_v4 = vadd.f32 %v649_v40, %v520_v50  ;;  %v521_v23 = vmul.f32 %v3722_v5, %v4644_v36  ;;  %v650_v34 = vmul.f32 %v4647_v44, %v3725_v7 }
 0x112   : > { %v1927_v16 = vadd.f32 %v1799_v21, %v1670_v49  ;;  %v3163_v38 = vpop.eup %3162  ;;  %v2436_v26 = vadd.f32 0.5, %v2308_v54  ;;  %v1671_v3 = vadd.f32 %v1543_v2, %v1414_v27  ;;  %v1416_v37 = vmul.f32 %v3729_v10, %v4571_v29 }
 0x113   : > { %v3165_v57 = vpop.eup %3164  ;;  %v1544_v60 = vmul.f32 %v3740_v17, %v1286_v58  ;;  %v1159_v1 = vmul.f32 0.5, %v3163_v38  ;;  %v906_v12 = vadd.f32 %v3735_v15, %v777_v4  ;;  %v778_v19 = vadd.f32 %v650_v34, %v521_v23 }
 0x114   : > { %v2056_v20 = vadd.f32 %v3752_v25, %v1927_v16  ;;  %2564 = vst [vmem:[%s3924_s30 + $0x158] sm:$0xff] %v2436_v26  ;;  %v2309_v9 = vmul.f32 0.5, %v3165_v57  ;;  %v1928_v21 = vadd.f32 %v1800_v13, %v1671_v3  ;;  %v1802_v39 = vmul.f32 %v4574_v56, %v3742_v18  ;;  %v4698_v16 = vld [vmem:[%s3711_s19 + $0x5c8] sm:$0xff] }
 0x115   : > { %v1672_v28 = vadd.f32 %v1544_v60, %v1415_v22  ;;  %v1287_v30 = vadd.f32 0.5, %v1159_v1  ;;  %v907_v45 = vadd.f32 %v3735_v15, %v778_v19  ;;  %v522_v27 = vmul.f32 %v3722_v5, %v4665_v35  ;;  %v4695_v22 = vld [vmem:[%s3711_s19 + $0x1c8] sm:$0xff] }
 0x116   : > { %v3167_v33 = vpop.eup %3166  ;;  %3174 = vtanh.f32 %v2056_v20  ;;  %v2437_v41 = vadd.f32 0.5, %v2309_v9  ;;  %v2057_v52 = vadd.f32 %v3752_v25, %v1928_v21  ;;  %v1417_v47 = vmul.f32 %v3729_v10, %v4591_v0  ;;  %v4715_v20 = vld [vmem:[%s3711_s19 + $0x1d0] sm:$0xff] }
 0x117   : > { %v2310_v55 = vmul.f32 0.5, %v3167_v33  ;;  %3176 = vtanh.f32 %v906_v12  ;;  %v1929_v29 = vadd.f32 %v1801_v48, %v1672_v28  ;;  %v1545_v59 = vmul.f32 %v3740_v17, %v1287_v30  ;;  %v3169_v56 = vpop.eup %3168 }
 0x118   : > { %2565 = vst [vmem:[%s3924_s30 + $0x160] sm:$0xff] %v2437_v41  ;;  %3178 = vtanh.f32 %v2057_v52  ;;  %v651_v63 = vmul.f32 %v4670_v32, %v3725_v7  ;;  %v1160_v51 = vmul.f32 0.5, %v3169_v56  ;;  %v1803_v49 = vmul.f32 %v4596_v14, %v3742_v18 }
 0x119   : > { %v2438_v46 = vadd.f32 0.5, %v2310_v55  ;;  %v3171_v31 = vpop.eup %3170  ;;  %v2058_v13 = vadd.f32 %v3752_v25, %v1929_v29  ;;  %v1673_v43 = vadd.f32 %v1545_v59, %v1416_v37  ;;  %3180 = vtanh.f32 %v907_v45 }
 0x11a   : > { %v3173_v50 = vpop.eup %3172  ;;  %v2311_v6 = vmul.f32 0.5, %v3171_v31  ;;  %v779_v0 = vadd.f32 %v651_v63, %v522_v27  ;;  %v523_v24 = vmul.f32 %v3722_v5, %v4678_v8  ;;  %v1288_v54 = vadd.f32 0.5, %v1160_v51 }
 0x11b   : > { %2566 = vst [vmem:[%s3924_s30 + $0x168] sm:$0xff] %v2438_v46  ;;  %3182 = vtanh.f32 %v2058_v13  ;;  %v1930_v40 = vadd.f32 %v1802_v39, %v1673_v43  ;;  %v1161_v2 = vmul.f32 0.5, %v3173_v50  ;;  %v1418_v48 = vmul.f32 %v3729_v10, %v4608_v62  ;;  %v4736_v13 = vld [vmem:[%s3711_s19 + $0x1d8] sm:$0xff] }
 0x11c   : > { %v2439_v58 = vadd.f32 0.5, %v2311_v6  ;;  %v908_v14 = vadd.f32 %v3735_v15, %v779_v0  ;;  %v652_v4 = vmul.f32 %v4687_v53, %v3725_v7  ;;  %v1546_v26 = vmul.f32 %v3740_v17, %v1288_v54  ;;  %v4739_v43 = vld [vmem:[%s3711_s19 + $0x5d8] sm:$0xff] }
 0x11d   : > { %v2059_v38 = vadd.f32 %v3752_v25, %v1930_v40  ;;  %v1289_v3 = vadd.f32 0.5, %v1161_v2  ;;  %v1804_v23 = vmul.f32 %v4611_v42, %v3742_v18  ;;  %v524_v62 = vmul.f32 %v3722_v5, %v4695_v22  ;;  %v4721_v42 = vld [vmem:[%s3711_s19 + $0x5d0] sm:$0xff] }
 0x11e   : > { %2567 = vst [vmem:[%s3924_s30 + $0x170] sm:$0xff] %v2439_v58  ;;  %3184 = vtanh.f32 %v908_v14  ;;  %v780_v34 = vadd.f32 %v652_v4, %v523_v24  ;;  %v653_v57 = vmul.f32 %v4698_v16, %v3725_v7  ;;  %v1674_v1 = vadd.f32 %v1546_v26, %v1417_v47  ;;  %v4755_v14 = vld [vmem:[%s3711_s19 + $0x5e0] sm:$0xff] }
 0x11f   : > { %3186 = vtanh.f32 %v2059_v38  ;;  %v1547_v12 = vmul.f32 %v3740_v17, %v1289_v3  ;;  %v1419_v9 = vmul.f32 %v3729_v10, %v4624_v61  ;;  %v1805_v19 = vmul.f32 %v4631_v11, %v3742_v18 }
 0x120   : > { %v3175_v60 = vpop.eup %3174  ;;  %v909_v33 = vadd.f32 %v3735_v15, %v780_v34  ;;  %v781_v28 = vadd.f32 %v653_v57, %v524_v62  ;;  %v1931_v30 = vadd.f32 %v1803_v49, %v1674_v1  ;;  %v525_v55 = vmul.f32 %v3722_v5, %v4715_v20 }
 0x121   : > { %v3177_v21 = vpop.eup %3176  ;;  %v2312_v37 = vmul.f32 0.5, %v3175_v60  ;;  %v1675_v39 = vadd.f32 %v1547_v12, %v1418_v48  ;;  %v654_v11 = vmul.f32 %v4721_v42, %v3725_v7  ;;  %v1420_v63 = vmul.f32 %v3729_v10, %v4644_v36  ;;  %v4752_v48 = vld [vmem:[%s3711_s19 + $0x1e0] sm:$0xff] }
 0x122   : > { %v1162_v41 = vmul.f32 0.5, %v3177_v21  ;;  %v3179_v52 = vpop.eup %3178  ;;  %3188 = vtanh.f32 %v909_v33  ;;  %v910_v29 = vadd.f32 %v3735_v15, %v781_v28  ;;  %v2060_v27 = vadd.f32 %v3752_v25, %v1931_v30  ;;  %v4768_v21 = vld [vmem:[%s3711_s19 + $0x1e8] sm:$0xff] }
 0x123   : > { %v2440_v61 = vadd.f32 0.5, %v2312_v37  ;;  %v3181_v59 = vpop.eup %3180  ;;  %v2313_v45 = vmul.f32 0.5, %v3179_v52  ;;  %v1932_v56 = vadd.f32 %v1804_v23, %v1675_v39  ;;  %v782_v31 = vadd.f32 %v654_v11, %v525_v55  ;;  %v4775_v33 = vld [vmem:[%s3711_s19 + $0x5e8] sm:$0xff] }
 0x124   : > { %v1290_v46 = vadd.f32 0.5, %v1162_v41  ;;  %v1163_v47 = vmul.f32 0.5, %v3181_v59  ;;  %3190 = vtanh.f32 %v910_v29  ;;  %v1806_v36 = vmul.f32 %v4647_v44, %v3742_v18 }
 0x125   : > { %2568 = vst [vmem:[%s3924_s30 + $0x178] sm:$0xff] %v2440_v61  ;;  %v3183_v51 = vpop.eup %3182  ;;  %v2441_v50 = vadd.f32 0.5, %v2313_v45  ;;  %3192 = vtanh.f32 %v2060_v27  ;;  %v2061_v6 = vadd.f32 %v3752_v25, %v1932_v56  ;;  %v911_v40 = vadd.f32 %v3735_v15, %v782_v31 }
 0x126   : > { %v1548_v49 = vmul.f32 %v3740_v17, %v1290_v46  ;;  %v2314_v0 = vmul.f32 0.5, %v3183_v51  ;;  %v1291_v24 = vadd.f32 0.5, %v1163_v47  ;;  %v526_v2 = vmul.f32 %v3722_v5, %v4736_v13 }
 0x127   : > { %2569 = vst [vmem:[%s3924_s30 + $0x180] sm:$0xff] %v2441_v50  ;;  %3194 = vtanh.f32 %v2061_v6  ;;  %v655_v58 = vmul.f32 %v4739_v43, %v3725_v7  ;;  %v1421_v26 = vmul.f32 %v3729_v10, %v4665_v35  ;;  %v1807_v62 = vmul.f32 %v4670_v32, %v3742_v18 }
 0x128   : > { %v1676_v54 = vadd.f32 %v1548_v49, %v1419_v9  ;;  %v3185_v4 = vpop.eup %3184  ;;  %v2442_v38 = vadd.f32 0.5, %v2314_v0  ;;  %v1549_v44 = vmul.f32 %v3740_v17, %v1291_v24  ;;  %3196 = vtanh.f32 %v911_v40 }
 0x129   : > { %v3187_v3 = vpop.eup %3186  ;;  %v1164_v34 = vmul.f32 0.5, %v3185_v4  ;;  %v783_v57 = vadd.f32 %v655_v58, %v526_v2  ;;  %v527_v12 = vmul.f32 %v3722_v5, %v4752_v48  ;;  %v656_v9 = vmul.f32 %v4755_v14, %v3725_v7 }
 0x12a   : > { %v1933_v23 = vadd.f32 %v1805_v19, %v1676_v54  ;;  %2570 = vst [vmem:[%s3924_s30 + $0x188] sm:$0xff] %v2442_v38  ;;  %v2315_v60 = vmul.f32 0.5, %v3187_v3  ;;  %v1677_v1 = vadd.f32 %v1549_v44, %v1420_v63  ;;  %v1422_v19 = vmul.f32 %v3729_v10, %v4678_v8  ;;  %v4790_v63 = vld [vmem:[%s3711_s19 + $0x1f0] sm:$0xff]  ;;  %v4807_v3 = vld [vmem:[%s3711_s19 + $0x5f8] sm:$0xff] }
 0x12b   : > { %v1292_v37 = vadd.f32 0.5, %v1164_v34  ;;  %v912_v32 = vadd.f32 %v3735_v15, %v783_v57  ;;  %v1808_v41 = vmul.f32 %v4687_v53, %v3742_v18  ;;  %v784_v55 = vadd.f32 %v656_v9, %v527_v12 }
 0x12c   : > { %v2062_v35 = vadd.f32 %v3752_v25, %v1933_v23  ;;  %v3189_v28 = vpop.eup %3188  ;;  %v2443_v30 = vadd.f32 0.5, %v2315_v60  ;;  %v1934_v39 = vadd.f32 %v1806_v36, %v1677_v1  ;;  %v528_v29 = vmul.f32 %v3722_v5, %v4768_v21  ;;  %v4796_v36 = vld [vmem:[%s3711_s19 + $0x5f0] sm:$0xff] }
 0x12d   : > { %v1550_v52 = vmul.f32 %v3740_v17, %v1292_v37  ;;  %v1165_v61 = vmul.f32 0.5, %v3189_v28  ;;  %v913_v59 = vadd.f32 %v3735_v15, %v784_v55  ;;  %v657_v45 = vmul.f32 %v4775_v33, %v3725_v7 }
 0x12e   : > { %3198 = vtanh.f32 %v2062_v35  ;;  %v3191_v8 = vpop.eup %3190  ;;  %2571 = vst [vmem:[%s3924_s30 + $0x190] sm:$0xff] %v2443_v30  ;;  %v2063_v11 = vadd.f32 %v3752_v25, %v1934_v39  ;;  %v1423_v47 = vmul.f32 %v3729_v10, %v4695_v22  ;;  %v1809_v51 = vmul.f32 %v4698_v16, %v3742_v18  ;;  %v4826_v39 = vld [vmem:[%s3711_s19 + $0x200] sm:$0xff] }
 0x12f   : > { %3200 = vtanh.f32 %v912_v32  ;;  %v3193_v53 = vpop.eup %3192  ;;  %v1678_v27 = vadd.f32 %v1550_v52, %v1421_v26  ;;  %v1293_v56 = vadd.f32 0.5, %v1165_v61  ;;  %v1166_v46 = vmul.f32 0.5, %v3191_v8  ;;  %v4804_v26 = vld [vmem:[%s3711_s19 + $0x1f8] sm:$0xff] }
 0x130   : > { %v2316_v31 = vmul.f32 0.5, %v3193_v53  ;;  %3202 = vtanh.f32 %v2063_v11  ;;  %v785_v50 = vadd.f32 %v657_v45, %v528_v29  ;;  %v529_v16 = vmul.f32 %v3722_v5, %v4790_v63 }
 0x131   : > { %v3195_v6 = vpop.eup %3194  ;;  %v1935_v49 = vadd.f32 %v1807_v62, %v1678_v27  ;;  %v1551_v0 = vmul.f32 %v3740_v17, %v1293_v56  ;;  %v1294_v24 = vadd.f32 0.5, %v1166_v46  ;;  %3204 = vtanh.f32 %v913_v59  ;;  %v4833_v59 = vld [vmem:[%s3711_s19 + $0x600] sm:$0xff] }
 0x132   : > { %v3197_v22 = vpop.eup %3196  ;;  %v2444_v40 = vadd.f32 0.5, %v2316_v31  ;;  %v2317_v54 = vmul.f32 0.5, %v3195_v6  ;;  %v914_v2 = vadd.f32 %v3735_v15, %v785_v50  ;;  %v1424_v34 = vmul.f32 %v3729_v10, %v4715_v20  ;;  %v4839_v31 = vld [vmem:[%s3711_s19 + $0x208] sm:$0xff] }
 0x133   : > { %v2064_v58 = vadd.f32 %v3752_v25, %v1935_v49  ;;  %v1679_v4 = vadd.f32 %v1551_v0, %v1422_v19  ;;  %v1552_v38 = vmul.f32 %v3740_v17, %v1294_v24  ;;  %v1167_v44 = vmul.f32 0.5, %v3197_v22 }
 0x134   : > { %2572 = vst [vmem:[%s3924_s30 + $0x198] sm:$0xff] %v2444_v40  ;;  %v2445_v23 = vadd.f32 0.5, %v2317_v54  ;;  %3206 = vtanh.f32 %v914_v2  ;;  %v658_v62 = vmul.f32 %v4796_v36, %v3725_v7  ;;  %v1810_v12 = vmul.f32 %v4721_v42, %v3742_v18 }
 0x135   : > { %3208 = vtanh.f32 %v2064_v58  ;;  %v1936_v57 = vadd.f32 %v1808_v41, %v1679_v4  ;;  %v1680_v60 = vadd.f32 %v1552_v38, %v1423_v47  ;;  %v1295_v1 = vadd.f32 0.5, %v1167_v44  ;;  %v4858_v4 = vld [vmem:[%s3711_s19 + $0x210] sm:$0xff] }
 0x136   : > { %2573 = vst [vmem:[%s3924_s30 + $0x1a0] sm:$0xff] %v2445_v23  ;;  %v786_v9 = vadd.f32 %v658_v62, %v529_v16  ;;  %v530_v35 = vmul.f32 %v3722_v5, %v4804_v26  ;;  %v659_v20 = vmul.f32 %v4807_v3, %v3725_v7  ;;  %v1425_v30 = vmul.f32 %v3729_v10, %v4736_v13 }
 0x137   : > { %v2065_v19 = vadd.f32 %v3752_v25, %v1936_v57  ;;  %v1937_v32 = vadd.f32 %v1809_v51, %v1680_v60  ;;  %v1553_v28 = vmul.f32 %v3740_v17, %v1295_v1  ;;  %v1811_v55 = vmul.f32 %v4739_v43, %v3742_v18  ;;  %v4842_v51 = vld [vmem:[%s3711_s19 + $0x608] sm:$0xff]  ;;  %v4866_v1 = vld [vmem:[%s3711_s19 + $0x610] sm:$0xff] }
 0x138   : > { %v3199_v37 = vpop.eup %3198  ;;  %v915_v52 = vadd.f32 %v3735_v15, %v786_v9  ;;  %v787_v61 = vadd.f32 %v659_v20, %v530_v35  ;;  %v531_v43 = vmul.f32 %v3722_v5, %v4826_v39  ;;  %v1426_v6 = vmul.f32 %v3729_v10, %v4752_v48 }
 0x139   : > { %v3201_v42 = vpop.eup %3200  ;;  %v2318_v41 = vmul.f32 0.5, %v3199_v37  ;;  %3210 = vtanh.f32 %v2065_v19  ;;  %v2066_v29 = vadd.f32 %v3752_v25, %v1937_v32  ;;  %v1681_v8 = vadd.f32 %v1553_v28, %v1424_v34 }
 0x13a   : > { %v1168_v11 = vmul.f32 0.5, %v3201_v42  ;;  %v3203_v13 = vpop.eup %3202  ;;  %3212 = vtanh.f32 %v915_v52  ;;  %v916_v53 = vadd.f32 %v3735_v15, %v787_v61  ;;  %v660_v49 = vmul.f32 %v4833_v59, %v3725_v7 }
 0x13b   : > { %v2446_v45 = vadd.f32 0.5, %v2318_v41  ;;  %v3205_v27 = vpop.eup %3204  ;;  %v2319_v56 = vmul.f32 0.5, %v3203_v13  ;;  %3214 = vtanh.f32 %v2066_v29  ;;  %v1938_v46 = vadd.f32 %v1810_v12, %v1681_v8  ;;  %v4880_v41 = vld [vmem:[%s3711_s19 + $0x218] sm:$0xff] }
 0x13c   : > { %v1296_v47 = vadd.f32 0.5, %v1168_v11  ;;  %v1169_v50 = vmul.f32 0.5, %v3205_v27  ;;  %3216 = vtanh.f32 %v916_v53  ;;  %v1812_v40 = vmul.f32 %v4755_v14, %v3742_v18 }
 0x13d   : > { %2574 = vst [vmem:[%s3924_s30 + $0x1a8] sm:$0xff] %v2446_v45  ;;  %v2447_v0 = vadd.f32 0.5, %v2319_v56  ;;  %v2067_v24 = vadd.f32 %v3752_v25, %v1938_v46  ;;  %v788_v16 = vadd.f32 %v660_v49, %v531_v43  ;;  %v532_v58 = vmul.f32 %v3722_v5, %v4839_v31  ;;  %v4886_v45 = vld [vmem:[%s3711_s19 + $0x618] sm:$0xff]  ;;  %v4893_v49 = vld [vmem:[%s3711_s19 + $0x220] sm:$0xff] }
 0x13e   : > { %v1554_v22 = vmul.f32 %v3740_v17, %v1296_v47  ;;  %v3207_v54 = vpop.eup %3206  ;;  %v1297_v2 = vadd.f32 0.5, %v1169_v50  ;;  %v661_v48 = vmul.f32 %v4842_v51, %v3725_v7  ;;  %v1427_v14 = vmul.f32 %v3729_v10, %v4768_v21 }
 0x13f   : > { %v3209_v38 = vpop.eup %3208  ;;  %2575 = vst [vmem:[%s3924_s30 + $0x1b0] sm:$0xff] %v2447_v0  ;;  %3218 = vtanh.f32 %v2067_v24  ;;  %v1170_v23 = vmul.f32 0.5, %v3207_v54  ;;  %v917_v57 = vadd.f32 %v3735_v15, %v788_v16  ;;  %v1813_v35 = vmul.f32 %v4775_v33, %v3742_v18 }
 0x140   : > { %v1682_v44 = vadd.f32 %v1554_v22, %v1425_v30  ;;  %v2320_v34 = vmul.f32 0.5, %v3209_v38  ;;  %v1555_v62 = vmul.f32 %v3740_v17, %v1297_v2  ;;  %v789_v60 = vadd.f32 %v661_v48, %v532_v58 }
 0x141   : > { %v1298_v9 = vadd.f32 0.5, %v1170_v23  ;;  %v533_v20 = vmul.f32 %v3722_v5, %v4858_v4  ;;  %3220 = vtanh.f32 %v917_v57  ;;  %v1428_v42 = vmul.f32 %v3729_v10, %v4790_v63  ;;  %v4917_v57 = vld [vmem:[%s3711_s19 + $0x628] sm:$0xff] }
 0x142   : > { %v1939_v12 = vadd.f32 %v1811_v55, %v1682_v44  ;;  %v2448_v37 = vadd.f32 0.5, %v2320_v34  ;;  %v1683_v21 = vadd.f32 %v1555_v62, %v1426_v6  ;;  %v918_v19 = vadd.f32 %v3735_v15, %v789_v60  ;;  %v4914_v62 = vld [vmem:[%s3711_s19 + $0x228] sm:$0xff] }
 0x143   : > { %v3211_v32 = vpop.eup %3210  ;;  %v1556_v30 = vmul.f32 %v3740_v17, %v1298_v9  ;;  %v662_v33 = vmul.f32 %v4866_v1, %v3725_v7  ;;  %v1814_v29 = vmul.f32 %v4796_v36, %v3742_v18  ;;  %v534_v46 = vmul.f32 %v3722_v5, %v4880_v41 }
 0x144   : > { %v2068_v28 = vadd.f32 %v3752_v25, %v1939_v12  ;;  %v3213_v55 = vpop.eup %3212  ;;  %2576 = vst [vmem:[%s3924_s30 + $0x1b8] sm:$0xff] %v2448_v37  ;;  %v2321_v52 = vmul.f32 0.5, %v3211_v32  ;;  %v1940_v61 = vadd.f32 %v1812_v40, %v1683_v21  ;;  %3222 = vtanh.f32 %v918_v19  ;;  %v4901_v40 = vld [vmem:[%s3711_s19 + $0x620] sm:$0xff] }
 0x145   : > { %v3215_v8 = vpop.eup %3214  ;;  %v1684_v11 = vadd.f32 %v1556_v30, %v1427_v14  ;;  %v1171_v13 = vmul.f32 0.5, %v3213_v55  ;;  %v790_v63 = vadd.f32 %v662_v33, %v533_v20  ;;  %v1429_v24 = vmul.f32 %v3729_v10, %v4804_v26 }
 0x146   : > { %3224 = vtanh.f32 %v2068_v28  ;;  %v3217_v53 = vpop.eup %3216  ;;  %v2449_v43 = vadd.f32 0.5, %v2321_v52  ;;  %v2322_v27 = vmul.f32 0.5, %v3215_v8  ;;  %v2069_v56 = vadd.f32 %v3752_v25, %v1940_v61  ;;  %v4933_v61 = vld [vmem:[%s3711_s19 + $0x230] sm:$0xff] }
 0x147   : > { %v1941_v36 = vadd.f32 %v1813_v35, %v1684_v11  ;;  %v1299_v47 = vadd.f32 0.5, %v1171_v13  ;;  %v1172_v50 = vmul.f32 0.5, %v3217_v53  ;;  %v919_v6 = vadd.f32 %v3735_v15, %v790_v63 }
 0x148   : > { %2577 = vst [vmem:[%s3924_s30 + $0x1c0] sm:$0xff] %v2449_v43  ;;  %v2450_v0 = vadd.f32 0.5, %v2322_v27  ;;  %3226 = vtanh.f32 %v2069_v56  ;;  %v663_v22 = vmul.f32 %v4886_v45, %v3725_v7  ;;  %v1815_v38 = vmul.f32 %v4807_v3, %v3742_v18  ;;  %v4941_v43 = vld [vmem:[%s3711_s19 + $0x630] sm:$0xff] }
 0x149   : > { %v3219_v54 = vpop.eup %3218  ;;  %v2070_v2 = vadd.f32 %v3752_v25, %v1941_v36  ;;  %v1557_v16 = vmul.f32 %v3740_v17, %v1299_v47  ;;  %v1300_v58 = vadd.f32 0.5, %v1172_v50  ;;  %3228 = vtanh.f32 %v919_v6 }
 0x14a   : > { %2578 = vst [vmem:[%s3924_s30 + $0x1c8] sm:$0xff] %v2450_v0  ;;  %v2323_v48 = vmul.f32 0.5, %v3219_v54  ;;  %v791_v26 = vadd.f32 %v663_v22, %v534_v46  ;;  %v535_v44 = vmul.f32 %v3722_v5, %v4893_v49  ;;  %v664_v34 = vmul.f32 %v4901_v40, %v3725_v7  ;;  %v4948_v0 = vld [vmem:[%s3711_s19 + $0x238] sm:$0xff] }
 0x14b   : > { %3230 = vtanh.f32 %v2070_v2  ;;  %v1685_v23 = vadd.f32 %v1557_v16, %v1428_v42  ;;  %v1558_v14 = vmul.f32 %v3740_v17, %v1300_v58  ;;  %v3221_v60 = vpop.eup %3220  ;;  %v1430_v3 = vmul.f32 %v3729_v10, %v4826_v39  ;;  %v4956_v2 = vld [vmem:[%s3711_s19 + $0x638] sm:$0xff] }
 0x14c   : > { %v2451_v12 = vadd.f32 0.5, %v2323_v48  ;;  %v1816_v9 = vmul.f32 %v4833_v59, %v3742_v18  ;;  %v920_v35 = vadd.f32 %v3735_v15, %v791_v26  ;;  %v1173_v21 = vmul.f32 0.5, %v3221_v60 }
 0x14d   : > { %v1942_v20 = vadd.f32 %v1814_v29, %v1685_v23  ;;  %v1686_v37 = vadd.f32 %v1558_v14, %v1429_v24  ;;  %v792_v19 = vadd.f32 %v664_v34, %v535_v44  ;;  %v1431_v28 = vmul.f32 %v3729_v10, %v4839_v31 }
 0x14e   : > { %v3223_v32 = vpop.eup %3222  ;;  %2579 = vst [vmem:[%s3924_s30 + $0x1d0] sm:$0xff] %v2451_v12  ;;  %3232 = vtanh.f32 %v920_v35  ;;  %v536_v30 = vmul.f32 %v3722_v5, %v4914_v62  ;;  %v665_v39 = vmul.f32 %v4917_v57, %v3725_v7  ;;  %v1301_v55 = vadd.f32 0.5, %v1173_v21 }
 0x14f   : > { %v2071_v42 = vadd.f32 %v3752_v25, %v1942_v20  ;;  %v1943_v33 = vadd.f32 %v1815_v38, %v1686_v37  ;;  %v1174_v52 = vmul.f32 0.5, %v3223_v32  ;;  %v1817_v31 = vmul.f32 %v4842_v51, %v3742_v18 }
 0x150   : > { %v3225_v59 = vpop.eup %3224  ;;  %v921_v8 = vadd.f32 %v3735_v15, %v792_v19  ;;  %v793_v11 = vadd.f32 %v665_v39, %v536_v30  ;;  %v1559_v63 = vmul.f32 %v3740_v17, %v1301_v55  ;;  %v537_v51 = vmul.f32 %v3722_v5, %v4933_v61 }
 0x151   : > { %v2324_v29 = vmul.f32 0.5, %v3225_v59  ;;  %3234 = vtanh.f32 %v2071_v42  ;;  %v2072_v13 = vadd.f32 %v3752_v25, %v1943_v33  ;;  %v1302_v53 = vadd.f32 0.5, %v1174_v52  ;;  %v4985_v42 = vld [vmem:[%s3711_s19 + $0x248] sm:$0xff] }
 0x152   : > { %v3227_v27 = vpop.eup %3226  ;;  %3236 = vtanh.f32 %v921_v8  ;;  %v922_v46 = vadd.f32 %v3735_v15, %v793_v11  ;;  %v1687_v50 = vadd.f32 %v1559_v63, %v1430_v3  ;;  %v1432_v22 = vmul.f32 %v3729_v10, %v4858_v4  ;;  %v4993_v63 = vld [vmem:[%s3711_s19 + $0x648] sm:$0xff] }
 0x153   : > { %v2452_v56 = vadd.f32 0.5, %v2324_v29  ;;  %v3229_v36 = vpop.eup %3228  ;;  %v2325_v47 = vmul.f32 0.5, %v3227_v27  ;;  %3238 = vtanh.f32 %v2072_v13  ;;  %v1560_v6 = vmul.f32 %v3740_v17, %v1302_v53 }
 0x154   : > { %v1175_v24 = vmul.f32 0.5, %v3229_v36  ;;  %3240 = vtanh.f32 %v922_v46  ;;  %v666_v54 = vmul.f32 %v4941_v43, %v3725_v7  ;;  %v1944_v48 = vadd.f32 %v1816_v9, %v1687_v50  ;;  %v4969_v9 = vld [vmem:[%s3711_s19 + $0x240] sm:$0xff] }
 0x155   : > { %2580 = vst [vmem:[%s3924_s30 + $0x1d8] sm:$0xff] %v2452_v56  ;;  %v3231_v16 = vpop.eup %3230  ;;  %v2453_v58 = vadd.f32 0.5, %v2325_v47  ;;  %v1688_v38 = vadd.f32 %v1560_v6, %v1431_v28  ;;  %v1818_v26 = vmul.f32 %v4866_v1, %v3742_v18  ;;  %v538_v4 = vmul.f32 %v3722_v5, %v4948_v0  ;;  %v4972_v1 = vld [vmem:[%s3711_s19 + $0x640] sm:$0xff] }
 0x156   : > { %v2326_v44 = vmul.f32 0.5, %v3231_v16  ;;  %v1303_v23 = vadd.f32 0.5, %v1175_v24  ;;  %v794_v14 = vadd.f32 %v666_v54, %v537_v51  ;;  %v2073_v34 = vadd.f32 %v3752_v25, %v1944_v48  ;;  %v5003_v54 = vld [vmem:[%s3711_s19 + $0x250] sm:$0xff] }
 0x157   : > { %2581 = vst [vmem:[%s3924_s30 + $0x1e0] sm:$0xff] %v2453_v58  ;;  %v1945_v60 = vadd.f32 %v1817_v31, %v1688_v38  ;;  %v1433_v12 = vmul.f32 %v3729_v10, %v4880_v41  ;;  %v667_v3 = vmul.f32 %v4956_v2, %v3725_v7  ;;  %v1819_v21 = vmul.f32 %v4886_v45, %v3742_v18  ;;  %v5006_v16 = vld [vmem:[%s3711_s19 + $0x650] sm:$0xff] }
 0x158   : > { %v3233_v35 = vpop.eup %3232  ;;  %v2454_v20 = vadd.f32 0.5, %v2326_v44  ;;  %v1561_v37 = vmul.f32 %v3740_v17, %v1303_v23  ;;  %v923_v19 = vadd.f32 %v3735_v15, %v794_v14  ;;  %3242 = vtanh.f32 %v2073_v34  ;;  %v5015_v14 = vld [vmem:[%s3711_s19 + $0x258] sm:$0xff] }
 0x159   : > { %v2074_v41 = vadd.f32 %v3752_v25, %v1945_v60  ;;  %v1176_v32 = vmul.f32 0.5, %v3233_v35  ;;  %v795_v28 = vadd.f32 %v667_v3, %v538_v4  ;;  %v539_v39 = vmul.f32 %v3722_v5, %v4969_v9 }
 0x15a   : > { %2582 = vst [vmem:[%s3924_s30 + $0x1e8] sm:$0xff] %v2454_v20  ;;  %v1689_v30 = vadd.f32 %v1561_v37, %v1432_v22  ;;  %3244 = vtanh.f32 %v923_v19  ;;  %v668_v59 = vmul.f32 %v4972_v1, %v3725_v7  ;;  %v1434_v55 = vmul.f32 %v3729_v10, %v4893_v49 }
 0x15b   : > { %v3235_v45 = vpop.eup %3234  ;;  %3246 = vtanh.f32 %v2074_v41  ;;  %v1304_v33 = vadd.f32 0.5, %v1176_v32  ;;  %v924_v52 = vadd.f32 %v3735_v15, %v795_v28  ;;  %v1820_v11 = vmul.f32 %v4901_v40, %v3742_v18  ;;  %v5030_v41 = vld [vmem:[%s3711_s19 + $0x658] sm:$0xff] }
 0x15c   : > { %v3237_v29 = vpop.eup %3236  ;;  %v2327_v31 = vmul.f32 0.5, %v3235_v45  ;;  %v1946_v8 = vadd.f32 %v1818_v26, %v1689_v30  ;;  %v796_v13 = vadd.f32 %v668_v59, %v539_v39  ;;  %v540_v49 = vmul.f32 %v3722_v5, %v4985_v42 }
 0x15d   : > { %v3239_v53 = vpop.eup %3238  ;;  %v1562_v27 = vmul.f32 %v3740_v17, %v1304_v33  ;;  %v1177_v56 = vmul.f32 0.5, %v3237_v29  ;;  %3248 = vtanh.f32 %v924_v52  ;;  %v669_v22 = vmul.f32 %v4993_v63, %v3725_v7 }
 0x15e   : > { %v3241_v46 = vpop.eup %3240  ;;  %v2455_v51 = vadd.f32 0.5, %v2327_v31  ;;  %v2328_v36 = vmul.f32 0.5, %v3239_v53  ;;  %v2075_v47 = vadd.f32 %v3752_v25, %v1946_v8  ;;  %v925_v40 = vadd.f32 %v3735_v15, %v796_v13  ;;  %v5039_v13 = vld [vmem:[%s3711_s19 + $0x260] sm:$0xff] }
 0x15f   : > { %v1690_v50 = vadd.f32 %v1562_v27, %v1433_v12  ;;  %v1305_v6 = vadd.f32 0.5, %v1177_v56  ;;  %v1178_v24 = vmul.f32 0.5, %v3241_v46  ;;  %v1435_v48 = vmul.f32 %v3729_v10, %v4914_v62  ;;  %v5042_v53 = vld [vmem:[%s3711_s19 + $0x660] sm:$0xff] }
 0x160   : > { %2583 = vst [vmem:[%s3924_s30 + $0x1f0] sm:$0xff] %v2455_v51  ;;  %v2456_v58 = vadd.f32 0.5, %v2328_v36  ;;  %3250 = vtanh.f32 %v2075_v47  ;;  %v1821_v38 = vmul.f32 %v4917_v57, %v3742_v18  ;;  %v1436_v4 = vmul.f32 %v3729_v10, %v4933_v61 }
 0x161   : > { %v1947_v26 = vadd.f32 %v1819_v21, %v1690_v50  ;;  %v1563_v44 = vmul.f32 %v3740_v17, %v1305_v6  ;;  %v1306_v23 = vadd.f32 0.5, %v1178_v24  ;;  %3252 = vtanh.f32 %v925_v40 }
 0x162   : > { %2584 = vst [vmem:[%s3924_s30 + $0x1f8] sm:$0xff] %v2456_v58  ;;  %v797_v34 = vadd.f32 %v669_v22, %v540_v49  ;;  %v541_v60 = vmul.f32 %v3722_v5, %v5003_v54  ;;  %v670_v62 = vmul.f32 %v5006_v16, %v3725_v7  ;;  %v3243_v57 = vpop.eup %3242  ;;  %v1822_v20 = vmul.f32 %v4941_v43, %v3742_v18 }
 0x163   : > { %v2076_v12 = vadd.f32 %v3752_v25, %v1947_v26  ;;  %v1691_v3 = vadd.f32 %v1563_v44, %v1434_v55  ;;  %v1564_v35 = vmul.f32 %v3740_v17, %v1306_v23  ;;  %v2329_v21 = vmul.f32 0.5, %v3243_v57  ;;  %v5064_v23 = vld [vmem:[%s3711_s19 + $0x668] sm:$0xff] }
 0x164   : > { %v3245_v37 = vpop.eup %3244  ;;  %v926_v61 = vadd.f32 %v3735_v15, %v797_v34  ;;  %v798_v19 = vadd.f32 %v670_v62, %v541_v60  ;;  %v542_v32 = vmul.f32 %v3722_v5, %v5015_v14  ;;  %v671_v8 = vmul.f32 %v5030_v41, %v3725_v7 }
 0x165   : > { %v3247_v28 = vpop.eup %3246  ;;  %3254 = vtanh.f32 %v2076_v12  ;;  %v1948_v30 = vadd.f32 %v1820_v11, %v1691_v3  ;;  %v1692_v39 = vadd.f32 %v1564_v35, %v1435_v48  ;;  %v1179_v59 = vmul.f32 0.5, %v3245_v37  ;;  %v5058_v48 = vld [vmem:[%s3711_s19 + $0x268] sm:$0xff]  ;;  %v5072_v35 = vld [vmem:[%s3711_s19 + $0x270] sm:$0xff] }
 0x166   : > { %v2457_v45 = vadd.f32 0.5, %v2329_v21  ;;  %v2330_v43 = vmul.f32 0.5, %v3247_v28  ;;  %3256 = vtanh.f32 %v926_v61  ;;  %v927_v33 = vadd.f32 %v3735_v15, %v798_v19  ;;  %v5083_v61 = vld [vmem:[%s3711_s19 + $0x670] sm:$0xff] }
 0x167   : > { %v3249_v55 = vpop.eup %3248  ;;  %v2077_v52 = vadd.f32 %v3752_v25, %v1948_v30  ;;  %v1949_v29 = vadd.f32 %v1821_v38, %v1692_v39  ;;  %v1307_v31 = vadd.f32 0.5, %v1179_v59  ;;  %v1437_v56 = vmul.f32 %v3729_v10, %v4948_v0 }
 0x168   : > { %2585 = vst [vmem:[%s3924_s30 + $0x200] sm:$0xff] %v2457_v45  ;;  %v2458_v11 = vadd.f32 0.5, %v2330_v43  ;;  %v1180_v27 = vmul.f32 0.5, %v3249_v55  ;;  %3258 = vtanh.f32 %v927_v33  ;;  %v799_v51 = vadd.f32 %v671_v8, %v542_v32 }
 0x169   : > { %3260 = vtanh.f32 %v2077_v52  ;;  %v2078_v49 = vadd.f32 %v3752_v25, %v1949_v29  ;;  %v1565_v46 = vmul.f32 %v3740_v17, %v1307_v31  ;;  %v1823_v40 = vmul.f32 %v4956_v2, %v3742_v18 }
 0x16a   : > { %v3251_v36 = vpop.eup %3250  ;;  %2586 = vst [vmem:[%s3924_s30 + $0x208] sm:$0xff] %v2458_v11  ;;  %v1308_v47 = vadd.f32 0.5, %v1180_v27  ;;  %v543_v50 = vmul.f32 %v3722_v5, %v5039_v13  ;;  %v672_v0 = vmul.f32 %v5042_v53, %v3725_v7  ;;  %v928_v58 = vadd.f32 %v3735_v15, %v799_v51  ;;  %v5099_v51 = vld [vmem:[%s3711_s19 + $0x678] sm:$0xff] }
 0x16b   : > { %v3253_v6 = vpop.eup %3252  ;;  %v2331_v24 = vmul.f32 0.5, %v3251_v36  ;;  %3262 = vtanh.f32 %v2078_v49  ;;  %v1693_v22 = vadd.f32 %v1565_v46, %v1436_v4  ;;  %v1438_v2 = vmul.f32 %v3729_v10, %v4969_v9  ;;  %v5096_v46 = vld [vmem:[%s3711_s19 + $0x278] sm:$0xff] }
 0x16c   : > { %v1566_v38 = vmul.f32 %v3740_v17, %v1308_v47  ;;  %v1181_v26 = vmul.f32 0.5, %v3253_v6  ;;  %v800_v44 = vadd.f32 %v672_v0, %v543_v50  ;;  %v1824_v4 = vmul.f32 %v4972_v1, %v3742_v18 }
 0x16d   : > { %v2459_v34 = vadd.f32 0.5, %v2331_v24  ;;  %v1950_v60 = vadd.f32 %v1822_v20, %v1693_v22  ;;  %3264 = vtanh.f32 %v928_v58  ;;  %v544_v3 = vmul.f32 %v3722_v5, %v5058_v48 }
 0x16e   : > { %v1694_v62 = vadd.f32 %v1566_v38, %v1437_v56  ;;  %v1309_v57 = vadd.f32 0.5, %v1181_v26  ;;  %v929_v12 = vadd.f32 %v3735_v15, %v800_v44  ;;  %v1439_v20 = vmul.f32 %v3729_v10, %v4985_v42  ;;  %v5112_v44 = vld [vmem:[%s3711_s19 + $0x280] sm:$0xff] }
 0x16f   : > { %v3255_v9 = vpop.eup %3254  ;;  %2587 = vst [vmem:[%s3924_s30 + $0x210] sm:$0xff] %v2459_v34  ;;  %v2079_v37 = vadd.f32 %v3752_v25, %v1950_v60  ;;  %v1825_v1 = vmul.f32 %v4993_v63, %v3742_v18  ;;  %v673_v21 = vmul.f32 %v5064_v23, %v3725_v7  ;;  %v545_v42 = vmul.f32 %v3722_v5, %v5072_v35 }
 0x170   : > { %v3257_v19 = vpop.eup %3256  ;;  %v2332_v32 = vmul.f32 0.5, %v3255_v9  ;;  %v1951_v28 = vadd.f32 %v1823_v40, %v1694_v62  ;;  %v1567_v30 = vmul.f32 %v3740_v17, %v1309_v57  ;;  %3266 = vtanh.f32 %v929_v12 }
 0x171   : > { %3268 = vtanh.f32 %v2079_v37  ;;  %v1182_v39 = vmul.f32 0.5, %v3257_v19  ;;  %v801_v59 = vadd.f32 %v673_v21, %v544_v3  ;;  %v674_v55 = vmul.f32 %v5083_v61, %v3725_v7 }
 0x172   : > { %v3259_v63 = vpop.eup %3258  ;;  %v2460_v45 = vadd.f32 0.5, %v2332_v32  ;;  %v2080_v43 = vadd.f32 %v3752_v25, %v1951_v28  ;;  %v1695_v33 = vadd.f32 %v1567_v30, %v1438_v2  ;;  %v1440_v8 = vmul.f32 %v3729_v10, %v5003_v54 }
 0x173   : > { %v3261_v52 = vpop.eup %3260  ;;  %v1310_v29 = vadd.f32 0.5, %v1182_v39  ;;  %v1183_v31 = vmul.f32 0.5, %v3259_v63  ;;  %v930_v11 = vadd.f32 %v3735_v15, %v801_v59  ;;  %v802_v49 = vadd.f32 %v674_v55, %v545_v42  ;;  %v5133_v42 = vld [vmem:[%s3711_s19 + $0x288] sm:$0xff] }
 0x174   : > { %2588 = vst [vmem:[%s3924_s30 + $0x218] sm:$0xff] %v2460_v45  ;;  %v2333_v27 = vmul.f32 0.5, %v3261_v52  ;;  %3270 = vtanh.f32 %v2080_v43  ;;  %v1952_v56 = vadd.f32 %v1824_v4, %v1695_v33  ;;  %v1826_v54 = vmul.f32 %v5006_v16, %v3742_v18  ;;  %v5115_v16 = vld [vmem:[%s3711_s19 + $0x680] sm:$0xff]  ;;  %v5139_v33 = vld [vmem:[%s3711_s19 + $0x688] sm:$0xff] }
 0x175   : > { %v3263_v36 = vpop.eup %3262  ;;  %v1568_v47 = vmul.f32 %v3740_v17, %v1310_v29  ;;  %v1311_v40 = vadd.f32 0.5, %v1183_v31  ;;  %3272 = vtanh.f32 %v930_v11  ;;  %v931_v24 = vadd.f32 %v3735_v15, %v802_v49 }
 0x176   : > { %v2461_v50 = vadd.f32 0.5, %v2333_v27  ;;  %v2334_v0 = vmul.f32 0.5, %v3263_v36  ;;  %v2081_v6 = vadd.f32 %v3752_v25, %v1952_v56  ;;  %v546_v26 = vmul.f32 %v3722_v5, %v5096_v46  ;;  %v5146_v56 = vld [vmem:[%s3711_s19 + $0x290] sm:$0xff] }
 0x177   : > { %v3265_v22 = vpop.eup %3264  ;;  %v1696_v58 = vadd.f32 %v1568_v47, %v1439_v20  ;;  %v1569_v38 = vmul.f32 %v3740_v17, %v1311_v40  ;;  %v675_v2 = vmul.f32 %v5099_v51, %v3725_v7  ;;  %v1441_v4 = vmul.f32 %v3729_v10, %v5015_v14  ;;  %v5152_v47 = vld [vmem:[%s3711_s19 + $0x690] sm:$0xff] }
 0x178   : > { %2589 = vst [vmem:[%s3924_s30 + $0x220] sm:$0xff] %v2461_v50  ;;  %v2462_v34 = vadd.f32 0.5, %v2334_v0  ;;  %3274 = vtanh.f32 %v2081_v6  ;;  %v1184_v60 = vmul.f32 0.5, %v3265_v22  ;;  %v1827_v37 = vmul.f32 %v5030_v41, %v3742_v18 }
 0x179   : > { %v1953_v62 = vadd.f32 %v1825_v1, %v1696_v58  ;;  %v1697_v57 = vadd.f32 %v1569_v38, %v1440_v8  ;;  %3276 = vtanh.f32 %v931_v24  ;;  %v803_v12 = vadd.f32 %v675_v2, %v546_v26 }
 0x17a   : > { %v3267_v3 = vpop.eup %3266  ;;  %2590 = vst [vmem:[%s3924_s30 + $0x228] sm:$0xff] %v2462_v34  ;;  %v1312_v9 = vadd.f32 0.5, %v1184_v60  ;;  %v547_v20 = vmul.f32 %v3722_v5, %v5112_v44  ;;  %v676_v21 = vmul.f32 %v5115_v16, %v3725_v7  ;;  %v1442_v41 = vmul.f32 %v3729_v10, %v5039_v13 }
 0x17b   : > { %v3269_v19 = vpop.eup %3268  ;;  %v2082_v14 = vadd.f32 %v3752_v25, %v1953_v62  ;;  %v1954_v1 = vadd.f32 %v1826_v54, %v1697_v57  ;;  %v1185_v32 = vmul.f32 0.5, %v3267_v3  ;;  %v932_v28 = vadd.f32 %v3735_v15, %v803_v12  ;;  %v5172_v12 = vld [vmem:[%s3711_s19 + $0x698] sm:$0xff] }
 0x17c   : > { %v2335_v30 = vmul.f32 0.5, %v3269_v19  ;;  %v1570_v39 = vmul.f32 %v3740_v17, %v1312_v9  ;;  %v804_v59 = vadd.f32 %v676_v21, %v547_v20  ;;  %v1828_v43 = vmul.f32 %v5042_v53, %v3742_v18 }
 0x17d   : > { %3278 = vtanh.f32 %v2082_v14  ;;  %v2083_v63 = vadd.f32 %v3752_v25, %v1954_v1  ;;  %v1313_v45 = vadd.f32 0.5, %v1185_v32  ;;  %v548_v27 = vmul.f32 %v3722_v5, %v5133_v42  ;;  %v5180_v14 = vld [vmem:[%s3711_s19 + $0x2a0] sm:$0xff] }
 0x17e   : > { %v3271_v55 = vpop.eup %3270  ;;  %v2463_v52 = vadd.f32 0.5, %v2335_v30  ;;  %v1698_v29 = vadd.f32 %v1570_v39, %v1441_v4  ;;  %3280 = vtanh.f32 %v932_v28  ;;  %v933_v13 = vadd.f32 %v3735_v15, %v804_v59 }
 0x17f   : > { %v3273_v31 = vpop.eup %3272  ;;  %v2336_v8 = vmul.f32 0.5, %v3271_v55  ;;  %3282 = vtanh.f32 %v2083_v63  ;;  %v1571_v11 = vmul.f32 %v3740_v17, %v1313_v45  ;;  %v677_v36 = vmul.f32 %v5139_v33, %v3725_v7  ;;  %v5192_v45 = vld [vmem:[%s3711_s19 + $0x6a0] sm:$0xff] }
 0x180   : > { %2591 = vst [vmem:[%s3924_s30 + $0x230] sm:$0xff] %v2463_v52  ;;  %v1955_v53 = vadd.f32 %v1827_v37, %v1698_v29  ;;  %v1186_v49 = vmul.f32 0.5, %v3273_v31  ;;  %3284 = vtanh.f32 %v933_v13  ;;  %v1443_v50 = vmul.f32 %v3729_v10, %v5058_v48 }
 0x181   : > { %v2464_v40 = vadd.f32 0.5, %v2336_v8  ;;  %v1699_v54 = vadd.f32 %v1571_v11, %v1442_v41  ;;  %v1829_v0 = vmul.f32 %v5064_v23, %v3742_v18  ;;  %v805_v58 = vadd.f32 %v677_v36, %v548_v27  ;;  %v5167_v23 = vld [vmem:[%s3711_s19 + $0x298] sm:$0xff]  ;;  %v5201_v36 = vld [vmem:[%s3711_s19 + $0x2a8] sm:$0xff] }
 0x182   : > { %v3275_v6 = vpop.eup %3274  ;;  %v2084_v24 = vadd.f32 %v3752_v25, %v1955_v53  ;;  %v1314_v22 = vadd.f32 0.5, %v1186_v49  ;;  %v549_v38 = vmul.f32 %v3722_v5, %v5146_v56  ;;  %v1444_v60 = vmul.f32 %v3729_v10, %v5072_v35 }
 0x183   : > { %v3277_v26 = vpop.eup %3276  ;;  %2592 = vst [vmem:[%s3924_s30 + $0x238] sm:$0xff] %v2464_v40  ;;  %v2337_v2 = vmul.f32 0.5, %v3275_v6  ;;  %v1956_v34 = vadd.f32 %v1828_v43, %v1699_v54  ;;  %v678_v48 = vmul.f32 %v5152_v47, %v3725_v7  ;;  %v934_v57 = vadd.f32 %v3735_v15, %v805_v58  ;;  %v5204_v40 = vld [vmem:[%s3711_s19 + $0x6a8] sm:$0xff] }
 0x184   : > { %3286 = vtanh.f32 %v2084_v24  ;;  %v1572_v4 = vmul.f32 %v3740_v17, %v1314_v22  ;;  %v1187_v62 = vmul.f32 0.5, %v3277_v26  ;;  %v1830_v35 = vmul.f32 %v5083_v61, %v3742_v18 }
 0x185   : > { %v2465_v3 = vadd.f32 0.5, %v2337_v2  ;;  %v2085_v9 = vadd.f32 %v3752_v25, %v1956_v34  ;;  %v806_v37 = vadd.f32 %v678_v48, %v549_v38  ;;  %3288 = vtanh.f32 %v934_v57 }
 0x186   : > { %v1700_v20 = vadd.f32 %v1572_v4, %v1443_v50  ;;  %v1315_v21 = vadd.f32 0.5, %v1187_v62  ;;  %v550_v19 = vmul.f32 %v3722_v5, %v5167_v23  ;;  %v1445_v32 = vmul.f32 %v3729_v10, %v5096_v46  ;;  %v5221_v62 = vld [vmem:[%s3711_s19 + $0x2b0] sm:$0xff] }
 0x187   : > { %v3279_v1 = vpop.eup %3278  ;;  %2593 = vst [vmem:[%s3924_s30 + $0x240] sm:$0xff] %v2465_v3  ;;  %3290 = vtanh.f32 %v2085_v9  ;;  %v935_v28 = vadd.f32 %v3735_v15, %v806_v37  ;;  %v679_v61 = vmul.f32 %v5172_v12, %v3725_v7  ;;  %v1831_v63 = vmul.f32 %v5099_v51, %v3742_v18 }
 0x188   : > { %v3281_v30 = vpop.eup %3280  ;;  %v2338_v39 = vmul.f32 0.5, %v3279_v1  ;;  %v1957_v41 = vadd.f32 %v1829_v0, %v1700_v20  ;;  %v1573_v59 = vmul.f32 %v3740_v17, %v1315_v21  ;;  %v551_v52 = vmul.f32 %v3722_v5, %v5180_v14 }
 0x189   : > { %v3283_v43 = vpop.eup %3282  ;;  %v1188_v46 = vmul.f32 0.5, %v3281_v30  ;;  %3292 = vtanh.f32 %v935_v28  ;;  %v807_v55 = vadd.f32 %v679_v61, %v550_v19  ;;  %v680_v49 = vmul.f32 %v5192_v45, %v3725_v7 }
 0x18a   : > { %v3285_v29 = vpop.eup %3284  ;;  %v2466_v13 = vadd.f32 0.5, %v2338_v39  ;;  %v2339_v31 = vmul.f32 0.5, %v3283_v43  ;;  %v2086_v8 = vadd.f32 %v3752_v25, %v1957_v41  ;;  %v1701_v11 = vadd.f32 %v1573_v59, %v1444_v60  ;;  %v5238_v59 = vld [vmem:[%s3711_s19 + $0x2b8] sm:$0xff] }
 0x18b   : > { %v1316_v27 = vadd.f32 0.5, %v1188_v46  ;;  %v1189_v51 = vmul.f32 0.5, %v3285_v29  ;;  %v936_v53 = vadd.f32 %v3735_v15, %v807_v55  ;;  %v1446_v0 = vmul.f32 %v3729_v10, %v5112_v44 }
 0x18c   : > { %2594 = vst [vmem:[%s3924_s30 + $0x248] sm:$0xff] %v2466_v13  ;;  %v2467_v54 = vadd.f32 0.5, %v2339_v31  ;;  %3294 = vtanh.f32 %v2086_v8  ;;  %v1958_v50 = vadd.f32 %v1830_v35, %v1701_v11  ;;  %v808_v22 = vadd.f32 %v680_v49, %v551_v52  ;;  %v5228_v35 = vld [vmem:[%s3711_s19 + $0x6b0] sm:$0xff] }
 0x18d   : > { %v1574_v6 = vmul.f32 %v3740_v17, %v1316_v27  ;;  %v1317_v24 = vadd.f32 0.5, %v1189_v51  ;;  %3296 = vtanh.f32 %v936_v53  ;;  %v1832_v26 = vmul.f32 %v5115_v16, %v3742_v18 }
 0x18e   : > { %v3287_v58 = vpop.eup %3286  ;;  %2595 = vst [vmem:[%s3924_s30 + $0x250] sm:$0xff] %v2467_v54  ;;  %v2087_v38 = vadd.f32 %v3752_v25, %v1958_v50  ;;  %v552_v2 = vmul.f32 %v3722_v5, %v5201_v36  ;;  %v681_v34 = vmul.f32 %v5204_v40, %v3725_v7  ;;  %v937_v4 = vadd.f32 %v3735_v15, %v808_v22  ;;  %v5256_v50 = vld [vmem:[%s3711_s19 + $0x2c0] sm:$0xff] }
 0x18f   : > { %v2340_v44 = vmul.f32 0.5, %v3287_v58  ;;  %v1702_v60 = vadd.f32 %v1574_v6, %v1445_v32  ;;  %v1575_v48 = vmul.f32 %v3740_v17, %v1317_v24  ;;  %v3289_v57 = vpop.eup %3288  ;;  %v1447_v16 = vmul.f32 %v3729_v10, %v5133_v42  ;;  %v5262_v22 = vld [vmem:[%s3711_s19 + $0x6c0] sm:$0xff] }
 0x190   : > { %3298 = vtanh.f32 %v2087_v38  ;;  %v1833_v3 = vmul.f32 %v5139_v33, %v3742_v18  ;;  %v809_v9 = vadd.f32 %v681_v34, %v552_v2  ;;  %v1190_v1 = vmul.f32 0.5, %v3289_v57 }
 0x191   : > { %v3291_v37 = vpop.eup %3290  ;;  %v2468_v20 = vadd.f32 0.5, %v2340_v44  ;;  %v1959_v21 = vadd.f32 %v1831_v63, %v1702_v60  ;;  %v1703_v19 = vadd.f32 %v1575_v48, %v1446_v0  ;;  %3300 = vtanh.f32 %v937_v4  ;;  %v5241_v63 = vld [vmem:[%s3711_s19 + $0x6b8] sm:$0xff] }
 0x192   : > { %v2341_v32 = vmul.f32 0.5, %v3291_v37  ;;  %v938_v28 = vadd.f32 %v3735_v15, %v809_v9  ;;  %v553_v42 = vmul.f32 %v3722_v5, %v5221_v62  ;;  %v1318_v39 = vadd.f32 0.5, %v1190_v1 }
 0x193   : > { %v3293_v61 = vpop.eup %3292  ;;  %2596 = vst [vmem:[%s3924_s30 + $0x258] sm:$0xff] %v2468_v20  ;;  %v2088_v33 = vadd.f32 %v3752_v25, %v1959_v21  ;;  %v1960_v30 = vadd.f32 %v1832_v26, %v1703_v19  ;;  %v682_v41 = vmul.f32 %v5228_v35, %v3725_v7  ;;  %v1448_v55 = vmul.f32 %v3729_v10, %v5146_v56 }
 0x194   : > { %v2469_v43 = vadd.f32 0.5, %v2341_v32  ;;  %v1191_v46 = vmul.f32 0.5, %v3293_v61  ;;  %3302 = vtanh.f32 %v938_v28  ;;  %v1576_v29 = vmul.f32 %v3740_v17, %v1318_v39 }
 0x195   : > { %3304 = vtanh.f32 %v2088_v33  ;;  %v2089_v52 = vadd.f32 %v3752_v25, %v1960_v30  ;;  %v810_v13 = vadd.f32 %v682_v41, %v553_v42  ;;  %v1834_v11 = vmul.f32 %v5152_v47, %v3742_v18 }
 0x196   : > { %v3295_v31 = vpop.eup %3294  ;;  %2597 = vst [vmem:[%s3924_s30 + $0x260] sm:$0xff] %v2469_v43  ;;  %v1319_v8 = vadd.f32 0.5, %v1191_v46  ;;  %v554_v27 = vmul.f32 %v3722_v5, %v5238_v59  ;;  %v683_v56 = vmul.f32 %v5241_v63, %v3725_v7  ;;  %v1704_v49 = vadd.f32 %v1576_v29, %v1447_v16  ;;  %v5294_v29 = vld [vmem:[%s3711_s19 + $0x2d0] sm:$0xff] }
 0x197   : > { %v3297_v51 = vpop.eup %3296  ;;  %v2342_v53 = vmul.f32 0.5, %v3295_v31  ;;  %3306 = vtanh.f32 %v2089_v52  ;;  %v939_v54 = vadd.f32 %v3735_v15, %v810_v13  ;;  %v1449_v47 = vmul.f32 %v3729_v10, %v5167_v23  ;;  %v5297_v13 = vld [vmem:[%s3711_s19 + $0x6d0] sm:$0xff] }
 0x198   : > { %v1577_v0 = vmul.f32 %v3740_v17, %v1319_v8  ;;  %v1192_v6 = vmul.f32 0.5, %v3297_v51  ;;  %v811_v24 = vadd.f32 %v683_v56, %v554_v27  ;;  %v1961_v38 = vadd.f32 %v1833_v3, %v1704_v49  ;;  %v5279_v3 = vld [vmem:[%s3711_s19 + $0x6c8] sm:$0xff] }
 0x199   : > { %v2470_v58 = vadd.f32 0.5, %v2342_v53  ;;  %v1835_v26 = vmul.f32 %v5172_v12, %v3742_v18  ;;  %3308 = vtanh.f32 %v939_v54  ;;  %v555_v48 = vmul.f32 %v3722_v5, %v5256_v50  ;;  %v5276_v12 = vld [vmem:[%s3711_s19 + $0x2c8] sm:$0xff] }
 0x19a   : > { %v3299_v2 = vpop.eup %3298  ;;  %v1705_v34 = vadd.f32 %v1577_v0, %v1448_v55  ;;  %v1320_v44 = vadd.f32 0.5, %v1192_v6  ;;  %v940_v60 = vadd.f32 %v3735_v15, %v811_v24  ;;  %v2090_v4 = vadd.f32 %v3752_v25, %v1961_v38  ;;  %v5310_v24 = vld [vmem:[%s3711_s19 + $0x2d8] sm:$0xff] }
 0x19b   : > { %2598 = vst [vmem:[%s3924_s30 + $0x268] sm:$0xff] %v2470_v58  ;;  %v2343_v23 = vmul.f32 0.5, %v3299_v2  ;;  %v1450_v57 = vmul.f32 %v3729_v10, %v5180_v14  ;;  %v684_v16 = vmul.f32 %v5262_v22, %v3725_v7  ;;  %v3301_v9 = vpop.eup %3300  ;;  %v1836_v21 = vmul.f32 %v5192_v45, %v3742_v18 }
 0x19c   : > { %v1962_v37 = vadd.f32 %v1834_v11, %v1705_v34  ;;  %v1578_v20 = vmul.f32 %v3740_v17, %v1320_v44  ;;  %3310 = vtanh.f32 %v940_v60  ;;  %v1193_v1 = vmul.f32 0.5, %v3301_v9 }
 0x19d   : > { %v2471_v19 = vadd.f32 0.5, %v2343_v23  ;;  %3312 = vtanh.f32 %v2090_v4  ;;  %v812_v14 = vadd.f32 %v684_v16, %v555_v48  ;;  %v556_v61 = vmul.f32 %v3722_v5, %v5276_v12 }
 0x19e   : > { %v3303_v32 = vpop.eup %3302  ;;  %v2091_v28 = vadd.f32 %v3752_v25, %v1962_v37  ;;  %v1706_v42 = vadd.f32 %v1578_v20, %v1449_v47  ;;  %v685_v33 = vmul.f32 %v5279_v3, %v3725_v7  ;;  %v1321_v45 = vadd.f32 0.5, %v1193_v1 }
 0x19f   : > { %v3305_v30 = vpop.eup %3304  ;;  %2599 = vst [vmem:[%s3924_s30 + $0x270] sm:$0xff] %v2471_v19  ;;  %v1194_v39 = vmul.f32 0.5, %v3303_v32  ;;  %v1451_v41 = vmul.f32 %v3729_v10, %v5201_v36  ;;  %v941_v43 = vadd.f32 %v3735_v15, %v812_v14  ;;  %v1837_v36 = vmul.f32 %v5204_v40, %v3742_v18  ;;  %v5313_v40 = vld [vmem:[%s3711_s19 + $0x6d8] sm:$0xff]  ;;  %v5331_v14 = vld [vmem:[%s3711_s19 + $0x2e0] sm:$0xff] }
 0x1a0   : > { %v2344_v46 = vmul.f32 0.5, %v3305_v30  ;;  %3314 = vtanh.f32 %v2091_v28  ;;  %v1963_v55 = vadd.f32 %v1835_v26, %v1706_v42  ;;  %v813_v52 = vadd.f32 %v685_v33, %v556_v61  ;;  %v5337_v61 = vld [vmem:[%s3711_s19 + $0x6e0] sm:$0xff] }
 0x1a1   : > { %v3307_v31 = vpop.eup %3306  ;;  %v1579_v8 = vmul.f32 %v3740_v17, %v1321_v45  ;;  %v1322_v11 = vadd.f32 0.5, %v1194_v39  ;;  %3316 = vtanh.f32 %v941_v43  ;;  %v557_v6 = vmul.f32 %v3722_v5, %v5294_v29 }
 0x1a2   : > { %v2472_v27 = vadd.f32 0.5, %v2344_v46  ;;  %v2345_v56 = vmul.f32 0.5, %v3307_v31  ;;  %v2092_v51 = vadd.f32 %v3752_v25, %v1963_v55  ;;  %v942_v53 = vadd.f32 %v3735_v15, %v813_v52  ;;  %v5344_v55 = vld [vmem:[%s3711_s19 + $0x2e8] sm:$0xff] }
 0x1a3   : > { %v3309_v49 = vpop.eup %3308  ;;  %v1707_v54 = vadd.f32 %v1579_v8, %v1450_v57  ;;  %v1580_v0 = vmul.f32 %v3740_v17, %v1322_v11  ;;  %v686_v47 = vmul.f32 %v5297_v13, %v3725_v7  ;;  %v1452_v26 = vmul.f32 %v3729_v10, %v5221_v62  ;;  %v5350_v8 = vld [vmem:[%s3711_s19 + $0x6e8] sm:$0xff] }
 0x1a4   : > { %2600 = vst [vmem:[%s3924_s30 + $0x278] sm:$0xff] %v2472_v27  ;;  %v2473_v58 = vadd.f32 0.5, %v2345_v56  ;;  %3318 = vtanh.f32 %v2092_v51  ;;  %v1195_v38 = vmul.f32 0.5, %v3309_v49  ;;  %v1838_v23 = vmul.f32 %v5228_v35, %v3742_v18 }
 0x1a5   : > { %v1964_v2 = vadd.f32 %v1836_v21, %v1707_v54  ;;  %v1708_v34 = vadd.f32 %v1580_v0, %v1451_v41  ;;  %3320 = vtanh.f32 %v942_v53  ;;  %v814_v44 = vadd.f32 %v686_v47, %v557_v6 }
 0x1a6   : > { %v3311_v60 = vpop.eup %3310  ;;  %2601 = vst [vmem:[%s3924_s30 + $0x280] sm:$0xff] %v2473_v58  ;;  %v1323_v48 = vadd.f32 0.5, %v1195_v38  ;;  %v558_v4 = vmul.f32 %v3722_v5, %v5310_v24  ;;  %v687_v57 = vmul.f32 %v5313_v40, %v3725_v7  ;;  %v1453_v35 = vmul.f32 %v3729_v10, %v5238_v59 }
 0x1a7   : > { %v3313_v16 = vpop.eup %3312  ;;  %v2093_v62 = vadd.f32 %v3752_v25, %v1964_v2  ;;  %v1965_v9 = vadd.f32 %v1837_v36, %v1708_v34  ;;  %v1196_v37 = vmul.f32 0.5, %v3311_v60  ;;  %v943_v20 = vadd.f32 %v3735_v15, %v814_v44  ;;  %v5370_v44 = vld [vmem:[%s3711_s19 + $0x6f0] sm:$0xff] }
 0x1a8   : > { %v2346_v21 = vmul.f32 0.5, %v3313_v16  ;;  %v1581_v19 = vmul.f32 %v3740_v17, %v1323_v48  ;;  %v815_v1 = vadd.f32 %v687_v57, %v558_v4  ;;  %v1839_v42 = vmul.f32 %v5241_v63, %v3742_v18 }
 0x1a9   : > { %3322 = vtanh.f32 %v2093_v62  ;;  %v2094_v32 = vadd.f32 %v3752_v25, %v1965_v9  ;;  %v1324_v28 = vadd.f32 0.5, %v1196_v37  ;;  %v559_v46 = vmul.f32 %v3722_v5, %v5331_v14  ;;  %v5378_v62 = vld [vmem:[%s3711_s19 + $0x2f8] sm:$0xff] }
 0x1aa   : > { %v3315_v33 = vpop.eup %3314  ;;  %v2474_v30 = vadd.f32 0.5, %v2346_v21  ;;  %v1709_v45 = vadd.f32 %v1581_v19, %v1452_v26  ;;  %3324 = vtanh.f32 %v943_v20  ;;  %v944_v59 = vadd.f32 %v3735_v15, %v815_v1 }
 0x1ab   : > { %v3317_v39 = vpop.eup %3316  ;;  %v2347_v41 = vmul.f32 0.5, %v3315_v33  ;;  %3326 = vtanh.f32 %v2094_v32  ;;  %v1582_v43 = vmul.f32 %v3740_v17, %v1324_v28  ;;  %v688_v31 = vmul.f32 %v5337_v61, %v3725_v7  ;;  %v5390_v28 = vld [vmem:[%s3711_s19 + $0x6f8] sm:$0xff] }
 0x1ac   : > { %2602 = vst [vmem:[%s3924_s30 + $0x288] sm:$0xff] %v2474_v30  ;;  %v1966_v63 = vadd.f32 %v1838_v23, %v1709_v45  ;;  %v1197_v52 = vmul.f32 0.5, %v3317_v39  ;;  %3328 = vtanh.f32 %v944_v59  ;;  %v1454_v27 = vmul.f32 %v3729_v10, %v5256_v50 }
 0x1ad   : > { %v2475_v11 = vadd.f32 0.5, %v2347_v41  ;;  %v1710_v36 = vadd.f32 %v1582_v43, %v1453_v35  ;;  %v1840_v56 = vmul.f32 %v5262_v22, %v3742_v18  ;;  %v816_v54 = vadd.f32 %v688_v31, %v559_v46  ;;  %v5365_v22 = vld [vmem:[%s3711_s19 + $0x2f0] sm:$0xff]  ;;  %v5399_v31 = vld [vmem:[%s3711_s19 + $0x300] sm:$0xff] }
 0x1ae   : > { %v3319_v51 = vpop.eup %3318  ;;  %v2095_v53 = vadd.f32 %v3752_v25, %v1966_v63  ;;  %v1325_v49 = vadd.f32 0.5, %v1197_v52  ;;  %v560_v0 = vmul.f32 %v3722_v5, %v5344_v55  ;;  %v1455_v38 = vmul.f32 %v3729_v10, %v5276_v12 }
 0x1af   : > { %v3321_v6 = vpop.eup %3320  ;;  %2603 = vst [vmem:[%s3924_s30 + $0x290] sm:$0xff] %v2475_v11  ;;  %v2348_v47 = vmul.f32 0.5, %v3319_v51  ;;  %v1967_v58 = vadd.f32 %v1839_v42, %v1710_v36  ;;  %v689_v50 = vmul.f32 %v5350_v8, %v3725_v7  ;;  %v945_v34 = vadd.f32 %v3735_v15, %v816_v54  ;;  %v5402_v11 = vld [vmem:[%s3711_s19 + $0x700] sm:$0xff] }
 0x1b0   : > { %3330 = vtanh.f32 %v2095_v53  ;;  %v1583_v26 = vmul.f32 %v3740_v17, %v1325_v49  ;;  %v1198_v2 = vmul.f32 0.5, %v3321_v6  ;;  %v1841_v12 = vmul.f32 %v5279_v3, %v3742_v18 }
 0x1b1   : > { %v2476_v60 = vadd.f32 0.5, %v2348_v47  ;;  %v2096_v48 = vadd.f32 %v3752_v25, %v1967_v58  ;;  %v817_v23 = vadd.f32 %v689_v50, %v560_v0  ;;  %3332 = vtanh.f32 %v945_v34 }
 0x1b2   : > { %v1711_v4 = vadd.f32 %v1583_v26, %v1454_v27  ;;  %v1326_v57 = vadd.f32 0.5, %v1198_v2  ;;  %v561_v16 = vmul.f32 %v3722_v5, %v5365_v22  ;;  %v1456_v37 = vmul.f32 %v3729_v10, %v5294_v29  ;;  %v5419_v2 = vld [vmem:[%s3711_s19 + $0x308] sm:$0xff] }
 0x1b3   : > { %v3323_v9 = vpop.eup %3322  ;;  %2604 = vst [vmem:[%s3924_s30 + $0x298] sm:$0xff] %v2476_v60  ;;  %3334 = vtanh.f32 %v2096_v48  ;;  %v946_v20 = vadd.f32 %v3735_v15, %v817_v23  ;;  %v690_v3 = vmul.f32 %v5370_v44, %v3725_v7  ;;  %v1842_v32 = vmul.f32 %v5297_v13, %v3742_v18 }
 0x1b4   : > { %v3325_v21 = vpop.eup %3324  ;;  %v2349_v19 = vmul.f32 0.5, %v3323_v9  ;;  %v1968_v35 = vadd.f32 %v1840_v56, %v1711_v4  ;;  %v1584_v1 = vmul.f32 %v3740_v17, %v1326_v57  ;;  %v562_v30 = vmul.f32 %v3722_v5, %v5378_v62 }
 0x1b5   : > { %v3327_v42 = vpop.eup %3326  ;;  %v1199_v29 = vmul.f32 0.5, %v3325_v21  ;;  %3336 = vtanh.f32 %v946_v20  ;;  %v818_v33 = vadd.f32 %v690_v3, %v561_v16  ;;  %v691_v52 = vmul.f32 %v5390_v28, %v3725_v7 }
 0x1b6   : > { %v3329_v45 = vpop.eup %3328  ;;  %v2477_v59 = vadd.f32 0.5, %v2349_v19  ;;  %v2350_v39 = vmul.f32 0.5, %v3327_v42  ;;  %v2097_v41 = vadd.f32 %v3752_v25, %v1968_v35  ;;  %v1712_v43 = vadd.f32 %v1584_v1, %v1455_v38  ;;  %v5436_v1 = vld [vmem:[%s3711_s19 + $0x310] sm:$0xff] }
 0x1b7   : > { %v1327_v46 = vadd.f32 0.5, %v1199_v29  ;;  %v1200_v13 = vmul.f32 0.5, %v3329_v45  ;;  %v947_v63 = vadd.f32 %v3735_v15, %v818_v33  ;;  %v1457_v56 = vmul.f32 %v3729_v10, %v5310_v24 }
 0x1b8   : > { %2605 = vst [vmem:[%s3924_s30 + $0x2a0] sm:$0xff] %v2477_v59  ;;  %v2478_v36 = vadd.f32 0.5, %v2350_v39  ;;  %3338 = vtanh.f32 %v2097_v41  ;;  %v1969_v27 = vadd.f32 %v1841_v12, %v1712_v43  ;;  %v819_v49 = vadd.f32 %v691_v52, %v562_v30  ;;  %v5426_v12 = vld [vmem:[%s3711_s19 + $0x708] sm:$0xff] }
 0x1b9   : > { %v1585_v51 = vmul.f32 %v3740_v17, %v1327_v46  ;;  %v1328_v53 = vadd.f32 0.5, %v1200_v13  ;;  %3340 = vtanh.f32 %v947_v63  ;;  %v1843_v6 = vmul.f32 %v5313_v40, %v3742_v18 }
 0x1ba   : > { %v3331_v54 = vpop.eup %3330  ;;  %2606 = vst [vmem:[%s3924_s30 + $0x2a8] sm:$0xff] %v2478_v36  ;;  %v2098_v0 = vadd.f32 %v3752_v25, %v1969_v27  ;;  %v563_v47 = vmul.f32 %v3722_v5, %v5399_v31  ;;  %v692_v58 = vmul.f32 %v5402_v11, %v3725_v7  ;;  %v948_v26 = vadd.f32 %v3735_v15, %v819_v49  ;;  %v5454_v27 = vld [vmem:[%s3711_s19 + $0x318] sm:$0xff] }
 0x1bb   : > { %v2351_v24 = vmul.f32 0.5, %v3331_v54  ;;  %v1713_v38 = vadd.f32 %v1585_v51, %v1456_v37  ;;  %v1586_v50 = vmul.f32 %v3740_v17, %v1328_v53  ;;  %v3333_v34 = vpop.eup %3332  ;;  %v1458_v40 = vmul.f32 %v3729_v10, %v5331_v14  ;;  %v5460_v49 = vld [vmem:[%s3711_s19 + $0x718] sm:$0xff] }
 0x1bc   : > { %3342 = vtanh.f32 %v2098_v0  ;;  %v1844_v60 = vmul.f32 %v5337_v61, %v3742_v18  ;;  %v820_v48 = vadd.f32 %v692_v58, %v563_v47  ;;  %v1201_v9 = vmul.f32 0.5, %v3333_v34 }
 0x1bd   : > { %v3335_v23 = vpop.eup %3334  ;;  %v2479_v4 = vadd.f32 0.5, %v2351_v24  ;;  %v1970_v57 = vadd.f32 %v1842_v32, %v1713_v38  ;;  %v1714_v16 = vadd.f32 %v1586_v50, %v1457_v56  ;;  %3344 = vtanh.f32 %v948_v26  ;;  %v5439_v32 = vld [vmem:[%s3711_s19 + $0x710] sm:$0xff] }
 0x1be   : > { %v2352_v37 = vmul.f32 0.5, %v3335_v23  ;;  %v949_v20 = vadd.f32 %v3735_v15, %v820_v48  ;;  %v564_v14 = vmul.f32 %v3722_v5, %v5419_v2  ;;  %v1329_v19 = vadd.f32 0.5, %v1201_v9 }
 0x1bf   : > { %v3337_v3 = vpop.eup %3336  ;;  %2607 = vst [vmem:[%s3924_s30 + $0x2b0] sm:$0xff] %v2479_v4  ;;  %v2099_v61 = vadd.f32 %v3752_v25, %v1970_v57  ;;  %v1971_v21 = vadd.f32 %v1843_v6, %v1714_v16  ;;  %v693_v35 = vmul.f32 %v5426_v12, %v3725_v7  ;;  %v1459_v33 = vmul.f32 %v3729_v10, %v5344_v55 }
 0x1c0   : > { %v2480_v42 = vadd.f32 0.5, %v2352_v37  ;;  %v1202_v29 = vmul.f32 0.5, %v3337_v3  ;;  %3346 = vtanh.f32 %v949_v20  ;;  %v1587_v45 = vmul.f32 %v3740_v17, %v1329_v19 }
 0x1c1   : > { %3348 = vtanh.f32 %v2099_v61  ;;  %v2100_v30 = vadd.f32 %v3752_v25, %v1971_v21  ;;  %v821_v59 = vadd.f32 %v693_v35, %v564_v14  ;;  %v1845_v43 = vmul.f32 %v5350_v8, %v3742_v18 }
 0x1c2   : > { %v3339_v39 = vpop.eup %3338  ;;  %2608 = vst [vmem:[%s3924_s30 + $0x2b8] sm:$0xff] %v2480_v42  ;;  %v1330_v41 = vadd.f32 0.5, %v1202_v29  ;;  %v565_v46 = vmul.f32 %v3722_v5, %v5436_v1  ;;  %v694_v55 = vmul.f32 %v5439_v32, %v3725_v7  ;;  %v1715_v52 = vadd.f32 %v1587_v45, %v1458_v40  ;;  %v5492_v45 = vld [vmem:[%s3711_s19 + $0x328] sm:$0xff] }
 0x1c3   : > { %v3341_v13 = vpop.eup %3340  ;;  %v2353_v63 = vmul.f32 0.5, %v3339_v39  ;;  %3350 = vtanh.f32 %v2100_v30  ;;  %v950_v36 = vadd.f32 %v3735_v15, %v821_v59  ;;  %v1460_v8 = vmul.f32 %v3729_v10, %v5365_v22  ;;  %v5495_v59 = vld [vmem:[%s3711_s19 + $0x728] sm:$0xff] }
 0x1c4   : > { %v1588_v56 = vmul.f32 %v3740_v17, %v1330_v41  ;;  %v1203_v51 = vmul.f32 0.5, %v3341_v13  ;;  %v822_v53 = vadd.f32 %v694_v55, %v565_v46  ;;  %v1972_v0 = vadd.f32 %v1844_v60, %v1715_v52  ;;  %v5477_v60 = vld [vmem:[%s3711_s19 + $0x720] sm:$0xff] }
 0x1c5   : > { %v2481_v54 = vadd.f32 0.5, %v2353_v63  ;;  %v1846_v6 = vmul.f32 %v5370_v44, %v3742_v18  ;;  %3352 = vtanh.f32 %v950_v36  ;;  %v566_v50 = vmul.f32 %v3722_v5, %v5454_v27  ;;  %v5474_v44 = vld [vmem:[%s3711_s19 + $0x320] sm:$0xff] }
 0x1c6   : > { %v3343_v47 = vpop.eup %3342  ;;  %v1716_v58 = vadd.f32 %v1588_v56, %v1459_v33  ;;  %v1331_v24 = vadd.f32 0.5, %v1203_v51  ;;  %v951_v38 = vadd.f32 %v3735_v15, %v822_v53  ;;  %v2101_v26 = vadd.f32 %v3752_v25, %v1972_v0  ;;  %v5508_v53 = vld [vmem:[%s3711_s19 + $0x330] sm:$0xff] }
 0x1c7   : > { %2609 = vst [vmem:[%s3924_s30 + $0x2c0] sm:$0xff] %v2481_v54  ;;  %v2354_v22 = vmul.f32 0.5, %v3343_v47  ;;  %v1461_v34 = vmul.f32 %v3729_v10, %v5378_v62  ;;  %v695_v40 = vmul.f32 %v5460_v49, %v3725_v7  ;;  %v3345_v48 = vpop.eup %3344  ;;  %v1847_v57 = vmul.f32 %v5390_v28, %v3742_v18 }
 0x1c8   : > { %v1973_v23 = vadd.f32 %v1845_v43, %v1716_v58  ;;  %v1589_v4 = vmul.f32 %v3740_v17, %v1331_v24  ;;  %3354 = vtanh.f32 %v951_v38  ;;  %v1204_v9 = vmul.f32 0.5, %v3345_v48 }
 0x1c9   : > { %v2482_v16 = vadd.f32 0.5, %v2354_v22  ;;  %3356 = vtanh.f32 %v2101_v26  ;;  %v823_v62 = vadd.f32 %v695_v40, %v566_v50  ;;  %v567_v3 = vmul.f32 %v3722_v5, %v5474_v44 }
 0x1ca   : > { %v3347_v37 = vpop.eup %3346  ;;  %v2102_v20 = vadd.f32 %v3752_v25, %v1973_v23  ;;  %v1717_v14 = vadd.f32 %v1589_v4, %v1460_v8  ;;  %v696_v61 = vmul.f32 %v5477_v60, %v3725_v7  ;;  %v1332_v28 = vadd.f32 0.5, %v1204_v9 }
 0x1cb   : > { %v3349_v21 = vpop.eup %3348  ;;  %2610 = vst [vmem:[%s3924_s30 + $0x2c8] sm:$0xff] %v2482_v16  ;;  %v1205_v19 = vmul.f32 0.5, %v3347_v37  ;;  %v1462_v35 = vmul.f32 %v3729_v10, %v5399_v31  ;;  %v952_v42 = vadd.f32 %v3735_v15, %v823_v62  ;;  %v1848_v31 = vmul.f32 %v5402_v11, %v3742_v18  ;;  %v5511_v11 = vld [vmem:[%s3711_s19 + $0x730] sm:$0xff]  ;;  %v5529_v62 = vld [vmem:[%s3711_s19 + $0x338] sm:$0xff] }
 0x1cc   : > { %v2355_v29 = vmul.f32 0.5, %v3349_v21  ;;  %3358 = vtanh.f32 %v2102_v20  ;;  %v1974_v33 = vadd.f32 %v1846_v6, %v1717_v14  ;;  %v824_v30 = vadd.f32 %v696_v61, %v567_v3  ;;  %v5535_v3 = vld [vmem:[%s3711_s19 + $0x738] sm:$0xff] }
 0x1cd   : > { %v3351_v39 = vpop.eup %3350  ;;  %v1590_v41 = vmul.f32 %v3740_v17, %v1332_v28  ;;  %v1333_v43 = vadd.f32 0.5, %v1205_v19  ;;  %3360 = vtanh.f32 %v952_v42  ;;  %v568_v51 = vmul.f32 %v3722_v5, %v5492_v45 }
 0x1ce   : > { %v2483_v46 = vadd.f32 0.5, %v2355_v29  ;;  %v2356_v55 = vmul.f32 0.5, %v3351_v39  ;;  %v2103_v13 = vadd.f32 %v3752_v25, %v1974_v33  ;;  %v953_v63 = vadd.f32 %v3735_v15, %v824_v30  ;;  %v5542_v33 = vld [vmem:[%s3711_s19 + $0x340] sm:$0xff] }
 0x1cf   : > { %v3353_v52 = vpop.eup %3352  ;;  %v1718_v36 = vadd.f32 %v1590_v41, %v1461_v34  ;;  %v1591_v56 = vmul.f32 %v3740_v17, %v1333_v43  ;;  %v697_v8 = vmul.f32 %v5495_v59, %v3725_v7  ;;  %v1463_v6 = vmul.f32 %v3729_v10, %v5419_v2  ;;  %v5548_v41 = vld [vmem:[%s3711_s19 + $0x740] sm:$0xff] }
 0x1d0   : > { %2611 = vst [vmem:[%s3924_s30 + $0x2d0] sm:$0xff] %v2483_v46  ;;  %v2484_v54 = vadd.f32 0.5, %v2356_v55  ;;  %3362 = vtanh.f32 %v2103_v13  ;;  %v1206_v0 = vmul.f32 0.5, %v3353_v52  ;;  %v1849_v22 = vmul.f32 %v5426_v12, %v3742_v18 }
 0x1d1   : > { %v1975_v47 = vadd.f32 %v1847_v57, %v1718_v36  ;;  %v1719_v58 = vadd.f32 %v1591_v56, %v1462_v35  ;;  %3364 = vtanh.f32 %v953_v63  ;;  %v825_v24 = vadd.f32 %v697_v8, %v568_v51 }
 0x1d2   : > { %v3355_v38 = vpop.eup %3354  ;;  %2612 = vst [vmem:[%s3924_s30 + $0x2d8] sm:$0xff] %v2484_v54  ;;  %v1334_v50 = vadd.f32 0.5, %v1206_v0  ;;  %v569_v26 = vmul.f32 %v3722_v5, %v5508_v53  ;;  %v698_v34 = vmul.f32 %v5511_v11, %v3725_v7  ;;  %v1464_v12 = vmul.f32 %v3729_v10, %v5436_v1 }
 0x1d3   : > { %v3357_v40 = vpop.eup %3356  ;;  %v2104_v2 = vadd.f32 %v3752_v25, %v1975_v47  ;;  %v1976_v48 = vadd.f32 %v1848_v31, %v1719_v58  ;;  %v1207_v23 = vmul.f32 0.5, %v3355_v38  ;;  %v954_v4 = vadd.f32 %v3735_v15, %v825_v24  ;;  %v5568_v24 = vld [vmem:[%s3711_s19 + $0x748] sm:$0xff] }
 0x1d4   : > { %v2357_v57 = vmul.f32 0.5, %v3357_v40  ;;  %v1592_v16 = vmul.f32 %v3740_v17, %v1334_v50  ;;  %v826_v9 = vadd.f32 %v698_v34, %v569_v26  ;;  %v1850_v14 = vmul.f32 %v5439_v32, %v3742_v18 }
 0x1d5   : > { %3366 = vtanh.f32 %v2104_v2  ;;  %v2105_v37 = vadd.f32 %v3752_v25, %v1976_v48  ;;  %v1335_v20 = vadd.f32 0.5, %v1207_v23  ;;  %v570_v29 = vmul.f32 %v3722_v5, %v5529_v62  ;;  %v5576_v2 = vld [vmem:[%s3711_s19 + $0x350] sm:$0xff] }
 0x1d6   : > { %v3359_v61 = vpop.eup %3358  ;;  %v2485_v21 = vadd.f32 0.5, %v2357_v57  ;;  %v1720_v28 = vadd.f32 %v1592_v16, %v1463_v6  ;;  %3368 = vtanh.f32 %v954_v4  ;;  %v955_v1 = vadd.f32 %v3735_v15, %v826_v9 }
 0x1d7   : > { %v3361_v19 = vpop.eup %3360  ;;  %v2358_v35 = vmul.f32 0.5, %v3359_v61  ;;  %3370 = vtanh.f32 %v2105_v37  ;;  %v1593_v42 = vmul.f32 %v3740_v17, %v1335_v20  ;;  %v699_v39 = vmul.f32 %v5535_v3, %v3725_v7  ;;  %v5588_v20 = vld [vmem:[%s3711_s19 + $0x750] sm:$0xff] }
 0x1d8   : > { %2613 = vst [vmem:[%s3924_s30 + $0x2e0] sm:$0xff] %v2485_v21  ;;  %v1977_v32 = vadd.f32 %v1849_v22, %v1720_v28  ;;  %v1208_v30 = vmul.f32 0.5, %v3361_v19  ;;  %3372 = vtanh.f32 %v955_v1  ;;  %v1465_v46 = vmul.f32 %v3729_v10, %v5454_v27 }
 0x1d9   : > { %v2486_v43 = vadd.f32 0.5, %v2358_v35  ;;  %v1721_v31 = vadd.f32 %v1593_v42, %v1464_v12  ;;  %v1851_v55 = vmul.f32 %v5460_v49, %v3742_v18  ;;  %v827_v36 = vadd.f32 %v699_v39, %v570_v29  ;;  %v5563_v49 = vld [vmem:[%s3711_s19 + $0x348] sm:$0xff]  ;;  %v5597_v39 = vld [vmem:[%s3711_s19 + $0x358] sm:$0xff] }
 0x1da   : > { %v3363_v13 = vpop.eup %3362  ;;  %v2106_v63 = vadd.f32 %v3752_v25, %v1977_v32  ;;  %v1336_v52 = vadd.f32 0.5, %v1208_v30  ;;  %v571_v56 = vmul.f32 %v3722_v5, %v5542_v33  ;;  %v1466_v0 = vmul.f32 %v3729_v10, %v5474_v44 }
 0x1db   : > { %v3365_v51 = vpop.eup %3364  ;;  %2614 = vst [vmem:[%s3924_s30 + $0x2e8] sm:$0xff] %v2486_v43  ;;  %v2359_v8 = vmul.f32 0.5, %v3363_v13  ;;  %v1978_v54 = vadd.f32 %v1850_v14, %v1721_v31  ;;  %v700_v27 = vmul.f32 %v5548_v41, %v3725_v7  ;;  %v956_v58 = vadd.f32 %v3735_v15, %v827_v36  ;;  %v5600_v43 = vld [vmem:[%s3711_s19 + $0x758] sm:$0xff] }
 0x1dc   : > { %3374 = vtanh.f32 %v2106_v63  ;;  %v1594_v6 = vmul.f32 %v3740_v17, %v1336_v52  ;;  %v1209_v47 = vmul.f32 0.5, %v3365_v51  ;;  %v1852_v44 = vmul.f32 %v5477_v60, %v3742_v18 }
 0x1dd   : > { %v2487_v38 = vadd.f32 0.5, %v2359_v8  ;;  %v2107_v50 = vadd.f32 %v3752_v25, %v1978_v54  ;;  %v828_v22 = vadd.f32 %v700_v27, %v571_v56  ;;  %3376 = vtanh.f32 %v956_v58 }
 0x1de   : > { %v1722_v26 = vadd.f32 %v1594_v6, %v1465_v46  ;;  %v1337_v34 = vadd.f32 0.5, %v1209_v47  ;;  %v572_v40 = vmul.f32 %v3722_v5, %v5563_v49  ;;  %v1467_v23 = vmul.f32 %v3729_v10, %v5492_v45  ;;  %v5617_v47 = vld [vmem:[%s3711_s19 + $0x360] sm:$0xff] }
 0x1df   : > { %v3367_v48 = vpop.eup %3366  ;;  %2615 = vst [vmem:[%s3924_s30 + $0x2f0] sm:$0xff] %v2487_v38  ;;  %3378 = vtanh.f32 %v2107_v50  ;;  %v957_v4 = vadd.f32 %v3735_v15, %v828_v22  ;;  %v701_v60 = vmul.f32 %v5568_v24, %v3725_v7  ;;  %v1853_v37 = vmul.f32 %v5495_v59, %v3742_v18 }
 0x1e0   : > { %v3369_v57 = vpop.eup %3368  ;;  %v2360_v16 = vmul.f32 0.5, %v3367_v48  ;;  %v1979_v12 = vadd.f32 %v1851_v55, %v1722_v26  ;;  %v1595_v9 = vmul.f32 %v3740_v17, %v1337_v34  ;;  %v573_v21 = vmul.f32 %v3722_v5, %v5576_v2 }
 0x1e1   : > { %v3371_v14 = vpop.eup %3370  ;;  %v1210_v45 = vmul.f32 0.5, %v3369_v57  ;;  %3380 = vtanh.f32 %v957_v4  ;;  %v829_v61 = vadd.f32 %v701_v60, %v572_v40  ;;  %v702_v30 = vmul.f32 %v5588_v20, %v3725_v7 }
 0x1e2   : > { %v3373_v28 = vpop.eup %3372  ;;  %v2488_v1 = vadd.f32 0.5, %v2360_v16  ;;  %v2361_v19 = vmul.f32 0.5, %v3371_v14  ;;  %v2108_v35 = vadd.f32 %v3752_v25, %v1979_v12  ;;  %v1723_v42 = vadd.f32 %v1595_v9, %v1466_v0  ;;  %v5634_v9 = vld [vmem:[%s3711_s19 + $0x368] sm:$0xff] }
 0x1e3   : > { %v1338_v29 = vadd.f32 0.5, %v1210_v45  ;;  %v1211_v59 = vmul.f32 0.5, %v3373_v28  ;;  %v958_v32 = vadd.f32 %v3735_v15, %v829_v61  ;;  %v1468_v55 = vmul.f32 %v3729_v10, %v5508_v53 }
 0x1e4   : > { %2616 = vst [vmem:[%s3924_s30 + $0x2f8] sm:$0xff] %v2488_v1  ;;  %v2489_v31 = vadd.f32 0.5, %v2361_v19  ;;  %3382 = vtanh.f32 %v2108_v35  ;;  %v1980_v46 = vadd.f32 %v1852_v44, %v1723_v42  ;;  %v830_v52 = vadd.f32 %v702_v30, %v573_v21  ;;  %v5624_v44 = vld [vmem:[%s3711_s19 + $0x760] sm:$0xff] }
 0x1e5   : > { %v1596_v13 = vmul.f32 %v3740_v17, %v1338_v29  ;;  %v1339_v63 = vadd.f32 0.5, %v1211_v59  ;;  %3384 = vtanh.f32 %v958_v32  ;;  %v1854_v51 = vmul.f32 %v5511_v11, %v3742_v18 }
 0x1e6   : > { %v3375_v36 = vpop.eup %3374  ;;  %2617 = vst [vmem:[%s3924_s30 + $0x300] sm:$0xff] %v2489_v31  ;;  %v2109_v56 = vadd.f32 %v3752_v25, %v1980_v46  ;;  %v574_v8 = vmul.f32 %v3722_v5, %v5597_v39  ;;  %v703_v54 = vmul.f32 %v5600_v43, %v3725_v7  ;;  %v959_v6 = vadd.f32 %v3735_v15, %v830_v52  ;;  %v5652_v46 = vld [vmem:[%s3711_s19 + $0x370] sm:$0xff] }
 0x1e7   : > { %v2362_v53 = vmul.f32 0.5, %v3375_v36  ;;  %v1724_v0 = vadd.f32 %v1596_v13, %v1467_v23  ;;  %v1597_v27 = vmul.f32 %v3740_v17, %v1339_v63  ;;  %v3377_v58 = vpop.eup %3376  ;;  %v1469_v11 = vmul.f32 %v3729_v10, %v5529_v62  ;;  %v5658_v52 = vld [vmem:[%s3711_s19 + $0x770] sm:$0xff] }
 0x1e8   : > { %3386 = vtanh.f32 %v2109_v56  ;;  %v1855_v38 = vmul.f32 %v5535_v3, %v3742_v18  ;;  %v831_v50 = vadd.f32 %v703_v54, %v574_v8  ;;  %v1212_v48 = vmul.f32 0.5, %v3377_v58 }
 0x1e9   : > { %v3379_v22 = vpop.eup %3378  ;;  %v2490_v26 = vadd.f32 0.5, %v2362_v53  ;;  %v1981_v34 = vadd.f32 %v1853_v37, %v1724_v0  ;;  %v1725_v40 = vadd.f32 %v1597_v27, %v1468_v55  ;;  %3388 = vtanh.f32 %v959_v6  ;;  %v5637_v37 = vld [vmem:[%s3711_s19 + $0x768] sm:$0xff] }
 0x1ea   : > { %v2363_v23 = vmul.f32 0.5, %v3379_v22  ;;  %v960_v4 = vadd.f32 %v3735_v15, %v831_v50  ;;  %v575_v62 = vmul.f32 %v3722_v5, %v5617_v47  ;;  %v1340_v16 = vadd.f32 0.5, %v1212_v48 }
 0x1eb   : > { %v3381_v60 = vpop.eup %3380  ;;  %2618 = vst [vmem:[%s3924_s30 + $0x308] sm:$0xff] %v2490_v26  ;;  %v2110_v3 = vadd.f32 %v3752_v25, %v1981_v34  ;;  %v1982_v57 = vadd.f32 %v1854_v51, %v1725_v40  ;;  %v704_v12 = vmul.f32 %v5624_v44, %v3725_v7  ;;  %v1470_v61 = vmul.f32 %v3729_v10, %v5542_v33 }
 0x1ec   : > { %v2491_v14 = vadd.f32 0.5, %v2363_v23  ;;  %v1213_v45 = vmul.f32 0.5, %v3381_v60  ;;  %3390 = vtanh.f32 %v960_v4  ;;  %v1598_v28 = vmul.f32 %v3740_v17, %v1340_v16 }
 0x1ed   : > { %3392 = vtanh.f32 %v2110_v3  ;;  %v2111_v21 = vadd.f32 %v3752_v25, %v1982_v57  ;;  %v832_v1 = vadd.f32 %v704_v12, %v575_v62  ;;  %v1856_v42 = vmul.f32 %v5548_v41, %v3742_v18 }
 0x1ee   : > { %v3383_v19 = vpop.eup %3382  ;;  %2619 = vst [vmem:[%s3924_s30 + $0x310] sm:$0xff] %v2491_v14  ;;  %v1341_v35 = vadd.f32 0.5, %v1213_v45  ;;  %v576_v29 = vmul.f32 %v3722_v5, %v5634_v9  ;;  %v705_v33 = vmul.f32 %v5637_v37, %v3725_v7  ;;  %v1726_v30 = vadd.f32 %v1598_v28, %v1469_v11  ;;  %v5690_v28 = vld [vmem:[%s3711_s19 + $0x380] sm:$0xff] }
 0x1ef   : > { %v3385_v59 = vpop.eup %3384  ;;  %v2364_v32 = vmul.f32 0.5, %v3383_v19  ;;  %3394 = vtanh.f32 %v2111_v21  ;;  %v961_v31 = vadd.f32 %v3735_v15, %v832_v1  ;;  %v1471_v41 = vmul.f32 %v3729_v10, %v5563_v49  ;;  %v5693_v1 = vld [vmem:[%s3711_s19 + $0x780] sm:$0xff] }
 0x1f0   : > { %v1599_v55 = vmul.f32 %v3740_v17, %v1341_v35  ;;  %v1214_v13 = vmul.f32 0.5, %v3385_v59  ;;  %v833_v63 = vadd.f32 %v705_v33, %v576_v29  ;;  %v1983_v56 = vadd.f32 %v1855_v38, %v1726_v30  ;;  %v5675_v38 = vld [vmem:[%s3711_s19 + $0x778] sm:$0xff] }
 0x1f1   : > { %v2492_v36 = vadd.f32 0.5, %v2364_v32  ;;  %v1857_v51 = vmul.f32 %v5568_v24, %v3742_v18  ;;  %3396 = vtanh.f32 %v961_v31  ;;  %v577_v27 = vmul.f32 %v3722_v5, %v5652_v46  ;;  %v5672_v24 = vld [vmem:[%s3711_s19 + $0x378] sm:$0xff] }
 0x1f2   : > { %v3387_v8 = vpop.eup %3386  ;;  %v1727_v54 = vadd.f32 %v1599_v55, %v1470_v61  ;;  %v1342_v53 = vadd.f32 0.5, %v1214_v13  ;;  %v962_v0 = vadd.f32 %v3735_v15, %v833_v63  ;;  %v2112_v6 = vadd.f32 %v3752_v25, %v1983_v56  ;;  %v5706_v63 = vld [vmem:[%s3711_s19 + $0x388] sm:$0xff] }
 0x1f3   : > { %2620 = vst [vmem:[%s3924_s30 + $0x318] sm:$0xff] %v2492_v36  ;;  %v2365_v49 = vmul.f32 0.5, %v3387_v8  ;;  %v1472_v58 = vmul.f32 %v3729_v10, %v5576_v2  ;;  %v706_v11 = vmul.f32 %v5658_v52, %v3725_v7  ;;  %v3389_v50 = vpop.eup %3388  ;;  %v1858_v34 = vmul.f32 %v5588_v20, %v3742_v18 }
 0x1f4   : > { %v1984_v22 = vadd.f32 %v1856_v42, %v1727_v54  ;;  %v1600_v26 = vmul.f32 %v3740_v17, %v1342_v53  ;;  %3398 = vtanh.f32 %v962_v0  ;;  %v1215_v48 = vmul.f32 0.5, %v3389_v50 }
 0x1f5   : > { %v2493_v40 = vadd.f32 0.5, %v2365_v49  ;;  %3400 = vtanh.f32 %v2112_v6  ;;  %v834_v2 = vadd.f32 %v706_v11, %v577_v27  ;;  %v578_v60 = vmul.f32 %v3722_v5, %v5672_v24 }
 0x1f6   : > { %v3391_v23 = vpop.eup %3390  ;;  %v2113_v4 = vadd.f32 %v3752_v25, %v1984_v22  ;;  %v1728_v62 = vadd.f32 %v1600_v26, %v1471_v41  ;;  %v707_v3 = vmul.f32 %v5675_v38, %v3725_v7  ;;  %v1343_v20 = vadd.f32 0.5, %v1215_v48 }
 0x1f7   : > { %v3393_v57 = vpop.eup %3392  ;;  %2621 = vst [vmem:[%s3924_s30 + $0x320] sm:$0xff] %v2493_v40  ;;  %v1216_v16 = vmul.f32 0.5, %v3391_v23  ;;  %v1473_v12 = vmul.f32 %v3729_v10, %v5597_v39  ;;  %v963_v14 = vadd.f32 %v3735_v15, %v834_v2  ;;  %v1859_v39 = vmul.f32 %v5600_v43, %v3742_v18  ;;  %v5709_v43 = vld [vmem:[%s3711_s19 + $0x788] sm:$0xff]  ;;  %v5727_v2 = vld [vmem:[%s3711_s19 + $0x390] sm:$0xff] }
 0x1f8   : > { %v2366_v45 = vmul.f32 0.5, %v3393_v57  ;;  %3402 = vtanh.f32 %v2113_v4  ;;  %v1985_v61 = vadd.f32 %v1857_v51, %v1728_v62  ;;  %v835_v21 = vadd.f32 %v707_v3, %v578_v60  ;;  %v5733_v60 = vld [vmem:[%s3711_s19 + $0x790] sm:$0xff] }
 0x1f9   : > { %v3395_v19 = vpop.eup %3394  ;;  %v1601_v35 = vmul.f32 %v3740_v17, %v1343_v20  ;;  %v1344_v42 = vadd.f32 0.5, %v1216_v16  ;;  %3404 = vtanh.f32 %v963_v14  ;;  %v579_v13 = vmul.f32 %v3722_v5, %v5690_v28 }
 0x1fa   : > { %v2494_v29 = vadd.f32 0.5, %v2366_v45  ;;  %v2367_v33 = vmul.f32 0.5, %v3395_v19  ;;  %v2114_v59 = vadd.f32 %v3752_v25, %v1985_v61  ;;  %v964_v32 = vadd.f32 %v3735_v15, %v835_v21  ;;  %v5740_v61 = vld [vmem:[%s3711_s19 + $0x398] sm:$0xff] }
 0x1fb   : > { %v3397_v30 = vpop.eup %3396  ;;  %v1729_v31 = vadd.f32 %v1601_v35, %v1472_v58  ;;  %v1602_v55 = vmul.f32 %v3740_v17, %v1344_v42  ;;  %v708_v41 = vmul.f32 %v5693_v1, %v3725_v7  ;;  %v1474_v51 = vmul.f32 %v3729_v10, %v5617_v47  ;;  %v5746_v35 = vld [vmem:[%s3711_s19 + $0x798] sm:$0xff] }
 0x1fc   : > { %2622 = vst [vmem:[%s3924_s30 + $0x328] sm:$0xff] %v2494_v29  ;;  %v2495_v36 = vadd.f32 0.5, %v2367_v33  ;;  %3406 = vtanh.f32 %v2114_v59  ;;  %v1217_v56 = vmul.f32 0.5, %v3397_v30  ;;  %v1860_v49 = vmul.f32 %v5624_v44, %v3742_v18 }
 0x1fd   : > { %v1986_v8 = vadd.f32 %v1858_v34, %v1729_v31  ;;  %v1730_v54 = vadd.f32 %v1602_v55, %v1473_v12  ;;  %3408 = vtanh.f32 %v964_v32  ;;  %v836_v53 = vadd.f32 %v708_v41, %v579_v13 }
 0x1fe   : > { %v3399_v0 = vpop.eup %3398  ;;  %2623 = vst [vmem:[%s3924_s30 + $0x330] sm:$0xff] %v2495_v36  ;;  %v1345_v27 = vadd.f32 0.5, %v1217_v56  ;;  %v580_v6 = vmul.f32 %v3722_v5, %v5706_v63  ;;  %v709_v58 = vmul.f32 %v5709_v43, %v3725_v7  ;;  %v1475_v44 = vmul.f32 %v3729_v10, %v5634_v9 }
 0x1ff   : > { %v3401_v11 = vpop.eup %3400  ;;  %v2115_v47 = vadd.f32 %v3752_v25, %v1986_v8  ;;  %v1987_v50 = vadd.f32 %v1859_v39, %v1730_v54  ;;  %v1218_v22 = vmul.f32 0.5, %v3399_v0  ;;  %v965_v26 = vadd.f32 %v3735_v15, %v836_v53  ;;  %v5766_v53 = vld [vmem:[%s3711_s19 + $0x7a0] sm:$0xff] }
 0x200   : > { %v2368_v34 = vmul.f32 0.5, %v3401_v11  ;;  %v1603_v40 = vmul.f32 %v3740_v17, %v1345_v27  ;;  %v837_v48 = vadd.f32 %v709_v58, %v580_v6  ;;  %v1861_v62 = vmul.f32 %v5637_v37, %v3742_v18 }
 0x201   : > { %3410 = vtanh.f32 %v2115_v47  ;;  %v2116_v23 = vadd.f32 %v3752_v25, %v1987_v50  ;;  %v1346_v4 = vadd.f32 0.5, %v1218_v22  ;;  %v581_v45 = vmul.f32 %v3722_v5, %v5727_v2  ;;  %v5774_v47 = vld [vmem:[%s3711_s19 + $0x3a8] sm:$0xff] }
 0x202   : > { %v3403_v3 = vpop.eup %3402  ;;  %v2496_v57 = vadd.f32 0.5, %v2368_v34  ;;  %v1731_v20 = vadd.f32 %v1603_v40, %v1474_v51  ;;  %3412 = vtanh.f32 %v965_v26  ;;  %v966_v9 = vadd.f32 %v3735_v15, %v837_v48 }
 0x203   : > { %v3405_v16 = vpop.eup %3404  ;;  %v2369_v12 = vmul.f32 0.5, %v3403_v3  ;;  %3414 = vtanh.f32 %v2116_v23  ;;  %v1604_v14 = vmul.f32 %v3740_v17, %v1346_v4  ;;  %v710_v19 = vmul.f32 %v5733_v60, %v3725_v7  ;;  %v5786_v4 = vld [vmem:[%s3711_s19 + $0x7a8] sm:$0xff] }
 0x204   : > { %2624 = vst [vmem:[%s3924_s30 + $0x338] sm:$0xff] %v2496_v57  ;;  %v1988_v37 = vadd.f32 %v1860_v49, %v1731_v20  ;;  %v1219_v21 = vmul.f32 0.5, %v3405_v16  ;;  %3416 = vtanh.f32 %v966_v9  ;;  %v1476_v29 = vmul.f32 %v3729_v10, %v5652_v46 }
 0x205   : > { %v2497_v42 = vadd.f32 0.5, %v2369_v12  ;;  %v1732_v39 = vadd.f32 %v1604_v14, %v1475_v44  ;;  %v1862_v33 = vmul.f32 %v5658_v52, %v3742_v18  ;;  %v838_v31 = vadd.f32 %v710_v19, %v581_v45  ;;  %v5761_v52 = vld [vmem:[%s3711_s19 + $0x3a0] sm:$0xff]  ;;  %v5795_v19 = vld [vmem:[%s3711_s19 + $0x3b0] sm:$0xff] }
 0x206   : > { %v3407_v59 = vpop.eup %3406  ;;  %v2117_v32 = vadd.f32 %v3752_v25, %v1988_v37  ;;  %v1347_v30 = vadd.f32 0.5, %v1219_v21  ;;  %v582_v55 = vmul.f32 %v3722_v5, %v5740_v61  ;;  %v1477_v56 = vmul.f32 %v3729_v10, %v5672_v24 }
 0x207   : > { %v3409_v13 = vpop.eup %3408  ;;  %2625 = vst [vmem:[%s3924_s30 + $0x340] sm:$0xff] %v2497_v42  ;;  %v2370_v41 = vmul.f32 0.5, %v3407_v59  ;;  %v1989_v36 = vadd.f32 %v1861_v62, %v1732_v39  ;;  %v711_v46 = vmul.f32 %v5746_v35, %v3725_v7  ;;  %v967_v54 = vadd.f32 %v3735_v15, %v838_v31  ;;  %v5798_v42 = vld [vmem:[%s3711_s19 + $0x7b0] sm:$0xff] }
 0x208   : > { %3418 = vtanh.f32 %v2117_v32  ;;  %v1605_v51 = vmul.f32 %v3740_v17, %v1347_v30  ;;  %v1220_v8 = vmul.f32 0.5, %v3409_v13  ;;  %v1863_v24 = vmul.f32 %v5675_v38, %v3742_v18 }
 0x209   : > { %v2498_v0 = vadd.f32 0.5, %v2370_v41  ;;  %v2118_v27 = vadd.f32 %v3752_v25, %v1989_v36  ;;  %v839_v49 = vadd.f32 %v711_v46, %v582_v55  ;;  %3420 = vtanh.f32 %v967_v54 }
 0x20a   : > { %v1733_v6 = vadd.f32 %v1605_v51, %v1476_v29  ;;  %v1348_v58 = vadd.f32 0.5, %v1220_v8  ;;  %v583_v11 = vmul.f32 %v3722_v5, %v5761_v52  ;;  %v1478_v22 = vmul.f32 %v3729_v10, %v5690_v28  ;;  %v5815_v8 = vld [vmem:[%s3711_s19 + $0x3b8] sm:$0xff] }
 0x20b   : > { %v3411_v50 = vpop.eup %3410  ;;  %2626 = vst [vmem:[%s3924_s30 + $0x348] sm:$0xff] %v2498_v0  ;;  %3422 = vtanh.f32 %v2118_v27  ;;  %v968_v26 = vadd.f32 %v3735_v15, %v839_v49  ;;  %v712_v38 = vmul.f32 %v5766_v53, %v3725_v7  ;;  %v1864_v23 = vmul.f32 %v5693_v1, %v3742_v18 }
 0x20c   : > { %v3413_v34 = vpop.eup %3412  ;;  %v2371_v40 = vmul.f32 0.5, %v3411_v50  ;;  %v1990_v44 = vadd.f32 %v1862_v33, %v1733_v6  ;;  %v1606_v48 = vmul.f32 %v3740_v17, %v1348_v58  ;;  %v584_v57 = vmul.f32 %v3722_v5, %v5774_v47 }
 0x20d   : > { %v3415_v62 = vpop.eup %3414  ;;  %v1221_v28 = vmul.f32 0.5, %v3413_v34  ;;  %3424 = vtanh.f32 %v968_v26  ;;  %v840_v3 = vadd.f32 %v712_v38, %v583_v11  ;;  %v713_v21 = vmul.f32 %v5786_v4, %v3725_v7 }
 0x20e   : > { %v3417_v20 = vpop.eup %3416  ;;  %v2499_v9 = vadd.f32 0.5, %v2371_v40  ;;  %v2372_v16 = vmul.f32 0.5, %v3415_v62  ;;  %v2119_v12 = vadd.f32 %v3752_v25, %v1990_v44  ;;  %v1734_v14 = vadd.f32 %v1606_v48, %v1477_v56  ;;  %v5832_v48 = vld [vmem:[%s3711_s19 + $0x3c0] sm:$0xff] }
 0x20f   : > { %v1349_v45 = vadd.f32 0.5, %v1221_v28  ;;  %v1222_v1 = vmul.f32 0.5, %v3417_v20  ;;  %v969_v37 = vadd.f32 %v3735_v15, %v840_v3  ;;  %v1479_v33 = vmul.f32 %v3729_v10, %v5706_v63 }
 0x210   : > { %2627 = vst [vmem:[%s3924_s30 + $0x350] sm:$0xff] %v2499_v9  ;;  %v2500_v39 = vadd.f32 0.5, %v2372_v16  ;;  %3426 = vtanh.f32 %v2119_v12  ;;  %v1991_v29 = vadd.f32 %v1863_v24, %v1734_v14  ;;  %v841_v30 = vadd.f32 %v713_v21, %v584_v57  ;;  %v5822_v24 = vld [vmem:[%s3711_s19 + $0x7b8] sm:$0xff] }
 0x211   : > { %v1607_v59 = vmul.f32 %v3740_v17, %v1349_v45  ;;  %v1350_v32 = vadd.f32 0.5, %v1222_v1  ;;  %3428 = vtanh.f32 %v969_v37  ;;  %v1865_v13 = vmul.f32 %v5709_v43, %v3742_v18 }
 0x212   : > { %v3419_v31 = vpop.eup %3418  ;;  %2628 = vst [vmem:[%s3924_s30 + $0x358] sm:$0xff] %v2500_v39  ;;  %v2120_v55 = vadd.f32 %v3752_v25, %v1991_v29  ;;  %v585_v41 = vmul.f32 %v3722_v5, %v5795_v19  ;;  %v714_v36 = vmul.f32 %v5798_v42, %v3725_v7  ;;  %v970_v51 = vadd.f32 %v3735_v15, %v841_v30  ;;  %v5850_v29 = vld [vmem:[%s3711_s19 + $0x3c8] sm:$0xff] }
 0x213   : > { %v2373_v63 = vmul.f32 0.5, %v3419_v31  ;;  %v1735_v56 = vadd.f32 %v1607_v59, %v1478_v22  ;;  %v1608_v46 = vmul.f32 %v3740_v17, %v1350_v32  ;;  %v3421_v54 = vpop.eup %3420  ;;  %v1480_v43 = vmul.f32 %v3729_v10, %v5727_v2  ;;  %v5856_v30 = vld [vmem:[%s3711_s19 + $0x7c8] sm:$0xff] }
 0x214   : > { %3430 = vtanh.f32 %v2120_v55  ;;  %v1866_v0 = vmul.f32 %v5733_v60, %v3742_v18  ;;  %v842_v27 = vadd.f32 %v714_v36, %v585_v41  ;;  %v1223_v50 = vmul.f32 0.5, %v3421_v54 }
 0x215   : > { %v3423_v49 = vpop.eup %3422  ;;  %v2501_v6 = vadd.f32 0.5, %v2373_v63  ;;  %v1992_v58 = vadd.f32 %v1864_v23, %v1735_v56  ;;  %v1736_v11 = vadd.f32 %v1608_v46, %v1479_v33  ;;  %3432 = vtanh.f32 %v970_v51  ;;  %v5835_v23 = vld [vmem:[%s3711_s19 + $0x7c0] sm:$0xff] }
 0x216   : > { %v2374_v22 = vmul.f32 0.5, %v3423_v49  ;;  %v971_v26 = vadd.f32 %v3735_v15, %v842_v27  ;;  %v586_v2 = vmul.f32 %v3722_v5, %v5815_v8  ;;  %v1351_v40 = vadd.f32 0.5, %v1223_v50 }
 0x217   : > { %v3425_v38 = vpop.eup %3424  ;;  %2629 = vst [vmem:[%s3924_s30 + $0x360] sm:$0xff] %v2501_v6  ;;  %v2121_v60 = vadd.f32 %v3752_v25, %v1992_v58  ;;  %v1993_v34 = vadd.f32 %v1865_v13, %v1736_v11  ;;  %v715_v44 = vmul.f32 %v5822_v24, %v3725_v7  ;;  %v1481_v3 = vmul.f32 %v3729_v10, %v5740_v61 }
 0x218   : > { %v2502_v62 = vadd.f32 0.5, %v2374_v22  ;;  %v1224_v28 = vmul.f32 0.5, %v3425_v38  ;;  %3434 = vtanh.f32 %v971_v26  ;;  %v1609_v20 = vmul.f32 %v3740_v17, %v1351_v40 }
 0x219   : > { %3436 = vtanh.f32 %v2121_v60  ;;  %v2122_v57 = vadd.f32 %v3752_v25, %v1993_v34  ;;  %v843_v9 = vadd.f32 %v715_v44, %v586_v2  ;;  %v1867_v14 = vmul.f32 %v5746_v35, %v3742_v18 }
 0x21a   : > { %v3427_v16 = vpop.eup %3426  ;;  %2630 = vst [vmem:[%s3924_s30 + $0x368] sm:$0xff] %v2502_v62  ;;  %v1352_v12 = vadd.f32 0.5, %v1224_v28  ;;  %v587_v45 = vmul.f32 %v3722_v5, %v5832_v48  ;;  %v716_v61 = vmul.f32 %v5835_v23, %v3725_v7  ;;  %v1737_v21 = vadd.f32 %v1609_v20, %v1480_v43  ;;  %v5888_v20 = vld [vmem:[%s3711_s19 + $0x3d8] sm:$0xff] }
 0x21b   : > { %v3429_v1 = vpop.eup %3428  ;;  %v2375_v37 = vmul.f32 0.5, %v3427_v16  ;;  %3438 = vtanh.f32 %v2122_v57  ;;  %v972_v39 = vadd.f32 %v3735_v15, %v843_v9  ;;  %v1482_v35 = vmul.f32 %v3729_v10, %v5761_v52  ;;  %v5891_v9 = vld [vmem:[%s3711_s19 + $0x7d8] sm:$0xff] }
 0x21c   : > { %v1610_v33 = vmul.f32 %v3740_v17, %v1352_v12  ;;  %v1225_v59 = vmul.f32 0.5, %v3429_v1  ;;  %v844_v32 = vadd.f32 %v716_v61, %v587_v45  ;;  %v1994_v55 = vadd.f32 %v1866_v0, %v1737_v21  ;;  %v5873_v0 = vld [vmem:[%s3711_s19 + $0x7d0] sm:$0xff] }
 0x21d   : > { %v2503_v31 = vadd.f32 0.5, %v2375_v37  ;;  %v1868_v13 = vmul.f32 %v5766_v53, %v3742_v18  ;;  %3440 = vtanh.f32 %v972_v39  ;;  %v588_v46 = vmul.f32 %v3722_v5, %v5850_v29  ;;  %v5870_v53 = vld [vmem:[%s3711_s19 + $0x3d0] sm:$0xff] }
 0x21e   : > { %v3431_v41 = vpop.eup %3430  ;;  %v1738_v36 = vadd.f32 %v1610_v33, %v1481_v3  ;;  %v1353_v63 = vadd.f32 0.5, %v1225_v59  ;;  %v973_v56 = vadd.f32 %v3735_v15, %v844_v32  ;;  %v2123_v51 = vadd.f32 %v3752_v25, %v1994_v55  ;;  %v5904_v32 = vld [vmem:[%s3711_s19 + $0x3e0] sm:$0xff] }
 0x21f   : > { %2631 = vst [vmem:[%s3924_s30 + $0x370] sm:$0xff] %v2503_v31  ;;  %v2376_v52 = vmul.f32 0.5, %v3431_v41  ;;  %v1483_v54 = vmul.f32 %v3729_v10, %v5774_v47  ;;  %v717_v43 = vmul.f32 %v5856_v30, %v3725_v7  ;;  %v3433_v27 = vpop.eup %3432  ;;  %v1869_v58 = vmul.f32 %v5786_v4, %v3742_v18 }
 0x220   : > { %v1995_v49 = vadd.f32 %v1867_v14, %v1738_v36  ;;  %v1611_v6 = vmul.f32 %v3740_v17, %v1353_v63  ;;  %3442 = vtanh.f32 %v973_v56  ;;  %v1226_v50 = vmul.f32 0.5, %v3433_v27 }
 0x221   : > { %v2504_v11 = vadd.f32 0.5, %v2376_v52  ;;  %3444 = vtanh.f32 %v2123_v51  ;;  %v845_v47 = vadd.f32 %v717_v43, %v588_v46  ;;  %v589_v38 = vmul.f32 %v3722_v5, %v5870_v53 }
 0x222   : > { %v3435_v22 = vpop.eup %3434  ;;  %v2124_v26 = vadd.f32 %v3752_v25, %v1995_v49  ;;  %v1739_v2 = vadd.f32 %v1611_v6, %v1482_v35  ;;  %v718_v60 = vmul.f32 %v5873_v0, %v3725_v7  ;;  %v1354_v4 = vadd.f32 0.5, %v1226_v50 }
 0x223   : > { %v3437_v34 = vpop.eup %3436  ;;  %2632 = vst [vmem:[%s3924_s30 + $0x378] sm:$0xff] %v2504_v11  ;;  %v1227_v40 = vmul.f32 0.5, %v3435_v22  ;;  %v1484_v44 = vmul.f32 %v3729_v10, %v5795_v19  ;;  %v974_v62 = vadd.f32 %v3735_v15, %v845_v47  ;;  %v1870_v19 = vmul.f32 %v5798_v42, %v3742_v18  ;;  %v5907_v42 = vld [vmem:[%s3711_s19 + $0x7e0] sm:$0xff]  ;;  %v5925_v47 = vld [vmem:[%s3711_s19 + $0x3e8] sm:$0xff] }
 0x224   : > { %v2377_v28 = vmul.f32 0.5, %v3437_v34  ;;  %3446 = vtanh.f32 %v2124_v26  ;;  %v1996_v3 = vadd.f32 %v1868_v13, %v1739_v2  ;;  %v846_v57 = vadd.f32 %v718_v60, %v589_v38  ;;  %v5931_v38 = vld [vmem:[%s3711_s19 + $0x7e8] sm:$0xff] }
 0x225   : > { %v3439_v16 = vpop.eup %3438  ;;  %v1612_v12 = vmul.f32 %v3740_v17, %v1354_v4  ;;  %v1355_v14 = vadd.f32 0.5, %v1227_v40  ;;  %3448 = vtanh.f32 %v974_v62  ;;  %v590_v59 = vmul.f32 %v3722_v5, %v5888_v20 }
 0x226   : > { %v2505_v45 = vadd.f32 0.5, %v2377_v28  ;;  %v2378_v61 = vmul.f32 0.5, %v3439_v16  ;;  %v2125_v1 = vadd.f32 %v3752_v25, %v1996_v3  ;;  %v975_v37 = vadd.f32 %v3735_v15, %v846_v57  ;;  %v5938_v3 = vld [vmem:[%s3711_s19 + $0x3f0] sm:$0xff] }
 0x227   : > { %v3441_v21 = vpop.eup %3440  ;;  %v1740_v39 = vadd.f32 %v1612_v12, %v1483_v54  ;;  %v1613_v33 = vmul.f32 %v3740_v17, %v1355_v14  ;;  %v719_v35 = vmul.f32 %v5891_v9, %v3725_v7  ;;  %v1485_v13 = vmul.f32 %v3729_v10, %v5815_v8  ;;  %v5944_v12 = vld [vmem:[%s3711_s19 + $0x7f0] sm:$0xff] }
 0x228   : > { %2633 = vst [vmem:[%s3924_s30 + $0x380] sm:$0xff] %v2505_v45  ;;  %v2506_v31 = vadd.f32 0.5, %v2378_v61  ;;  %3450 = vtanh.f32 %v2125_v1  ;;  %v1228_v55 = vmul.f32 0.5, %v3441_v21  ;;  %v1871_v52 = vmul.f32 %v5822_v24, %v3742_v18 }
 0x229   : > { %v1997_v41 = vadd.f32 %v1869_v58, %v1740_v39  ;;  %v1741_v36 = vadd.f32 %v1613_v33, %v1484_v44  ;;  %3452 = vtanh.f32 %v975_v37  ;;  %v847_v63 = vadd.f32 %v719_v35, %v590_v59 }
 0x22a   : > { %v3443_v56 = vpop.eup %3442  ;;  %2634 = vst [vmem:[%s3924_s30 + $0x388] sm:$0xff] %v2506_v31  ;;  %v1356_v46 = vadd.f32 0.5, %v1228_v55  ;;  %v591_v51 = vmul.f32 %v3722_v5, %v5904_v32  ;;  %v720_v54 = vmul.f32 %v5907_v42, %v3725_v7  ;;  %v1486_v24 = vmul.f32 %v3729_v10, %v5832_v48 }
 0x22b   : > { %v3445_v43 = vpop.eup %3444  ;;  %v2126_v8 = vadd.f32 %v3752_v25, %v1997_v41  ;;  %v1998_v27 = vadd.f32 %v1870_v19, %v1741_v36  ;;  %v1229_v49 = vmul.f32 0.5, %v3443_v56  ;;  %v976_v6 = vadd.f32 %v3735_v15, %v847_v63  ;;  %v5962_v63 = vld [vmem:[%s3711_s19 + $0x7f8] sm:$0xff] }
 0x22c   : > { %v2379_v58 = vmul.f32 0.5, %v3445_v43  ;;  %v1614_v11 = vmul.f32 %v3740_v17, %v1356_v46  ;;  %v848_v50 = vadd.f32 %v720_v54, %v591_v51  ;;  %v1872_v2 = vmul.f32 %v5835_v23, %v3742_v18 }
 0x22d   : > { %3454 = vtanh.f32 %v2126_v8  ;;  %v2127_v22 = vadd.f32 %v3752_v25, %v1998_v27  ;;  %v1357_v26 = vadd.f32 0.5, %v1229_v49  ;;  %v592_v28 = vmul.f32 %v3722_v5, %v5925_v47 }
 0x22e   : > { %v3447_v60 = vpop.eup %3446  ;;  %v2507_v34 = vadd.f32 0.5, %v2379_v58  ;;  %v1742_v4 = vadd.f32 %v1614_v11, %v1485_v13  ;;  %3456 = vtanh.f32 %v976_v6  ;;  %v977_v48 = vadd.f32 %v3735_v15, %v848_v50 }
 0x22f   : > { %v3449_v40 = vpop.eup %3448  ;;  %v2380_v44 = vmul.f32 0.5, %v3447_v60  ;;  %3458 = vtanh.f32 %v2127_v22  ;;  %v1615_v62 = vmul.f32 %v3740_v17, %v1357_v26  ;;  %v721_v16 = vmul.f32 %v5931_v38, %v3725_v7 }
 0x230   : > { %2635 = vst [vmem:[%s3924_s30 + $0x390] sm:$0xff] %v2507_v34  ;;  %v1999_v23 = vadd.f32 %v1871_v52, %v1742_v4  ;;  %v1230_v57 = vmul.f32 0.5, %v3449_v40  ;;  %3460 = vtanh.f32 %v977_v48  ;;  %v1487_v45 = vmul.f32 %v3729_v10, %v5850_v29  ;;  %v5957_v29 = vld [vmem:[%s3711_s19 + $0x3f8] sm:$0xff]  ;;  %s3505_s19 = scalar_lea.vmem %s3504_s24, 32768 }
 0x231   : > { %v2508_v14 = vadd.f32 0.5, %v2380_v44  ;;  %v1743_v19 = vadd.f32 %v1615_v62, %v1486_v24  ;;  %v849_v21 = vadd.f32 %v721_v16, %v592_v28  ;;  %v593_v39 = vmul.f32 %v3722_v5, %v5938_v3  ;;  %p3507_p2 = scmp.lt.s32.totalorder %s3505_s19, %s3499_s6 }
 0x232   : > { %v3451_v61 = vpop.eup %3450  ;;  %v2128_v1 = vadd.f32 %v3752_v25, %v1999_v23  ;;  %v1358_v37 = vadd.f32 0.5, %v1230_v57  ;;  %v1873_v31 = vmul.f32 %v5856_v30, %v3742_v18  ;;  %v722_v55 = vmul.f32 %v5944_v12, %v3725_v7 }
 0x233   : > { %v3453_v33 = vpop.eup %3452  ;;  %2636 = vst [vmem:[%s3924_s30 + $0x398] sm:$0xff] %v2508_v14  ;;  %v2381_v59 = vmul.f32 0.5, %v3451_v61  ;;  %v2000_v35 = vadd.f32 %v1872_v2, %v1743_v19  ;;  %v978_v36 = vadd.f32 %v3735_v15, %v849_v21  ;;  %v1488_v30 = vmul.f32 %v3729_v10, %v5870_v53  ;;  %p3508_p0 = por %p3507_p2, %p3506_p13 }
 0x234   : > { %3462 = vtanh.f32 %v2128_v1  ;;  %v1616_v13 = vmul.f32 %v3740_v17, %v1358_v37  ;;  %v1231_v41 = vmul.f32 0.5, %v3453_v33  ;;  %v850_v52 = vadd.f32 %v722_v55, %v593_v39 }
 0x235   : > { %v2509_v56 = vadd.f32 0.5, %v2381_v59  ;;  %v2129_v46 = vadd.f32 %v3752_v25, %v2000_v35  ;;  %3464 = vtanh.f32 %v978_v36  ;;  %v594_v43 = vmul.f32 %v3722_v5, %v5957_v29  ;;  %p3509_p3 = pnand %p3508_p0, %p3502_p6 }
 0x236   : > { %v1744_v51 = vadd.f32 %v1616_v13, %v1487_v45  ;;  %v1359_v54 = vadd.f32 0.5, %v1231_v41  ;;  %v979_v27 = vadd.f32 %v3735_v15, %v850_v52  ;;  %v723_v49 = vmul.f32 %v5962_v63, %v3725_v7 }
 0x237   : > { %v3455_v8 = vpop.eup %3454  ;;  %2637 = vst [vmem:[%s3924_s30 + $0x3a0] sm:$0xff] %v2509_v56  ;;  %3466 = vtanh.f32 %v2129_v46  ;;  %v1874_v24 = vmul.f32 %v5873_v0, %v3742_v18  ;;  %v1489_v48 = vmul.f32 %v3729_v10, %v5888_v20  ;;  %v1875_v28 = vmul.f32 %v5891_v9, %v3742_v18 }
 0x238   : > { %v3457_v6 = vpop.eup %3456  ;;  %v2382_v58 = vmul.f32 0.5, %v3455_v8  ;;  %v2001_v11 = vadd.f32 %v1873_v31, %v1744_v51  ;;  %v1617_v53 = vmul.f32 %v3740_v17, %v1359_v54  ;;  %3468 = vtanh.f32 %v979_v27 }
 0x239   : > { %v3459_v50 = vpop.eup %3458  ;;  %v1232_v22 = vmul.f32 0.5, %v3457_v6  ;;  %v851_v5 = vadd.f32 %v723_v49, %v594_v43  ;;  %v1490_v16 = vmul.f32 %v3729_v10, %v5904_v32  ;;  %v1876_v61 = vmul.f32 %v5907_v42, %v3742_v18 }
 0x23a   : > { %v3461_v26 = vpop.eup %3460  ;;  %v2510_v2 = vadd.f32 0.5, %v2382_v58  ;;  %v2383_v60 = vmul.f32 0.5, %v3459_v50  ;;  %v2130_v34 = vadd.f32 %v3752_v25, %v2001_v11  ;;  %v1745_v7 = vadd.f32 %v1617_v53, %v1488_v30 }
 0x23b   : > { %v1360_v4 = vadd.f32 0.5, %v1232_v22  ;;  %v1233_v40 = vmul.f32 0.5, %v3461_v26  ;;  %v980_v44 = vadd.f32 %v3735_v15, %v851_v5  ;;  %v1491_v13 = vmul.f32 %v3729_v10, %v5925_v47 }
 0x23c   : > { %2638 = vst [vmem:[%s3924_s30 + $0x3a8] sm:$0xff] %v2510_v2  ;;  %v2511_v0 = vadd.f32 0.5, %v2383_v60  ;;  %3470 = vtanh.f32 %v2130_v34  ;;  %v2002_v62 = vadd.f32 %v1874_v24, %v1745_v7  ;;  %v1877_v46 = vmul.f32 %v5931_v38, %v3742_v18 }
 0x23d   : > { %v1618_v23 = vmul.f32 %v3740_v17, %v1360_v4  ;;  %v1361_v57 = vadd.f32 0.5, %v1233_v40  ;;  %3472 = vtanh.f32 %v980_v44  ;;  %v1492_v51 = vmul.f32 %v3729_v10, %v5938_v3 }
 0x23e   : > { %v3463_v14 = vpop.eup %3462  ;;  %2639 = vst [vmem:[%s3924_s30 + $0x3b0] sm:$0xff] %v2511_v0  ;;  %v2131_v20 = vadd.f32 %v3752_v25, %v2002_v62  ;;  %v1878_v27 = vmul.f32 %v5944_v12, %v3742_v18  ;;  %v1493_v24 = vmul.f32 %v3729_v10, %v5957_v29  ;;  %v1879_v12 = vmul.f32 %v5962_v63, %v3742_v18 }
 0x23f   : > { %v2384_v15 = vmul.f32 0.5, %v3463_v14  ;;  %v1746_v19 = vadd.f32 %v1618_v23, %v1489_v48  ;;  %v1619_v45 = vmul.f32 %v3740_v17, %v1361_v57  ;;  %v3465_v9 = vpop.eup %3464 }
 0x240   : > { %3474 = vtanh.f32 %v2131_v20  ;;  %v1234_v32 = vmul.f32 0.5, %v3465_v9 }
 0x241   : > { %v3467_v1 = vpop.eup %3466  ;;  %v2512_v37 = vadd.f32 0.5, %v2384_v15  ;;  %v2003_v21 = vadd.f32 %v1875_v28, %v1746_v19  ;;  %v1747_v39 = vadd.f32 %v1619_v45, %v1490_v16 }
 0x242   : > { %v2385_v33 = vmul.f32 0.5, %v3467_v1  ;;  %v3469_v59 = vpop.eup %3468  ;;  %v1362_v55 = vadd.f32 0.5, %v1234_v32 }
 0x243   : > { %2640 = vst [vmem:[%s3924_s30 + $0x3b8] sm:$0xff] %v2512_v37  ;;  %v2132_v35 = vadd.f32 %v3752_v25, %v2003_v21  ;;  %v2004_v31 = vadd.f32 %v1876_v61, %v1747_v39  ;;  %v1235_v42 = vmul.f32 0.5, %v3469_v59 }
 0x244   : > { %v2513_v41 = vadd.f32 0.5, %v2385_v33  ;;  %v1620_v56 = vmul.f32 %v3740_v17, %v1362_v55 }
 0x245   : > { %3476 = vtanh.f32 %v2132_v35  ;;  %v2133_v36 = vadd.f32 %v3752_v25, %v2004_v31  ;;  %v1363_v52 = vadd.f32 0.5, %v1235_v42 }
 0x246   : > { %v3471_v30 = vpop.eup %3470  ;;  %2641 = vst [vmem:[%s3924_s30 + $0x3c0] sm:$0xff] %v2513_v41  ;;  %v1748_v47 = vadd.f32 %v1620_v56, %v1491_v13 }
 0x247   : > { %v3473_v54 = vpop.eup %3472  ;;  %v2386_v43 = vmul.f32 0.5, %v3471_v30  ;;  %3478 = vtanh.f32 %v2133_v36  ;;  %v1621_v8 = vmul.f32 %v3740_v17, %v1363_v52 }
 0x248   : > { %v1236_v49 = vmul.f32 0.5, %v3473_v54  ;;  %v2005_v58 = vadd.f32 %v1877_v46, %v1748_v47 }
 0x249   : > { %v2514_v6 = vadd.f32 0.5, %v2386_v43  ;;  %v1749_v11 = vadd.f32 %v1621_v8, %v1492_v51 }
 0x24a   : > { %v3475_v38 = vpop.eup %3474  ;;  %v1364_v53 = vadd.f32 0.5, %v1236_v49  ;;  %v2134_v50 = vadd.f32 %v3752_v25, %v2005_v58 }
 0x24b   : > { %2642 = vst [vmem:[%s3924_s30 + $0x3c8] sm:$0xff] %v2514_v6  ;;  %v2387_v3 = vmul.f32 0.5, %v3475_v38  ;;  %v2006_v22 = vadd.f32 %v1878_v27, %v1749_v11 }
 0x24c   : > { %v1622_v5 = vmul.f32 %v3740_v17, %v1364_v53  ;;  %3480 = vtanh.f32 %v2134_v50 }
 0x24d   : > { %v2515_v26 = vadd.f32 0.5, %v2387_v3  ;;  %v2135_v2 = vadd.f32 %v3752_v25, %v2006_v22 }
 0x24e   : > { %v1750_v60 = vadd.f32 %v1622_v5, %v1493_v24 }
 0x24f   : > { %v3477_v34 = vpop.eup %3476  ;;  %2643 = vst [vmem:[%s3924_s30 + $0x3d0] sm:$0xff] %v2515_v26  ;;  %3482 = vtanh.f32 %v2135_v2 }
 0x250   : > { %v2388_v10 = vmul.f32 0.5, %v3477_v34  ;;  %v2007_v29 = vadd.f32 %v1879_v12, %v1750_v60 }
 0x251   : > { %v3479_v7 = vpop.eup %3478 }
 0x252   : > { %v2516_v4 = vadd.f32 0.5, %v2388_v10  ;;  %v2389_v17 = vmul.f32 0.5, %v3479_v7  ;;  %v2136_v18 = vadd.f32 %v3752_v25, %v2007_v29 }
 0x254   : > { %2644 = vst [vmem:[%s3924_s30 + $0x3d8] sm:$0xff] %v2516_v4  ;;  %v2517_v63 = vadd.f32 0.5, %v2389_v17  ;;  %3484 = vtanh.f32 %v2136_v18 }
 0x256   : > { %2645 = vst [vmem:[%s3924_s30 + $0x3e0] sm:$0xff] %v2517_v63  ;;  %v3481_v48 = vpop.eup %3480 }
 0x257   : > { %v2390_v40 = vmul.f32 0.5, %v3481_v48 }
 0x259   : > { %v3483_v44 = vpop.eup %3482  ;;  %v2518_v0 = vadd.f32 0.5, %v2390_v40 }
 0x25a   : > { %v2391_v62 = vmul.f32 0.5, %v3483_v44 }
 0x25b   : > { %2646 = vst [vmem:[%s3924_s30 + $0x3e8] sm:$0xff] %v2518_v0 }
 0x25c   : > { %v2519_v28 = vadd.f32 0.5, %v2391_v62 }
 0x25e   : > { %v3485_v23 = vpop.eup %3484  ;;  %2647 = vst [vmem:[%s3924_s30 + $0x3f0] sm:$0xff] %v2519_v28 }
 0x25f   : > { %v2392_v57 = vmul.f32 0.5, %v3485_v23 }
 0x261   : > { %v2520_v25 = vadd.f32 0.5, %v2392_v57 }
 0x263   : > { %2648 = vst [vmem:[%s3924_s30 + $0x3f8] sm:$0xff] %v2520_v25 }
 0x264   : > { %3512 = shalt.err (!%p3509_p3)
}
 0x265   : > { %s3513_s23 = scalar_lea.hbm %s6024_s8, 16384  ;;  %s3517_s26 = scalar_lea.hbm %s6073_s2, 32768 }
 0x266   : > { %p3514_p7 = scmp.ne.s32.totalorder %s6024_s8, %s3513_s23  ;;  %p3518_p10 = scmp.lt.u32.totalorder %s6024_s8, %s6073_s2 }
 0x267   : > { %p3519_p4 = scmp.lt.u32.totalorder %s3517_s26, %s3513_s23  ;;  %p3521_p6 = scmp.lt.u32.totalorder %s3513_s23, %s6024_s8 }
 0x268   : > { %p3515_p8 = pnand %p3514_p7, %p3648_p11 }
 0x269   : > { %p3520_p5 = por %p3519_p4, %p3518_p10 }
 0x26a   : > { %p3516_p9 = pneg %p3515_p8 }
 0x26b   : > { %p3522_p13 = por %p3521_p6, %p3520_p5 }
 0x26d   : > { %p3523_p2 = pnand %p3522_p13, %p3516_p9 }
 0x26f   : > { %3526 = shalt.err (!%p3523_p2)
}
 0x270   : > { %s3579_s29 = smov 256   ;;  %s3580_s20 = smov 16  }
 0x271   : > { %2920 = dma.vmem_to_hbm [thread:$0]  (%p3648_p11), %s6026_s4, 16384, %s6024_s8, %s2650_s14, %s3579_s29, %s3579_s29, %s3580_s20  }
 0x272 PF: > { %s2679_s30 = sand.u32 1, %s3557_s9   ;;  %p2927_p0 = pnand %p2752_p1, %p3652_p12 }
 0x273   : > { %s2680_s3 = scalar_lea.sflag [#allocation4], %s2679_s30 }
 0x274   : > { %3552 = dma.done.wait (!%p2927_p0), %s2680_s3, 16384  }
 0x275   : > { %3554 = vsyncadd (!%p2927_p0), %s2680_s3, 4294950912  ;;  %p16_p3 = scmp.ge.s32.totalorder %s3621_s15, 4   ;;  %s6079_s9 = smov %s3561_s10 }
 0x276   : > { %s6080_s10 = smov %s3565_s11  ;;  %s6081_s11 = smov %s3633_s18 }
 0x277   : > { %s6082_s12 = smov %s3621_s15  ;;  %18 = sbr.rel (!%p16_p3) target bundleno = 6 (0x6), region = 84 }
 0x27e   :  { %2685 = vsyncpa [#allocation3], 1 }
 0x27f   :  { %2687 = vsyncpa [#allocation3 + $0x1], 1 }
 0x280   :  { %2688 = vsyncpa [#allocation4], 1 }
 0x281   :  { %2690 = vsyncpa [#allocation4 + $0x1], 1 }
 0x282   :  { %2691 = vsyncpa [#allocation5], 1 }
 0x283   :  { %2693 = vsyncpa [#allocation5 + $0x1], 1 }

</bundles_post_ra>
